<compile_context>
chip_gen: v7x
topology: tpu7x:2x2x1
jax: 0.10.0
libtpu: 0.0.40
codegen_flags: <defaults>
</compile_context>

<pallas_src>
import math
import functools

import jax
import jax.numpy as jnp
from jax import lax
from jax.experimental import pallas as pl
from jax.experimental.pallas import tpu as pltpu

LN_EPS = 1e-5
LANE = 128
SUBLANE = 8


def _round_up(n, m):
    return ((n + m - 1) // m) * m


def _pad2(a, r, c):
    return jnp.pad(a, ((0, r - a.shape[0]), (0, c - a.shape[1])))


def _layernorm(v, gamma, beta):
    """Plain LayerNorm (used by the pure-JAX reference)."""
    mu = jnp.mean(v, axis=-1, keepdims=True)
    var = jnp.mean((v - mu) ** 2, axis=-1, keepdims=True)
    return (v - mu) * lax.rsqrt(var + LN_EPS) * gamma + beta


def _rnn_kernel(x0_ref,                      # (Bp, Dp)            first-timestep input
                wbig_ref,                    # (Dp+L*Hp, 2*L*Hp)   fused recurrent weight, bf16
                bias_ref,                    # (2L*Bp, Hp)         stacked bih|bhh (pre-broadcast)
                gamma_ref, beta_ref,         # (2L*Bp, Hp)         stacked LN params (pre-broadcast)
                who_ref,                     # (Hp, Dp)            output head weight, bf16
                bho_ref,                     # (Bp, Dp)            output head bias (pre-broadcast)
                out_ref,                     # (T, Bp, Dp)         output block for this time-chunk
                h_scratch,                   # VMEM (L*Bp, Hp)     recurrent state, layer l = rows [l*Bp:(l+1)*Bp]
                xin_scratch,                 # VMEM (Bp, Dp)       autoregressive input
                *, n_layers, h_valid, t_chunk):
    c = pl.program_id(0)
    L = n_layers
    Bp, Dp = xin_scratch.shape
    Hp = h_scratch.shape[1]

    @pl.when(c == 0)
    def _init():
        h_scratch[...] = jnp.zeros_like(h_scratch)
        xin_scratch[...] = x0_ref[...]        # only the first timestep of x is used

    # ---- loop-invariant hoists (params already pre-broadcast in the wrapper) ----
    bias_s = bias_ref[...]
    gamma_s = gamma_ref[...]
    beta_s = beta_ref[...]
    bho = bho_ref[...]
    w_big = wbig_ref[...]                     # bf16
    who = who_ref[...]                        # bf16
    inv_h = 1.0 / float(h_valid)

    # Recurrent state: one scratch read per grid step (not per timestep).
    x_in = xin_scratch[...]                   # (Bp, Dp) f32
    h_all = h_scratch[...]                    # (L*Bp, Hp) f32

    for i in range(t_chunk):                  # static unroll over the time chunk
        # Single fused MXU pass: ih of all layers + hh of all layers in one dot.
        lhs = jnp.concatenate(
            [x_in] + [h_all[l * Bp:(l + 1) * Bp] for l in range(L)], axis=-1
        ).astype(jnp.bfloat16)                                        # (Bp, Dp+L*Hp)
        y = jnp.dot(lhs, w_big, preferred_element_type=jnp.float32)   # (Bp, 2*L*Hp)

        # Restack the 2L branch blocks along sublanes so ONE batched LayerNorm covers
        # them all: rows [j*Bp:(j+1)*Bp] = branch j (j<L: ih layer j, j>=L: hh layer j-L),
        # matching the pre-stacked bias/gamma/beta layout.
        v = jnp.concatenate([y[:, j * Hp:(j + 1) * Hp] for j in range(2 * L)],
                            axis=0) + bias_s                          # (2L*Bp, Hp)

        # Batched LayerNorm; var = E[x^2] - mu^2 (independent lane reductions).
        # Padded lanes of v are exactly 0 and gamma/beta are zero-padded, so no mask.
        mu = jnp.sum(v, axis=-1, keepdims=True) * inv_h
        ex2 = jnp.sum(v * v, axis=-1, keepdims=True) * inv_h
        var = ex2 - mu * mu
        normed = (v - mu) * lax.rsqrt(var + LN_EPS) * gamma_s + beta_s

        h_all = jnp.tanh(normed[:L * Bp] + normed[L * Bp:])           # (L*Bp, Hp)
        h_last = h_all[(L - 1) * Bp:]                                 # (Bp, Hp)

        out_t = (jnp.dot(h_last.astype(jnp.bfloat16), who,
                         preferred_element_type=jnp.float32)
                 + bho + x_in)                # residual; requires d_out == d_in
        out_ref[i] = out_t.astype(out_ref.dtype)                      # lane-dense store
        x_in = out_t

    # Write state back once per grid step.
    xin_scratch[...] = x_in
    h_scratch[...] = h_all


def prepare_params(params, batch):
    """One-time weight prep: pad, fuse, pre-broadcast, cast to bf16.

    Hoisted out of rnn_pallas so the per-call wrapper does no weight work.
    """
    (wih, bih, gih, beih, whh, bhh, ghh, behh, who, bho) = params
    L, Din, H = wih.shape
    Dout = who.shape[1]
    assert Din == Dout, "residual `w_ho(h) + x_in` requires d_out == d_in"

    Dp = _round_up(Din, LANE)
    Hp = _round_up(H, LANE)
    Bp = _round_up(batch, SUBLANE)
    Kf = Dp + L * Hp
    Nf = 2 * L * Hp           # multiple of 256 whenever L*Hp is a multiple of 128

    f32, bf16 = jnp.float32, jnp.bfloat16

    # Fused recurrent weight: [ [Wih_0..Wih_{L-1}] |        0        ]
    #                         [        0           | blkdiag(Whh_l)  ]
    w_big = jnp.zeros((Kf, Nf), f32)
    wih_p = jnp.pad(wih.astype(f32), ((0, 0), (0, Dp - Din), (0, Hp - H)))   # (L, Dp, Hp)
    w_big = w_big.at[:Dp, :L * Hp].set(
        jnp.transpose(wih_p, (1, 0, 2)).reshape(Dp, L * Hp))
    whh_p = jnp.pad(whh.astype(f32), ((0, 0), (0, Hp - H), (0, Hp - H)))     # (L, Hp, Hp)
    for l in range(L):
        w_big = w_big.at[Dp + l * Hp:Dp + (l + 1) * Hp,
                         L * Hp + l * Hp:L * Hp + (l + 1) * Hp].set(whh_p[l])
    w_big = w_big.astype(bf16)

    def stack_rows(a_ih, a_hh):
        # (L,H) x2 -> (2L*Bp, Hp): branch-major rows, each branch broadcast over Bp rows
        a = jnp.concatenate([a_ih, a_hh], axis=0).astype(f32)        # (2L, H)
        a = jnp.pad(a, ((0, 0), (0, Hp - H)))                        # (2L, Hp)
        return jnp.repeat(a, Bp, axis=0)                             # (2L*Bp, Hp)

    bias_stack = stack_rows(bih, bhh)
    gamma_stack = stack_rows(gih, ghh)
    beta_stack = stack_rows(beih, behh)

    who_p = jnp.pad(who.astype(f32), ((0, Hp - H), (0, Dp - Dout))).astype(bf16)
    bho_b = jnp.broadcast_to(
        jnp.pad(bho.astype(f32), (0, Dp - Dout))[None, :], (Bp, Dp)) + jnp.zeros((Bp, Dp), f32)

    arrays = (w_big, bias_stack, gamma_stack, beta_stack, who_p, bho_b)
    meta = dict(L=L, H=H, Din=Din, Dout=Dout, Dp=Dp, Hp=Hp, Bp=Bp)
    return arrays, meta


def rnn_pallas(x, prep, *, t_chunk=8):
    """x: (seq_len, batch, d_in) float32; prep = prepare_params(params, batch)."""
    arrays, meta = prep
    (w_big, bias_stack, gamma_stack, beta_stack, who_p, bho_b) = arrays
    L, H = meta["L"], meta["H"]
    Din, Dout = meta["Din"], meta["Dout"]
    Dp, Hp, Bp = meta["Dp"], meta["Hp"], meta["Bp"]

    seq_len, B, Din_x = x.shape
    assert Din_x == Din and Bp == _round_up(B, SUBLANE)

    t_chunk = max(1, min(t_chunk, seq_len))
    n_chunks = pl.cdiv(seq_len, t_chunk)
    seq_pad = n_chunks * t_chunk          # extra autoregressive steps computed, discarded

    f32 = jnp.float32
    # Only x[0] is ever consumed (the model is autoregressive after t=0).
    x0p = _pad2(x[0].astype(f32), Bp, Dp)

    # Whole-array VMEM residency for weights / params (no double-buffering).
    vmem = pl.BlockSpec(memory_space=pltpu.MemorySpace.VMEM)
    kernel = functools.partial(_rnn_kernel, n_layers=L, h_valid=H, t_chunk=t_chunk)

    # Explicit VMEM budget (+headroom) — required for production (L,H) on v7x (64 MiB).
    resident = sum(int(a.size) * a.dtype.itemsize for a in (x0p,) + arrays)
    out_bytes = 2 * t_chunk * Bp * Dp * 4            # double-buffered output block
    scratch_bytes = (L * Bp * Hp + Bp * Dp) * 4
    vmem_limit = min(128 << 20,
                     max(32 << 20, 2 * (resident + out_bytes + scratch_bytes) + (8 << 20)))

    out = pl.pallas_call(
        kernel,
        out_shape=jax.ShapeDtypeStruct((seq_pad, Bp, Dp), f32),
        grid_spec=pltpu.PrefetchScalarGridSpec(
            num_scalar_prefetch=0,
            grid=(n_chunks,),
            in_specs=[vmem] * 7,
            out_specs=pl.BlockSpec((t_chunk, Bp, Dp), lambda c: (c, 0, 0)),
            scratch_shapes=[
                pltpu.VMEM((L * Bp, Hp), f32),   # h_{t-1}, layer l = rows [l*Bp:(l+1)*Bp]
                pltpu.VMEM((Bp, Dp), f32),       # autoregressive x_in
            ],
        ),
        compiler_params=pltpu.CompilerParams(
            dimension_semantics=("arbitrary",),  # time recurrence is sequential
            vmem_limit_bytes=int(vmem_limit)),
    )(x0p, w_big, bias_stack, gamma_stack, beta_stack, who_p, bho_b)

    return out[:seq_len, :B, :Dout]


def init_params(key, d_in, d_out, d_hidden, n_layers):
    """Deterministic init mirroring the PyTorch __init__ bounds (not its RNG)."""
    ks = jax.random.split(key, 7)
    bnd_h = math.sqrt(1.0 / d_hidden)
    wih = jax.random.uniform(ks[0], (n_layers, d_in, d_hidden), jnp.float32, -bnd_h, bnd_h)
    bih = jax.random.uniform(ks[1], (n_layers, d_hidden), jnp.float32,
                             -math.sqrt(1.0 / d_in), math.sqrt(1.0 / d_in))
    whh = jax.random.uniform(ks[2], (n_layers, d_hidden, d_hidden), jnp.float32, -bnd_h, bnd_h)
    bhh = jax.random.uniform(ks[3], (n_layers, d_hidden), jnp.float32, -bnd_h, bnd_h)
    gih = jnp.ones((n_layers, d_hidden), jnp.float32)
    beih = jnp.zeros((n_layers, d_hidden), jnp.float32)
    ghh = jnp.ones((n_layers, d_hidden), jnp.float32)
    behh = jnp.zeros((n_layers, d_hidden), jnp.float32)
    bnd_o = math.sqrt(1.0 / d_out)
    who = jax.random.uniform(ks[4], (d_hidden, d_out), jnp.float32, -bnd_o, bnd_o)
    bho = jax.random.uniform(ks[5], (d_out,), jnp.float32, -bnd_h, bnd_h)
    return (wih, bih, gih, beih, whh, bhh, ghh, behh, who, bho)


def rnn_reference(x, params, *, bf16_matmul=False):
    """Pure-JAX reference. With bf16_matmul=True the matmul operand precision matches
    the kernel (bf16 operands, f32 accumulation)."""
    (wih, bih, gih, beih, whh, bhh, ghh, behh, who, bho) = params
    seq_len, B, Din = x.shape
    L, _, H = wih.shape
    mm_dt = jnp.bfloat16 if bf16_matmul else jnp.float32

    def mm(a, w):
        return jnp.dot(a.astype(mm_dt), w.astype(mm_dt),
                       preferred_element_type=jnp.float32)

    h = [jnp.zeros((B, H), jnp.float32) for _ in range(L)]
    x_in = x[0]
    outs = []
    for t in range(seq_len):
        new_h = []
        for l in range(L):
            a = _layernorm(mm(x_in, wih[l]) + bih[l], gih[l], beih[l])
            b = _layernorm(mm(h[l], whh[l]) + bhh[l], ghh[l], behh[l])
            new_h.append(jnp.tanh(a + b))
        h = new_h
        out_t = mm(new_h[-1], who) + bho + x_in
        outs.append(out_t)
        x_in = out_t
    return jnp.stack(outs)


if __name__ == "__main__":
    d_in = d_out = 16     # residual `w_ho(h) + x_in` requires d_out == d_in
    d_hidden = 32
    n_layers = 2
    batch = 2
    seq_len = 8

    key = jax.random.PRNGKey(0)
    kx, kp = jax.random.split(key)
    x = jax.random.normal(kx, (seq_len, batch, d_in), jnp.float32)
    params = init_params(kp, d_in, d_out, d_hidden, n_layers)

    prep = prepare_params(params, batch)   # one-time weight prep, hoisted out of forward
    out = rnn_pallas(x, prep, t_chunk=4)   # 2 time-chunks -> exercises cross-chunk state carry
    out = jax.block_until_ready(out)

    # Reference at the kernel's matmul precision (bf16 operands, f32 accumulation).
    # Tolerance is loose-ish because bf16 rounding differences compound over the
    # 8-step autoregressive rollout; structural bugs produce O(1) errors.
    ref = rnn_reference(x, params, bf16_matmul=True)
    assert out.shape == (seq_len, batch, d_out)
    assert jnp.allclose(out, ref, rtol=5e-2, atol=5e-2), (
        f"max abs err {jnp.max(jnp.abs(out - ref))}")

    print("KERNEL_OK")
</pallas_src>

<mosaic_0001>
module attributes {stable_mosaic.version = 11 : i64} {
  func.func @_rnn_kernel(%arg0: i32, %arg1: memref<8x128xf32, #tpu.memory_space<vmem>>, %arg2: memref<384x512xbf16, #tpu.memory_space<vmem>>, %arg3: memref<32x128xf32, #tpu.memory_space<vmem>>, %arg4: memref<32x128xf32, #tpu.memory_space<vmem>>, %arg5: memref<32x128xf32, #tpu.memory_space<vmem>>, %arg6: memref<128x128xbf16, #tpu.memory_space<vmem>>, %arg7: memref<8x128xf32, #tpu.memory_space<vmem>>, %arg8: memref<4x8x128xf32, #tpu.memory_space<vmem>>, %arg9: memref<16x128xf32, #tpu.memory_space<vmem>>, %arg10: memref<8x128xf32, #tpu.memory_space<vmem>>) attributes {dimension_semantics = [#tpu.dimension_semantics<arbitrary>], iteration_bounds = array<i64: 2>, scalar_prefetch = 0 : i64, scratch_operands = 2 : i64, tpu.core_type = #tpu.core_type<tc>, window_params = [{pipeline_mode = #tpu.pipeline_mode<synchronous>, transform_indices = @transform_0, window_bounds = array<i64: 8, 128>}, {pipeline_mode = #tpu.pipeline_mode<synchronous>, transform_indices = @transform_1, window_bounds = array<i64: 384, 512>}, {pipeline_mode = #tpu.pipeline_mode<synchronous>, transform_indices = @transform_2, window_bounds = array<i64: 32, 128>}, {pipeline_mode = #tpu.pipeline_mode<synchronous>, transform_indices = @transform_3, window_bounds = array<i64: 32, 128>}, {pipeline_mode = #tpu.pipeline_mode<synchronous>, transform_indices = @transform_4, window_bounds = array<i64: 32, 128>}, {pipeline_mode = #tpu.pipeline_mode<synchronous>, transform_indices = @transform_5, window_bounds = array<i64: 128, 128>}, {pipeline_mode = #tpu.pipeline_mode<synchronous>, transform_indices = @transform_6, window_bounds = array<i64: 8, 128>}, {transform_indices = @transform_7, window_bounds = array<i64: 4, 8, 128>}]} {
    %c0_i32 = arith.constant 0 : i32
    %0 = arith.cmpi eq, %arg0, %c0_i32 : i32
    %1 = arith.extui %0 : i1 to i32
    %c0_i32_0 = arith.constant 0 : i32
    %2 = arith.cmpi ne, %1, %c0_i32_0 : i32
    scf.if %2 {
      %cst_56 = arith.constant 0.000000e+00 : f32
      %185 = vector.broadcast %cst_56 : f32 to vector<16x128xf32>
      %c0_57 = arith.constant 0 : index
      %c0_58 = arith.constant 0 : index
      %186 = vector.load %arg9[%c0_57, %c0_58] : memref<16x128xf32, #tpu.memory_space<vmem>>, vector<16x128xf32>
      tpu.vector_store %arg9[%c0_57, %c0_58], %185 {strides = array<i32>} : memref<16x128xf32, #tpu.memory_space<vmem>>, vector<16x128xf32>,
      %c0_59 = arith.constant 0 : index
      %c0_60 = arith.constant 0 : index
      %187 = vector.load %arg1[%c0_59, %c0_60] : memref<8x128xf32, #tpu.memory_space<vmem>>, vector<8x128xf32>
      %c0_61 = arith.constant 0 : index
      %c0_62 = arith.constant 0 : index
      %188 = vector.load %arg10[%c0_61, %c0_62] : memref<8x128xf32, #tpu.memory_space<vmem>>, vector<8x128xf32>
      tpu.vector_store %arg10[%c0_61, %c0_62], %187 {strides = array<i32>} : memref<8x128xf32, #tpu.memory_space<vmem>>, vector<8x128xf32>,
    } else {
    }
    %c0 = arith.constant 0 : index
    %c0_1 = arith.constant 0 : index
    %3 = vector.load %arg3[%c0, %c0_1] : memref<32x128xf32, #tpu.memory_space<vmem>>, vector<32x128xf32>
    %c0_2 = arith.constant 0 : index
    %c0_3 = arith.constant 0 : index
    %4 = vector.load %arg4[%c0_2, %c0_3] : memref<32x128xf32, #tpu.memory_space<vmem>>, vector<32x128xf32>
    %c0_4 = arith.constant 0 : index
    %c0_5 = arith.constant 0 : index
    %5 = vector.load %arg5[%c0_4, %c0_5] : memref<32x128xf32, #tpu.memory_space<vmem>>, vector<32x128xf32>
    %c0_6 = arith.constant 0 : index
    %c0_7 = arith.constant 0 : index
    %6 = vector.load %arg7[%c0_6, %c0_7] : memref<8x128xf32, #tpu.memory_space<vmem>>, vector<8x128xf32>
    %c0_8 = arith.constant 0 : index
    %c0_9 = arith.constant 0 : index
    %7 = vector.load %arg2[%c0_8, %c0_9] : memref<384x512xbf16, #tpu.memory_space<vmem>>, vector<384x512xbf16>
    %c0_10 = arith.constant 0 : index
    %c0_11 = arith.constant 0 : index
    %8 = vector.load %arg6[%c0_10, %c0_11] : memref<128x128xbf16, #tpu.memory_space<vmem>>, vector<128x128xbf16>
    %c0_12 = arith.constant 0 : index
    %c0_13 = arith.constant 0 : index
    %9 = vector.load %arg10[%c0_12, %c0_13] : memref<8x128xf32, #tpu.memory_space<vmem>>, vector<8x128xf32>
    %c0_14 = arith.constant 0 : index
    %c0_15 = arith.constant 0 : index
    %10 = vector.load %arg9[%c0_14, %c0_15] : memref<16x128xf32, #tpu.memory_space<vmem>>, vector<16x128xf32>
    %11 = vector.extract_strided_slice %10 {offsets = [0, 0], sizes = [8, 128], strides = [1, 1]} : vector<16x128xf32> to vector<8x128xf32>
    %12 = vector.extract_strided_slice %10 {offsets = [8, 0], sizes = [8, 128], strides = [1, 1]} : vector<16x128xf32> to vector<8x128xf32>
    %13 = tpu.concatenate %9, %11, %12 in 1 : vector<8x128xf32>, vector<8x128xf32>, vector<8x128xf32> -> vector<8x384xf32>
    %14 = arith.truncf %13 : vector<8x384xf32> to vector<8x384xbf16>
    %cst = arith.constant dense<0.000000e+00> : vector<8x512xf32>
    %15 = tpu.matmul %14, %7, %cst {dimension_numbers = #tpu.dot_dimension_numbers<[1], [0], [0], [1], [0, 0, 1, 1], [], []>} : vector<8x384xbf16>, vector<384x512xbf16>, vector<8x512xf32> -> vector<8x512xf32>
    %16 = vector.extract_strided_slice %15 {offsets = [0, 0], sizes = [8, 128], strides = [1, 1]} : vector<8x512xf32> to vector<8x128xf32>
    %17 = vector.extract_strided_slice %15 {offsets = [0, 128], sizes = [8, 128], strides = [1, 1]} : vector<8x512xf32> to vector<8x128xf32>
    %18 = vector.extract_strided_slice %15 {offsets = [0, 256], sizes = [8, 128], strides = [1, 1]} : vector<8x512xf32> to vector<8x128xf32>
    %19 = vector.extract_strided_slice %15 {offsets = [0, 384], sizes = [8, 128], strides = [1, 1]} : vector<8x512xf32> to vector<8x128xf32>
    %20 = tpu.concatenate %16, %17, %18, %19 in 0 : vector<8x128xf32>, vector<8x128xf32>, vector<8x128xf32>, vector<8x128xf32> -> vector<32x128xf32>
    %21 = arith.addf %20, %3 : vector<32x128xf32>
    %cst_16 = arith.constant dense<0.000000e+00> : vector<32xf32>
    %22 = vector.multi_reduction <add>, %21, %cst_16 [1] : vector<32x128xf32> to vector<32xf32>
    %23 = vector.shape_cast %22 : vector<32xf32> to vector<32x1xf32>
    %cst_17 = arith.constant 3.125000e-02 : f32
    %24 = vector.broadcast %cst_17 : f32 to vector<32x1xf32>
    %25 = arith.mulf %23, %24 : vector<32x1xf32>
    %26 = arith.mulf %21, %21 : vector<32x128xf32>
    %cst_18 = arith.constant dense<0.000000e+00> : vector<32xf32>
    %27 = vector.multi_reduction <add>, %26, %cst_18 [1] : vector<32x128xf32> to vector<32xf32>
    %28 = vector.shape_cast %27 : vector<32xf32> to vector<32x1xf32>
    %cst_19 = arith.constant 3.125000e-02 : f32
    %29 = vector.broadcast %cst_19 : f32 to vector<32x1xf32>
    %30 = arith.mulf %28, %29 : vector<32x1xf32>
    %31 = arith.mulf %25, %25 : vector<32x1xf32>
    %32 = arith.subf %30, %31 : vector<32x1xf32>
    %33 = vector.broadcast %25 : vector<32x1xf32> to vector<32x128xf32>
    %34 = arith.subf %21, %33 : vector<32x128xf32>
    %cst_20 = arith.constant 9.99999974E-6 : f32
    %35 = vector.broadcast %cst_20 : f32 to vector<32x1xf32>
    %36 = arith.addf %32, %35 : vector<32x1xf32>
    %37 = math.rsqrt %36 : vector<32x1xf32>
    %38 = vector.broadcast %37 : vector<32x1xf32> to vector<32x128xf32>
    %39 = arith.mulf %34, %38 : vector<32x128xf32>
    %40 = arith.mulf %39, %4 : vector<32x128xf32>
    %41 = arith.addf %40, %5 : vector<32x128xf32>
    %42 = vector.extract_strided_slice %41 {offsets = [0, 0], sizes = [16, 128], strides = [1, 1]} : vector<32x128xf32> to vector<16x128xf32>
    %43 = vector.extract_strided_slice %41 {offsets = [16, 0], sizes = [16, 128], strides = [1, 1]} : vector<32x128xf32> to vector<16x128xf32>
    %44 = arith.addf %42, %43 : vector<16x128xf32>
    %45 = math.tanh %44 : vector<16x128xf32>
    %46 = vector.extract_strided_slice %45 {offsets = [8, 0], sizes = [8, 128], strides = [1, 1]} : vector<16x128xf32> to vector<8x128xf32>
    %47 = arith.truncf %46 : vector<8x128xf32> to vector<8x128xbf16>
    %cst_21 = arith.constant dense<0.000000e+00> : vector<8x128xf32>
    %48 = tpu.matmul %47, %8, %cst_21 {dimension_numbers = #tpu.dot_dimension_numbers<[1], [0], [0], [1], [0, 0, 1, 1], [], []>} : vector<8x128xbf16>, vector<128x128xbf16>, vector<8x128xf32> -> vector<8x128xf32>
    %49 = arith.addf %48, %6 : vector<8x128xf32>
    %50 = arith.addf %49, %9 : vector<8x128xf32>
    %c0_22 = arith.constant 0 : index
    %c0_23 = arith.constant 0 : index
    %c0_24 = arith.constant 0 : index
    %51 = vector.load %arg8[%c0_22, %c0_23, %c0_24] : memref<4x8x128xf32, #tpu.memory_space<vmem>>, vector<1x8x128xf32>
    %52 = vector.shape_cast %51 : vector<1x8x128xf32> to vector<8x128xf32>
    %53 = vector.shape_cast %50 : vector<8x128xf32> to vector<1x8x128xf32>
    tpu.vector_store %arg8[%c0_22, %c0_23, %c0_24], %53 {strides = array<i32>} : memref<4x8x128xf32, #tpu.memory_space<vmem>>, vector<1x8x128xf32>,
    %54 = vector.extract_strided_slice %45 {offsets = [0, 0], sizes = [8, 128], strides = [1, 1]} : vector<16x128xf32> to vector<8x128xf32>
    %55 = vector.extract_strided_slice %45 {offsets = [8, 0], sizes = [8, 128], strides = [1, 1]} : vector<16x128xf32> to vector<8x128xf32>
    %56 = tpu.concatenate %50, %54, %55 in 1 : vector<8x128xf32>, vector<8x128xf32>, vector<8x128xf32> -> vector<8x384xf32>
    %57 = arith.truncf %56 : vector<8x384xf32> to vector<8x384xbf16>
    %cst_25 = arith.constant dense<0.000000e+00> : vector<8x512xf32>
    %58 = tpu.matmul %57, %7, %cst_25 {dimension_numbers = #tpu.dot_dimension_numbers<[1], [0], [0], [1], [0, 0, 1, 1], [], []>} : vector<8x384xbf16>, vector<384x512xbf16>, vector<8x512xf32> -> vector<8x512xf32>
    %59 = vector.extract_strided_slice %58 {offsets = [0, 0], sizes = [8, 128], strides = [1, 1]} : vector<8x512xf32> to vector<8x128xf32>
    %60 = vector.extract_strided_slice %58 {offsets = [0, 128], sizes = [8, 128], strides = [1, 1]} : vector<8x512xf32> to vector<8x128xf32>
    %61 = vector.extract_strided_slice %58 {offsets = [0, 256], sizes = [8, 128], strides = [1, 1]} : vector<8x512xf32> to vector<8x128xf32>
    %62 = vector.extract_strided_slice %58 {offsets = [0, 384], sizes = [8, 128], strides = [1, 1]} : vector<8x512xf32> to vector<8x128xf32>
    %63 = tpu.concatenate %59, %60, %61, %62 in 0 : vector<8x128xf32>, vector<8x128xf32>, vector<8x128xf32>, vector<8x128xf32> -> vector<32x128xf32>
    %64 = arith.addf %63, %3 : vector<32x128xf32>
    %cst_26 = arith.constant dense<0.000000e+00> : vector<32xf32>
    %65 = vector.multi_reduction <add>, %64, %cst_26 [1] : vector<32x128xf32> to vector<32xf32>
    %66 = vector.shape_cast %65 : vector<32xf32> to vector<32x1xf32>
    %cst_27 = arith.constant 3.125000e-02 : f32
    %67 = vector.broadcast %cst_27 : f32 to vector<32x1xf32>
    %68 = arith.mulf %66, %67 : vector<32x1xf32>
    %69 = arith.mulf %64, %64 : vector<32x128xf32>
    %cst_28 = arith.constant dense<0.000000e+00> : vector<32xf32>
    %70 = vector.multi_reduction <add>, %69, %cst_28 [1] : vector<32x128xf32> to vector<32xf32>
    %71 = vector.shape_cast %70 : vector<32xf32> to vector<32x1xf32>
    %cst_29 = arith.constant 3.125000e-02 : f32
    %72 = vector.broadcast %cst_29 : f32 to vector<32x1xf32>
    %73 = arith.mulf %71, %72 : vector<32x1xf32>
    %74 = arith.mulf %68, %68 : vector<32x1xf32>
    %75 = arith.subf %73, %74 : vector<32x1xf32>
    %76 = vector.broadcast %68 : vector<32x1xf32> to vector<32x128xf32>
    %77 = arith.subf %64, %76 : vector<32x128xf32>
    %cst_30 = arith.constant 9.99999974E-6 : f32
    %78 = vector.broadcast %cst_30 : f32 to vector<32x1xf32>
    %79 = arith.addf %75, %78 : vector<32x1xf32>
    %80 = math.rsqrt %79 : vector<32x1xf32>
    %81 = vector.broadcast %80 : vector<32x1xf32> to vector<32x128xf32>
    %82 = arith.mulf %77, %81 : vector<32x128xf32>
    %83 = arith.mulf %82, %4 : vector<32x128xf32>
    %84 = arith.addf %83, %5 : vector<32x128xf32>
    %85 = vector.extract_strided_slice %84 {offsets = [0, 0], sizes = [16, 128], strides = [1, 1]} : vector<32x128xf32> to vector<16x128xf32>
    %86 = vector.extract_strided_slice %84 {offsets = [16, 0], sizes = [16, 128], strides = [1, 1]} : vector<32x128xf32> to vector<16x128xf32>
    %87 = arith.addf %85, %86 : vector<16x128xf32>
    %88 = math.tanh %87 : vector<16x128xf32>
    %89 = vector.extract_strided_slice %88 {offsets = [8, 0], sizes = [8, 128], strides = [1, 1]} : vector<16x128xf32> to vector<8x128xf32>
    %90 = arith.truncf %89 : vector<8x128xf32> to vector<8x128xbf16>
    %cst_31 = arith.constant dense<0.000000e+00> : vector<8x128xf32>
    %91 = tpu.matmul %90, %8, %cst_31 {dimension_numbers = #tpu.dot_dimension_numbers<[1], [0], [0], [1], [0, 0, 1, 1], [], []>} : vector<8x128xbf16>, vector<128x128xbf16>, vector<8x128xf32> -> vector<8x128xf32>
    %92 = arith.addf %91, %6 : vector<8x128xf32>
    %93 = arith.addf %92, %50 : vector<8x128xf32>
    %c1 = arith.constant 1 : index
    %c0_32 = arith.constant 0 : index
    %c0_33 = arith.constant 0 : index
    %94 = vector.load %arg8[%c1, %c0_32, %c0_33] : memref<4x8x128xf32, #tpu.memory_space<vmem>>, vector<1x8x128xf32>
    %95 = vector.shape_cast %94 : vector<1x8x128xf32> to vector<8x128xf32>
    %96 = vector.shape_cast %93 : vector<8x128xf32> to vector<1x8x128xf32>
    tpu.vector_store %arg8[%c1, %c0_32, %c0_33], %96 {strides = array<i32>} : memref<4x8x128xf32, #tpu.memory_space<vmem>>, vector<1x8x128xf32>,
    %97 = vector.extract_strided_slice %88 {offsets = [0, 0], sizes = [8, 128], strides = [1, 1]} : vector<16x128xf32> to vector<8x128xf32>
    %98 = vector.extract_strided_slice %88 {offsets = [8, 0], sizes = [8, 128], strides = [1, 1]} : vector<16x128xf32> to vector<8x128xf32>
    %99 = tpu.concatenate %93, %97, %98 in 1 : vector<8x128xf32>, vector<8x128xf32>, vector<8x128xf32> -> vector<8x384xf32>
    %100 = arith.truncf %99 : vector<8x384xf32> to vector<8x384xbf16>
    %cst_34 = arith.constant dense<0.000000e+00> : vector<8x512xf32>
    %101 = tpu.matmul %100, %7, %cst_34 {dimension_numbers = #tpu.dot_dimension_numbers<[1], [0], [0], [1], [0, 0, 1, 1], [], []>} : vector<8x384xbf16>, vector<384x512xbf16>, vector<8x512xf32> -> vector<8x512xf32>
    %102 = vector.extract_strided_slice %101 {offsets = [0, 0], sizes = [8, 128], strides = [1, 1]} : vector<8x512xf32> to vector<8x128xf32>
    %103 = vector.extract_strided_slice %101 {offsets = [0, 128], sizes = [8, 128], strides = [1, 1]} : vector<8x512xf32> to vector<8x128xf32>
    %104 = vector.extract_strided_slice %101 {offsets = [0, 256], sizes = [8, 128], strides = [1, 1]} : vector<8x512xf32> to vector<8x128xf32>
    %105 = vector.extract_strided_slice %101 {offsets = [0, 384], sizes = [8, 128], strides = [1, 1]} : vector<8x512xf32> to vector<8x128xf32>
    %106 = tpu.concatenate %102, %103, %104, %105 in 0 : vector<8x128xf32>, vector<8x128xf32>, vector<8x128xf32>, vector<8x128xf32> -> vector<32x128xf32>
    %107 = arith.addf %106, %3 : vector<32x128xf32>
    %cst_35 = arith.constant dense<0.000000e+00> : vector<32xf32>
    %108 = vector.multi_reduction <add>, %107, %cst_35 [1] : vector<32x128xf32> to vector<32xf32>
    %109 = vector.shape_cast %108 : vector<32xf32> to vector<32x1xf32>
    %cst_36 = arith.constant 3.125000e-02 : f32
    %110 = vector.broadcast %cst_36 : f32 to vector<32x1xf32>
    %111 = arith.mulf %109, %110 : vector<32x1xf32>
    %112 = arith.mulf %107, %107 : vector<32x128xf32>
    %cst_37 = arith.constant dense<0.000000e+00> : vector<32xf32>
    %113 = vector.multi_reduction <add>, %112, %cst_37 [1] : vector<32x128xf32> to vector<32xf32>
    %114 = vector.shape_cast %113 : vector<32xf32> to vector<32x1xf32>
    %cst_38 = arith.constant 3.125000e-02 : f32
    %115 = vector.broadcast %cst_38 : f32 to vector<32x1xf32>
    %116 = arith.mulf %114, %115 : vector<32x1xf32>
    %117 = arith.mulf %111, %111 : vector<32x1xf32>
    %118 = arith.subf %116, %117 : vector<32x1xf32>
    %119 = vector.broadcast %111 : vector<32x1xf32> to vector<32x128xf32>
    %120 = arith.subf %107, %119 : vector<32x128xf32>
    %cst_39 = arith.constant 9.99999974E-6 : f32
    %121 = vector.broadcast %cst_39 : f32 to vector<32x1xf32>
    %122 = arith.addf %118, %121 : vector<32x1xf32>
    %123 = math.rsqrt %122 : vector<32x1xf32>
    %124 = vector.broadcast %123 : vector<32x1xf32> to vector<32x128xf32>
    %125 = arith.mulf %120, %124 : vector<32x128xf32>
    %126 = arith.mulf %125, %4 : vector<32x128xf32>
    %127 = arith.addf %126, %5 : vector<32x128xf32>
    %128 = vector.extract_strided_slice %127 {offsets = [0, 0], sizes = [16, 128], strides = [1, 1]} : vector<32x128xf32> to vector<16x128xf32>
    %129 = vector.extract_strided_slice %127 {offsets = [16, 0], sizes = [16, 128], strides = [1, 1]} : vector<32x128xf32> to vector<16x128xf32>
    %130 = arith.addf %128, %129 : vector<16x128xf32>
    %131 = math.tanh %130 : vector<16x128xf32>
    %132 = vector.extract_strided_slice %131 {offsets = [8, 0], sizes = [8, 128], strides = [1, 1]} : vector<16x128xf32> to vector<8x128xf32>
    %133 = arith.truncf %132 : vector<8x128xf32> to vector<8x128xbf16>
    %cst_40 = arith.constant dense<0.000000e+00> : vector<8x128xf32>
    %134 = tpu.matmul %133, %8, %cst_40 {dimension_numbers = #tpu.dot_dimension_numbers<[1], [0], [0], [1], [0, 0, 1, 1], [], []>} : vector<8x128xbf16>, vector<128x128xbf16>, vector<8x128xf32> -> vector<8x128xf32>
    %135 = arith.addf %134, %6 : vector<8x128xf32>
    %136 = arith.addf %135, %93 : vector<8x128xf32>
    %c2 = arith.constant 2 : index
    %c0_41 = arith.constant 0 : index
    %c0_42 = arith.constant 0 : index
    %137 = vector.load %arg8[%c2, %c0_41, %c0_42] : memref<4x8x128xf32, #tpu.memory_space<vmem>>, vector<1x8x128xf32>
    %138 = vector.shape_cast %137 : vector<1x8x128xf32> to vector<8x128xf32>
    %139 = vector.shape_cast %136 : vector<8x128xf32> to vector<1x8x128xf32>
    tpu.vector_store %arg8[%c2, %c0_41, %c0_42], %139 {strides = array<i32>} : memref<4x8x128xf32, #tpu.memory_space<vmem>>, vector<1x8x128xf32>,
    %140 = vector.extract_strided_slice %131 {offsets = [0, 0], sizes = [8, 128], strides = [1, 1]} : vector<16x128xf32> to vector<8x128xf32>
    %141 = vector.extract_strided_slice %131 {offsets = [8, 0], sizes = [8, 128], strides = [1, 1]} : vector<16x128xf32> to vector<8x128xf32>
    %142 = tpu.concatenate %136, %140, %141 in 1 : vector<8x128xf32>, vector<8x128xf32>, vector<8x128xf32> -> vector<8x384xf32>
    %143 = arith.truncf %142 : vector<8x384xf32> to vector<8x384xbf16>
    %cst_43 = arith.constant dense<0.000000e+00> : vector<8x512xf32>
    %144 = tpu.matmul %143, %7, %cst_43 {dimension_numbers = #tpu.dot_dimension_numbers<[1], [0], [0], [1], [0, 0, 1, 1], [], []>} : vector<8x384xbf16>, vector<384x512xbf16>, vector<8x512xf32> -> vector<8x512xf32>
    %145 = vector.extract_strided_slice %144 {offsets = [0, 0], sizes = [8, 128], strides = [1, 1]} : vector<8x512xf32> to vector<8x128xf32>
    %146 = vector.extract_strided_slice %144 {offsets = [0, 128], sizes = [8, 128], strides = [1, 1]} : vector<8x512xf32> to vector<8x128xf32>
    %147 = vector.extract_strided_slice %144 {offsets = [0, 256], sizes = [8, 128], strides = [1, 1]} : vector<8x512xf32> to vector<8x128xf32>
    %148 = vector.extract_strided_slice %144 {offsets = [0, 384], sizes = [8, 128], strides = [1, 1]} : vector<8x512xf32> to vector<8x128xf32>
    %149 = tpu.concatenate %145, %146, %147, %148 in 0 : vector<8x128xf32>, vector<8x128xf32>, vector<8x128xf32>, vector<8x128xf32> -> vector<32x128xf32>
    %150 = arith.addf %149, %3 : vector<32x128xf32>
    %cst_44 = arith.constant dense<0.000000e+00> : vector<32xf32>
    %151 = vector.multi_reduction <add>, %150, %cst_44 [1] : vector<32x128xf32> to vector<32xf32>
    %152 = vector.shape_cast %151 : vector<32xf32> to vector<32x1xf32>
    %cst_45 = arith.constant 3.125000e-02 : f32
    %153 = vector.broadcast %cst_45 : f32 to vector<32x1xf32>
    %154 = arith.mulf %152, %153 : vector<32x1xf32>
    %155 = arith.mulf %150, %150 : vector<32x128xf32>
    %cst_46 = arith.constant dense<0.000000e+00> : vector<32xf32>
    %156 = vector.multi_reduction <add>, %155, %cst_46 [1] : vector<32x128xf32> to vector<32xf32>
    %157 = vector.shape_cast %156 : vector<32xf32> to vector<32x1xf32>
    %cst_47 = arith.constant 3.125000e-02 : f32
    %158 = vector.broadcast %cst_47 : f32 to vector<32x1xf32>
    %159 = arith.mulf %157, %158 : vector<32x1xf32>
    %160 = arith.mulf %154, %154 : vector<32x1xf32>
    %161 = arith.subf %159, %160 : vector<32x1xf32>
    %162 = vector.broadcast %154 : vector<32x1xf32> to vector<32x128xf32>
    %163 = arith.subf %150, %162 : vector<32x128xf32>
    %cst_48 = arith.constant 9.99999974E-6 : f32
    %164 = vector.broadcast %cst_48 : f32 to vector<32x1xf32>
    %165 = arith.addf %161, %164 : vector<32x1xf32>
    %166 = math.rsqrt %165 : vector<32x1xf32>
    %167 = vector.broadcast %166 : vector<32x1xf32> to vector<32x128xf32>
    %168 = arith.mulf %163, %167 : vector<32x128xf32>
    %169 = arith.mulf %168, %4 : vector<32x128xf32>
    %170 = arith.addf %169, %5 : vector<32x128xf32>
    %171 = vector.extract_strided_slice %170 {offsets = [0, 0], sizes = [16, 128], strides = [1, 1]} : vector<32x128xf32> to vector<16x128xf32>
    %172 = vector.extract_strided_slice %170 {offsets = [16, 0], sizes = [16, 128], strides = [1, 1]} : vector<32x128xf32> to vector<16x128xf32>
    %173 = arith.addf %171, %172 : vector<16x128xf32>
    %174 = math.tanh %173 : vector<16x128xf32>
    %175 = vector.extract_strided_slice %174 {offsets = [8, 0], sizes = [8, 128], strides = [1, 1]} : vector<16x128xf32> to vector<8x128xf32>
    %176 = arith.truncf %175 : vector<8x128xf32> to vector<8x128xbf16>
    %cst_49 = arith.constant dense<0.000000e+00> : vector<8x128xf32>
    %177 = tpu.matmul %176, %8, %cst_49 {dimension_numbers = #tpu.dot_dimension_numbers<[1], [0], [0], [1], [0, 0, 1, 1], [], []>} : vector<8x128xbf16>, vector<128x128xbf16>, vector<8x128xf32> -> vector<8x128xf32>
    %178 = arith.addf %177, %6 : vector<8x128xf32>
    %179 = arith.addf %178, %136 : vector<8x128xf32>
    %c3 = arith.constant 3 : index
    %c0_50 = arith.constant 0 : index
    %c0_51 = arith.constant 0 : index
    %180 = vector.load %arg8[%c3, %c0_50, %c0_51] : memref<4x8x128xf32, #tpu.memory_space<vmem>>, vector<1x8x128xf32>
    %181 = vector.shape_cast %180 : vector<1x8x128xf32> to vector<8x128xf32>
    %182 = vector.shape_cast %179 : vector<8x128xf32> to vector<1x8x128xf32>
    tpu.vector_store %arg8[%c3, %c0_50, %c0_51], %182 {strides = array<i32>} : memref<4x8x128xf32, #tpu.memory_space<vmem>>, vector<1x8x128xf32>,
    %c0_52 = arith.constant 0 : index
    %c0_53 = arith.constant 0 : index
    %183 = vector.load %arg10[%c0_52, %c0_53] : memref<8x128xf32, #tpu.memory_space<vmem>>, vector<8x128xf32>
    tpu.vector_store %arg10[%c0_52, %c0_53], %179 {strides = array<i32>} : memref<8x128xf32, #tpu.memory_space<vmem>>, vector<8x128xf32>,
    %c0_54 = arith.constant 0 : index
    %c0_55 = arith.constant 0 : index
    %184 = vector.load %arg9[%c0_54, %c0_55] : memref<16x128xf32, #tpu.memory_space<vmem>>, vector<16x128xf32>
    tpu.vector_store %arg9[%c0_54, %c0_55], %174 {strides = array<i32>} : memref<16x128xf32, #tpu.memory_space<vmem>>, vector<16x128xf32>,
    return
  }
  func.func @transform_0(%arg0: i32) -> (i32, i32) {
    %c0_i32 = arith.constant 0 : i32
    %c0_i32_0 = arith.constant 0 : i32
    %c0_i32_1 = arith.constant 0 : i32
    return %c0_i32, %c0_i32_0 : i32, i32
  }
  func.func @transform_1(%arg0: i32) -> (i32, i32) {
    %c0_i32 = arith.constant 0 : i32
    %c0_i32_0 = arith.constant 0 : i32
    %c0_i32_1 = arith.constant 0 : i32
    return %c0_i32, %c0_i32_0 : i32, i32
  }
  func.func @transform_2(%arg0: i32) -> (i32, i32) {
    %c0_i32 = arith.constant 0 : i32
    %c0_i32_0 = arith.constant 0 : i32
    %c0_i32_1 = arith.constant 0 : i32
    return %c0_i32, %c0_i32_0 : i32, i32
  }
  func.func @transform_3(%arg0: i32) -> (i32, i32) {
    %c0_i32 = arith.constant 0 : i32
    %c0_i32_0 = arith.constant 0 : i32
    %c0_i32_1 = arith.constant 0 : i32
    return %c0_i32, %c0_i32_0 : i32, i32
  }
  func.func @transform_4(%arg0: i32) -> (i32, i32) {
    %c0_i32 = arith.constant 0 : i32
    %c0_i32_0 = arith.constant 0 : i32
    %c0_i32_1 = arith.constant 0 : i32
    return %c0_i32, %c0_i32_0 : i32, i32
  }
  func.func @transform_5(%arg0: i32) -> (i32, i32) {
    %c0_i32 = arith.constant 0 : i32
    %c0_i32_0 = arith.constant 0 : i32
    %c0_i32_1 = arith.constant 0 : i32
    return %c0_i32, %c0_i32_0 : i32, i32
  }
  func.func @transform_6(%arg0: i32) -> (i32, i32) {
    %c0_i32 = arith.constant 0 : i32
    %c0_i32_0 = arith.constant 0 : i32
    %c0_i32_1 = arith.constant 0 : i32
    return %c0_i32, %c0_i32_0 : i32, i32
  }
  func.func @transform_7(%arg0: i32) -> (i32, i32, i32) {
    %c0_i32 = arith.constant 0 : i32
    %c0_i32_0 = arith.constant 0 : i32
    %c0_i32_1 = arith.constant 0 : i32
    return %arg0, %c0_i32, %c0_i32_0 : i32, i32, i32
  }
}

</mosaic_0001>

<bundles_post_ra>
// kernel: tpu_custom_call.1
= control target key start
LH: loop header
LB: loop body
LE: loop exit
PB: predicated region body
PF: predicated region fallthrough
CT: control target
= control target key end

     0   :  { %12 = vsyncpa [#allocation5], 0  ;;  %s4382_s0 = inlined_call_operand.hbm [shape: f32[8,128], index: 0, kind: input, shape index: {}]   ;;  %s4383_s1 = inlined_call_operand.hbm [shape: bf16[384,512], index: 1, kind: input, shape index: {}]   ;;  %s4384_s2 = inlined_call_operand.hbm [shape: f32[32,128], index: 2, kind: input, shape index: {}]   ;;  %s4385_s3 = inlined_call_operand.hbm [shape: f32[32,128], index: 3, kind: input, shape index: {}]   ;;  %s4386_s4 = inlined_call_operand.hbm [shape: f32[32,128], index: 4, kind: input, shape index: {}]   ;;  %s4387_s5 = inlined_call_operand.hbm [shape: bf16[128,128], index: 5, kind: input, shape index: {}]   ;;  %s4388_s6 = inlined_call_operand.vmem [shape: f32[8,128], index: 6, kind: input, shape index: {}]   ;;  %s4389_s7 = inlined_call_operand.hbm [shape: f32[8,8,128], index: 7, kind: output, shape index: {}]  }
   0x1   :  { %13 = vsyncpa [#allocation8], 0 }
   0x2   :  { %14 = vsyncpa [#allocation11], 0 }
   0x3   :  { %15 = vsyncpa [#allocation14], 0 }
   0x4   :  { %16 = vsyncpa [#allocation6], 0 }
   0x5   :  { %18 = vsyncpa [#allocation6 + $0x1], 0  ;;  %s3230_s24 = smov 0   ;;  %s3232_s25 = smov 0  }
   0x6   :  { %s3234_s26 = smov 0   ;;  %s3236_s27 = smov 0  }
   0x7 LB: > { %4510 = sst [smem:[#allocation21_spill]] %s3165_s26  ;;  %s3251_s28 = sadd.s32 4294967295, %s3169_s27   ;;  %s3169_s27 = sphi %s3236_s27, %s4713_s27   ;;  %s3165_s26 = sphi %s3234_s26, %s4715_s26   ;;  %s3161_s25 = sphi %s3232_s25, %s4717_s25   ;;  %s3157_s24 = sphi %s3230_s24, %s4716_s24  }
   0x8   : > { %s2248_s29 = sadd.s32 4294967294, %s3169_s27   ;;  %s3255_s30 = sadd.s32 1, %s3169_s27  }
   0x9   : > { %4511 = sst [smem:[#allocation22_spill]] %s3255_s30  ;;  %s178_s8 = sadd.s32 1, %s3165_s26 }
   0xa   : > { %s175_s9 = ssub.s32 %s3169_s27, %s3255_s30  ;;  %p188_p0 = scmp.ne.s32.totalorder %s3165_s26, %s3161_s25 }
   0xb   : > { %p176_p1 = scmp.eq.s32.totalorder %s175_s9, 0  ;;  %p189_p2 = scmp.eq.s32.totalorder %s3251_s28, 1 }
   0xc   : > { %p194_p3 = scmp.ne.s32.totalorder %s3161_s25, %s3157_s24  ;;  %p195_p4 = scmp.eq.s32.totalorder %s2248_s29, 1 }
   0xd   : > { %s3266_s10 = scalar_select %p176_p1, %s3165_s26, %s178_s8  }
   0xe   : > { %p3268_p5 = por %p189_p2, %p188_p0  ;;  %p3272_p6 = por %p195_p4, %p194_p3 }
   0xf   : > { %4512 = sst [smem:[#allocation23_spill]] %s3266_s10  ;;  %p2249_p7 = scmp.ge.s32.totalorder %s3169_s27, 1 }
  0x10   : > { %s4513_s11 = scalar_select %p3268_p5, 1, 0 }
  0x11   : > { %s4514_s12 = scalar_select %p3272_p6, 1, 0 }
  0x12   : > { %p202_p8 = scmp.lt.s32.totalorder %s3169_s27, 3  ;;  %p4390_p10 = scmp.eq.s32.totalorder %s3251_s28, 0 }
  0x13   : > { %4515 = sst [smem:[#allocation24_spill]] %s4514_s12  ;;  %s3171_s14 = smov [#allocation7]  }
  0x14   : > { %p3280_p11 = pnand %p2249_p7, %p202_p8  ;;  %s225_s15 = sshll.u32 %s3171_s14, 4  ;;  %s226_s15 = int_to_ptr.vmem [resolvable:$true] %s225_s15 }
  0x15   : > { %s3172_s17 = smov [#allocation10]   ;;  %s2923_s21 = scalar_lea.hbm %s4383_s1, 12288 }
  0x16   : > { %s4516_s13 = scalar_select %p3280_p11, 1, 0 }
  0x17   : > { %p2520_p12 = pneg %p3280_p11  ;;  %s251_s18 = sshll.u32 %s3172_s17, 4  ;;  %s252_s18 = int_to_ptr.vmem [resolvable:$true] %s251_s18 }
  0x18   : > { %p2924_p0 = scmp.ne.s32.totalorder %s4383_s1, %s2923_s21  ;;  %p2930_p4 = scmp.lt.u32.totalorder %s2923_s21, %s4383_s1 }
  0x19   : > { %p3288_p13 = pnand %p4390_p10, %p2520_p12 }
  0x1b   : > { %p3300_p1 = pneg %p3288_p13 }
  0x1d   : > { %p2926_p2 = pnand %p3300_p1, %p2924_p0 }
  0x1f   : > { %p2927_p3 = pneg %p2926_p2 }
  0x21   : > { %p2932_p7 = pnand %p2930_p4, %p2927_p3 }
  0x23   : > { %2935 = shalt.err (!%p2932_p7)
}
  0x24   : > { %s2936_s14 = scalar_lea.vmem %s226_s15, 12288  ;;  %p2944_p10 = scmp.lt.s32.totalorder %s226_s15, %s226_s15 }
  0x25   : > { %p2937_p8 = scmp.ne.s32.totalorder %s226_s15, %s2936_s14  ;;  %p2945_p6 = scmp.lt.s32.totalorder %s2936_s14, %s2936_s14 }
  0x27   : > { %p2939_p12 = pnand %p2937_p8, %p3300_p1  ;;  %p2946_p5 = por %p2945_p6, %p2944_p10 }
  0x29   : > { %p2940_p9 = pneg %p2939_p12 }
  0x2b   : > { %p2947_p11 = pnand %p2946_p5, %p2940_p9 }
  0x2d   : > { %2950 = shalt.err (!%p2947_p11)
}
  0x2e   : > { %s3173_s17 = smov 256   ;;  %s3174_s19 = smov 16  }
  0x2f   : > { %2526 = dma.hbm_to_vmem [thread:$0]  (!%p3288_p13), %s4383_s1, 12288, %s226_s15, [#allocation8], %s3173_s17, %s3173_s17, %s3174_s19  }
  0x30   : > { %s3175_s22 = smov [#allocation4]   ;;  %s2951_s10 = scalar_lea.hbm %s4385_s3, 512 }
  0x31   : > { %s215_s23 = sshll.u32 %s3175_s22, 4  ;;  %p2952_p5 = scmp.ne.s32.totalorder %s4385_s3, %s2951_s10  ;;  %s216_s23 = int_to_ptr.vmem [resolvable:$true] %s215_s23 }
  0x32   : > { %p2958_p10 = scmp.lt.u32.totalorder %s2951_s10, %s4385_s3 }
  0x33   : > { %p2954_p6 = pnand %p2952_p5, %p3300_p1 }
  0x35   : > { %p2955_p9 = pneg %p2954_p6 }
  0x37   : > { %p2960_p11 = pnand %p2958_p10, %p2955_p9 }
  0x39   : > { %2963 = shalt.err (!%p2960_p11)
}
  0x3a   : > { %s2964_s15 = scalar_lea.vmem %s252_s18, 512  ;;  %p2972_p4 = scmp.lt.s32.totalorder %s252_s18, %s252_s18 }
  0x3b   : > { %p2965_p0 = scmp.ne.s32.totalorder %s252_s18, %s2964_s15  ;;  %p2973_p7 = scmp.lt.s32.totalorder %s2964_s15, %s2964_s15 }
  0x3d   : > { %p2967_p2 = pnand %p2965_p0, %p3300_p1  ;;  %p2974_p8 = por %p2973_p7, %p2972_p4 }
  0x3f   : > { %p2968_p3 = pneg %p2967_p2 }
  0x41   : > { %p2975_p12 = pnand %p2974_p8, %p2968_p3 }
  0x43   : > { %2978 = shalt.err (!%p2975_p12)
}
  0x44   : > { %s3176_s26 = smov 128   ;;  %s3177_s17 = smov 8  }
  0x45   : > { %2532 = dma.hbm_to_vmem [thread:$0]  (!%p3288_p13), %s4385_s3, 512, %s252_s18, [#allocation11], %s3176_s26, %s3176_s26, %s3177_s17  }
  0x46   : > { %s2979_s20 = scalar_lea.hbm %s4382_s0, 128 }
  0x47   : > { %p2980_p5 = scmp.ne.s32.totalorder %s4382_s0, %s2979_s20  ;;  %p2986_p10 = scmp.lt.u32.totalorder %s2979_s20, %s4382_s0 }
  0x49   : > { %p2982_p6 = pnand %p2980_p5, %p3300_p1 }
  0x4b   : > { %p2983_p9 = pneg %p2982_p6 }
  0x4d   : > { %p2988_p11 = pnand %p2986_p10, %p2983_p9 }
  0x4f   : > { %2991 = shalt.err (!%p2988_p11)
}
  0x50   : > { %s2992_s14 = scalar_lea.vmem %s216_s23, 128  ;;  %p3000_p4 = scmp.lt.s32.totalorder %s216_s23, %s216_s23 }
  0x51   : > { %p2993_p0 = scmp.ne.s32.totalorder %s216_s23, %s2992_s14  ;;  %p3001_p7 = scmp.lt.s32.totalorder %s2992_s14, %s2992_s14 }
  0x53   : > { %p2995_p2 = pnand %p2993_p0, %p3300_p1  ;;  %p3002_p8 = por %p3001_p7, %p3000_p4 }
  0x55   : > { %p2996_p3 = pneg %p2995_p2 }
  0x57   : > { %p3003_p12 = pnand %p3002_p8, %p2996_p3 }
  0x59   : > { %3006 = shalt.err (!%p3003_p12)
}
  0x5a   : > { %2523 = dma.hbm_to_vmem [thread:$0]  (!%p3288_p13), %s4382_s0, 128, %s216_s23, [#allocation5]  }
  0x5b   : > { %s3178_s30 = smov [#allocation9]   ;;  %s3179_s12 = smov [#allocation12]  }
  0x5c   : > { %s238_s10 = sshll.u32 %s3178_s30, 4  ;;  %s264_s19 = sshll.u32 %s3179_s12, 4  ;;  %s239_s10 = int_to_ptr.vmem [resolvable:$true] %s238_s10  ;;  %s265_s19 = int_to_ptr.vmem [resolvable:$true] %s264_s19 }
  0x5d   : > { %s3007_s22 = scalar_lea.hbm %s4384_s2, 512 }
  0x5e   : > { %p3008_p5 = scmp.ne.s32.totalorder %s4384_s2, %s3007_s22  ;;  %p3014_p10 = scmp.lt.u32.totalorder %s3007_s22, %s4384_s2 }
  0x60   : > { %p3010_p6 = pnand %p3008_p5, %p3300_p1 }
  0x62   : > { %p3011_p9 = pneg %p3010_p6 }
  0x64   : > { %p3016_p11 = pnand %p3014_p10, %p3011_p9 }
  0x66   : > { %3019 = shalt.err (!%p3016_p11)
}
  0x67   : > { %s3020_s23 = scalar_lea.vmem %s239_s10, 512  ;;  %p3028_p4 = scmp.lt.s32.totalorder %s239_s10, %s239_s10 }
  0x68   : > { %p3021_p0 = scmp.ne.s32.totalorder %s239_s10, %s3020_s23  ;;  %p3029_p7 = scmp.lt.s32.totalorder %s3020_s23, %s3020_s23 }
  0x6a   : > { %p3023_p2 = pnand %p3021_p0, %p3300_p1  ;;  %p3030_p8 = por %p3029_p7, %p3028_p4 }
  0x6c   : > { %p3024_p3 = pneg %p3023_p2 }
  0x6e   : > { %p3031_p12 = pnand %p3030_p8, %p3024_p3 }
  0x70   : > { %3034 = shalt.err (!%p3031_p12)
}
  0x71   : > { %2529 = dma.hbm_to_vmem [thread:$0]  (!%p3288_p13), %s4384_s2, 512, %s239_s10, [#allocation8], %s3176_s26, %s3176_s26, %s3177_s17  }
  0x72   : > { %s3035_s21 = scalar_lea.hbm %s4386_s4, 512 }
  0x73   : > { %p3036_p5 = scmp.ne.s32.totalorder %s4386_s4, %s3035_s21  ;;  %p3042_p10 = scmp.lt.u32.totalorder %s3035_s21, %s4386_s4 }
  0x75   : > { %p3038_p6 = pnand %p3036_p5, %p3300_p1 }
  0x77   : > { %p3039_p9 = pneg %p3038_p6 }
  0x79   : > { %p3044_p11 = pnand %p3042_p10, %p3039_p9 }
  0x7b   : > { %3047 = shalt.err (!%p3044_p11)
}
  0x7c   : > { %s3048_s18 = scalar_lea.vmem %s265_s19, 512  ;;  %p3056_p4 = scmp.lt.s32.totalorder %s265_s19, %s265_s19 }
  0x7d   : > { %p3049_p0 = scmp.ne.s32.totalorder %s265_s19, %s3048_s18  ;;  %p3057_p7 = scmp.lt.s32.totalorder %s3048_s18, %s3048_s18 }
  0x7f   : > { %p3051_p2 = pnand %p3049_p0, %p3300_p1  ;;  %p3058_p8 = por %p3057_p7, %p3056_p4 }
  0x81   : > { %p3052_p3 = pneg %p3051_p2 }
  0x83   : > { %p3059_p12 = pnand %p3058_p8, %p3052_p3 }
  0x85   : > { %3062 = shalt.err (!%p3059_p12)
}
  0x86   : > { %2535 = dma.hbm_to_vmem [thread:$0]  (!%p3288_p13), %s4386_s4, 512, %s265_s19, [#allocation11], %s3176_s26, %s3176_s26, %s3177_s17  }
  0x87   : > { %s3180_s15 = smov [#allocation13]   ;;  %s3063_s21 = scalar_lea.hbm %s4387_s5, 1024 }
  0x88   : > { %s277_s30 = sshll.u32 %s3180_s15, 4  ;;  %p3064_p5 = scmp.ne.s32.totalorder %s4387_s5, %s3063_s21  ;;  %s278_s30 = int_to_ptr.vmem [resolvable:$true] %s277_s30 }
  0x89   : > { %p3070_p10 = scmp.lt.u32.totalorder %s3063_s21, %s4387_s5 }
  0x8a   : > { %p3066_p6 = pnand %p3064_p5, %p3300_p1 }
  0x8c   : > { %p3067_p9 = pneg %p3066_p6 }
  0x8e   : > { %p3072_p11 = pnand %p3070_p10, %p3067_p9 }
  0x90   : > { %3075 = shalt.err (!%p3072_p11)
}
  0x91   : > { %s3076_s26 = scalar_lea.vmem %s278_s30, 1024  ;;  %p3084_p4 = scmp.lt.s32.totalorder %s278_s30, %s278_s30 }
  0x92   : > { %p3077_p0 = scmp.ne.s32.totalorder %s278_s30, %s3076_s26  ;;  %p3085_p7 = scmp.lt.s32.totalorder %s3076_s26, %s3076_s26 }
  0x94   : > { %p3079_p2 = pnand %p3077_p0, %p3300_p1  ;;  %p3086_p8 = por %p3085_p7, %p3084_p4 }
  0x96   : > { %p3080_p3 = pneg %p3079_p2 }
  0x98   : > { %p3087_p12 = pnand %p3086_p8, %p3080_p3 }
  0x9a   : > { %3090 = shalt.err (!%p3087_p12)
}
  0x9b   : > { %s3181_s17 = smov 64   ;;  %s3182_s19 = smov 4  }
  0x9c   : > { %2538 = dma.hbm_to_vmem [thread:$0]  (!%p3288_p13), %s4387_s5, 1024, %s278_s30, [#allocation14], %s3181_s17, %s3181_s17, %s3182_s19  }
  0x9d   : > { %p4519_p5 = scmp.ne.s32.totalorder %s4516_s13, 0 }
  0x9f   : > { %296 = sbr.rel (%p4519_p5) target bundleno = 2869 (0xb35), region = 48 }
  0xa6   : > { %p4520_p6 = scmp.eq.s32.totalorder %s3251_s28, 0 }
  0xa8   : > { %3136 = dma.done.wait (%p4520_p6), [#allocation5], 128   ;;  %p4521_p1 = pmov %p4520_p6 }
  0xaa   : > { %3138 = vsyncadd (%p4521_p1), [#allocation5], 4294967168  ;;  %p4522_p9 = pmov %p4521_p1 }
  0xab   : > { %p4523_p10 = pmov %p4521_p1 }
  0xac   : > { %3140 = dma.done.wait (%p4522_p9), [#allocation8], 12800  }
  0xad   : > { %3142 = vsyncadd (%p4523_p10), [#allocation8], 4294954496  ;;  %p4524_p11 = pmov %p4521_p1 }
  0xae   : > { %p4525_p13 = pmov %p4521_p1 }
  0xaf   : > { %3144 = dma.done.wait (%p4524_p11), [#allocation11], 1024  }
  0xb0   : > { %3146 = vsyncadd (%p4525_p13), [#allocation11], 4294966272  ;;  %p4526_p0 = pmov %p4521_p1 }
  0xb2   : > { %3148 = dma.done.wait (%p4526_p0), [#allocation14], 1024   ;;  %p4527_p2 = pmov %p4526_p0 }
  0xb3   : > { %s340_s13 = sand.u32 1, %s3161_s25   ;;  %p4528_p3 = scmp.ne.s32.totalorder %s3251_s28, 0 }
  0xb4   : > { %3150 = vsyncadd (%p4527_p2), [#allocation14], 4294966272  ;;  %s2263_s16 = sshll.u32 %s340_s13, 5  ;;  %v351_v0 = vld [vmem:[#allocation4] sm:$0xff] (!%p4528_p3)  ;;  %v3183_v1 = vmov (!%p4528_p3), 0.0  }
  0xb5   : > { %s3436_s29 = scalar_lea.vmem [#allocation15], %s2263_s16  ;;  %348 = sbr.rel (%p4528_p3) target bundleno = 188 (0xbc), region = 76  ;;  %349 = vst [vmem:[#allocation2] sm:$0xff] (!%p4528_p3), %v3183_v1  ;;  %350 = vst [vmem:[#allocation2 + $0x8] sm:$0xff] (!%p4528_p3), %v3183_v1 }
  0xb6   : > { %352 = vst [vmem:[#allocation3] sm:$0xff] (!%p4528_p3), %v351_v0 }
  0xbc PF: > { %v3440_v2 = vld [vmem:[#allocation7 + $0x4] ss:$16 sps:$4 sm:$0xff]   ;;  %v4397_v4 = vmov 0   ;;  %v3446_v5 = vld [vmem:[#allocation7] ss:$16 sps:$4 sm:$0xff]   ;;  %v480_v35 = vld [vmem:[#allocation2 + $0x8] sm:$0xff] }
  0xbd   : > { %v3442_v3 = vld [vmem:[#allocation7 + $0x204] ss:$16 sps:$4 sm:$0xff]   ;;  %1037 = vmatprep.mubr.bf16.mxu1 %v4397_v4  ;;  %964 = vmatprep.subr.bf16.mxu0 %v3440_v2  ;;  %v3448_v6 = vld [vmem:[#allocation7 + $0x200] ss:$16 sps:$4 sm:$0xff]   ;;  %v3537_v37 = vld [vmem:[#allocation7 + $0xc] ss:$16 sps:$4 sm:$0xff]   ;;  %v3539_v38 = vpack.c.bf16 %v480_v35, %v480_v35 }
  0xbe   : > { %1005 = vmatprep.subr.bf16.mxu1 %v3442_v3  ;;  %v3451_v7 = vld [vmem:[#allocation7 + $0x24] ss:$16 sps:$4 sm:$0xff]   ;;  %965 = vmatpush1.bf16.msra.mxu0 %v3446_v5  ;;  %v3457_v9 = vld [vmem:[#allocation7 + $0x20] ss:$16 sps:$4 sm:$0xff]   ;;  %v3543_v40 = vld [vmem:[#allocation7 + $0x8] ss:$16 sps:$4 sm:$0xff]  }
  0xbf   : > { %1006 = vmatpush1.bf16.msra.mxu1 %v3448_v6  ;;  %v3455_v8 = vld [vmem:[#allocation7 + $0x224] ss:$16 sps:$4 sm:$0xff]   ;;  %966 = vmatprep.subr.bf16.mxu0 %v3451_v7  ;;  %v3460_v10 = vld [vmem:[#allocation7 + $0x220] ss:$16 sps:$4 sm:$0xff]   ;;  %v3551_v42 = vld [vmem:[#allocation7 + $0x2c] ss:$16 sps:$4 sm:$0xff]  }
  0xc0   : > { %1007 = vmatprep.subr.bf16.mxu1 %v3455_v8  ;;  %v3463_v11 = vld [vmem:[#allocation7 + $0x44] ss:$16 sps:$4 sm:$0xff]   ;;  %v3467_v13 = vld [vmem:[#allocation7 + $0x40] ss:$16 sps:$4 sm:$0xff]   ;;  %4529 = vst [vmem:[#allocation25_spill] sm:$0xff] %v3551_v42  ;;  %vm3186_vm0 = vmmov 0  }
  0xc1   : > { %v3465_v12 = vld [vmem:[#allocation7 + $0x244] ss:$16 sps:$4 sm:$0xff]   ;;  %v3469_v14 = vld [vmem:[#allocation7 + $0x240] ss:$16 sps:$4 sm:$0xff]   ;;  %v3558_v44 = vld [vmem:[#allocation7 + $0x28] ss:$16 sps:$4 sm:$0xff]  }
  0xc2   : > { %967 = vmatpush1.bf16.msra.mxu0 %v3457_v9  ;;  %v3473_v15 = vld [vmem:[#allocation7 + $0x64] ss:$16 sps:$4 sm:$0xff]   ;;  %v3479_v17 = vld [vmem:[#allocation7 + $0x60] ss:$16 sps:$4 sm:$0xff]   ;;  %4531 = vst [vmem:[#allocation27_spill] sm:$0xff] %v3558_v44  ;;  %s2377_s30 = sshll.u32 %s3251_s28, 9 }
  0xc3   : > { %1008 = vmatpush1.bf16.msra.mxu1 %v3460_v10  ;;  %968 = vmatprep.subr.bf16.mxu0 %v3463_v11  ;;  %v3477_v16 = vld [vmem:[#allocation7 + $0x264] ss:$16 sps:$4 sm:$0xff]   ;;  %v3483_v18 = vld [vmem:[#allocation7 + $0x260] ss:$16 sps:$4 sm:$0xff]   ;;  %v3564_v46 = vld [vmem:[#allocation7 + $0x4c] ss:$16 sps:$4 sm:$0xff]   ;;  %s4333_s9 = scalar_lea.hbm %s4389_s7, %s2377_s30 }
  0xc4   : > { %1009 = vmatprep.subr.bf16.mxu1 %v3465_v12  ;;  %v3485_v19 = vld [vmem:[#allocation7 + $0x84] ss:$16 sps:$4 sm:$0xff]   ;;  %v3491_v21 = vld [vmem:[#allocation7 + $0x80] ss:$16 sps:$4 sm:$0xff]   ;;  %4533 = vst [vmem:[#allocation29_spill] sm:$0xff] %v3564_v46  ;;  %s2138_s12 = sshll.u32 %s3436_s29, 4  ;;  %s4335_s12 = int_to_ptr.vmem [resolvable:$true] %s2138_s12 }
  0xc5   : > { %v3489_v20 = vld [vmem:[#allocation7 + $0x284] ss:$16 sps:$4 sm:$0xff]   ;;  %v3493_v22 = vld [vmem:[#allocation7 + $0x280] ss:$16 sps:$4 sm:$0xff]   ;;  %v3568_v48 = vld [vmem:[#allocation7 + $0x48] ss:$16 sps:$4 sm:$0xff]  }
  0xc6   : > { %969 = vmatpush1.bf16.msra.mxu0 %v3467_v13  ;;  %v3497_v23 = vld [vmem:[#allocation7 + $0xa4] ss:$16 sps:$4 sm:$0xff]   ;;  %v3503_v25 = vld [vmem:[#allocation7 + $0xa0] ss:$16 sps:$4 sm:$0xff]   ;;  %4535 = vst [vmem:[#allocation31_spill] sm:$0xff] %v3568_v48  ;;  %s4341_s28 = scalar_lea.sflag [#allocation6], %s340_s13 }
  0xc7   : > { %1010 = vmatpush1.bf16.msra.mxu1 %v3469_v14  ;;  %970 = vmatprep.subr.bf16.mxu0 %v3473_v15  ;;  %v3501_v24 = vld [vmem:[#allocation7 + $0x2a4] ss:$16 sps:$4 sm:$0xff]   ;;  %v3507_v26 = vld [vmem:[#allocation7 + $0x2a0] ss:$16 sps:$4 sm:$0xff]   ;;  %v3576_v50 = vld [vmem:[#allocation7 + $0x6c] ss:$16 sps:$4 sm:$0xff]  }
  0xc8   : > { %1011 = vmatprep.subr.bf16.mxu1 %v3477_v16  ;;  %v3509_v27 = vld [vmem:[#allocation7 + $0xc4] ss:$16 sps:$4 sm:$0xff]   ;;  %v3515_v29 = vld [vmem:[#allocation7 + $0xc0] ss:$16 sps:$4 sm:$0xff]   ;;  %4537 = vst [vmem:[#allocation33_spill] sm:$0xff] %v3576_v50  ;;  %s3091_s14 = scalar_lea.vmem %s4335_s12, 512 }
  0xc9   : > { %v3513_v28 = vld [vmem:[#allocation7 + $0x2c4] ss:$16 sps:$4 sm:$0xff]   ;;  %v3517_v30 = vld [vmem:[#allocation7 + $0x2c0] ss:$16 sps:$4 sm:$0xff]   ;;  %v3582_v53 = vld [vmem:[#allocation7 + $0x68] ss:$16 sps:$4 sm:$0xff]   ;;  %p3092_p4 = scmp.ne.s32.totalorder %s4335_s12, %s3091_s14 }
  0xca   : > { %971 = vmatpush1.bf16.msra.mxu0 %v3479_v17  ;;  %v3521_v31 = vld [vmem:[#allocation7 + $0xe4] ss:$16 sps:$4 sm:$0xff]   ;;  %v3527_v33 = vld [vmem:[#allocation7 + $0xe0] ss:$16 sps:$4 sm:$0xff]   ;;  %4539 = vst [vmem:[#allocation35_spill] sm:$0xff] %v3582_v53  ;;  %p4710_p7 = scmp.ne.s32.totalorder %s4513_s11, 0 }
  0xcb   : > { %1012 = vmatpush1.bf16.msra.mxu1 %v3483_v18  ;;  %972 = vmatprep.subr.bf16.mxu0 %v3485_v19  ;;  %v3525_v32 = vld [vmem:[#allocation7 + $0x2e4] ss:$16 sps:$4 sm:$0xff]   ;;  %v3529_v34 = vld [vmem:[#allocation7 + $0x2e0] ss:$16 sps:$4 sm:$0xff]   ;;  %v3588_v56 = vld [vmem:[#allocation7 + $0x8c] ss:$16 sps:$4 sm:$0xff]  }
  0xcc   : > { %1013 = vmatprep.subr.bf16.mxu1 %v3489_v20  ;;  %v3535_v36 = vld [vmem:[#allocation7 + $0x104] ss:$16 sps:$4 sm:$0xff]   ;;  %v3541_v39 = vld [vmem:[#allocation7 + $0x100] ss:$16 sps:$4 sm:$0xff]   ;;  %4541 = vst [vmem:[#allocation37_spill] sm:$0xff] %v3588_v56  ;;  %p3093_p8 = pnand %p3092_p4, %p4710_p7  ;;  %s3187_s26 = smov [#allocation15]  }
  0xcd   : > { %v3547_v41 = vld [vmem:[#allocation7 + $0x124] ss:$16 sps:$4 sm:$0xff]   ;;  %v3554_v43 = vld [vmem:[#allocation7 + $0x120] ss:$16 sps:$4 sm:$0xff]   ;;  %v3594_v58 = vld [vmem:[#allocation7 + $0x88] ss:$16 sps:$4 sm:$0xff]  }
  0xce   : > { %973 = vmatpush1.bf16.msra.mxu0 %v3491_v21  ;;  %4530 = vst [vmem:[#allocation26_spill] sm:$0xff] %v3554_v43  ;;  %v3562_v45 = vld [vmem:[#allocation7 + $0x144] ss:$16 sps:$4 sm:$0xff]   ;;  %v3566_v47 = vld [vmem:[#allocation7 + $0x140] ss:$16 sps:$4 sm:$0xff]   ;;  %4543 = vst [vmem:[#allocation39_spill] sm:$0xff] %v3594_v58  ;;  %p3094_p12 = pneg %p3093_p8 }
  0xcf   : > { %1014 = vmatpush1.bf16.msra.mxu1 %v3493_v22  ;;  %974 = vmatprep.subr.bf16.mxu0 %v3497_v23  ;;  %4532 = vst [vmem:[#allocation28_spill] sm:$0xff] %v3562_v45  ;;  %4534 = vst [vmem:[#allocation30_spill] sm:$0xff] %v3566_v47  ;;  %v3572_v49 = vld [vmem:[#allocation7 + $0x164] ss:$16 sps:$4 sm:$0xff]   ;;  %v3578_v51 = vld [vmem:[#allocation7 + $0x160] ss:$16 sps:$4 sm:$0xff]  }
  0xd0   : > { %1015 = vmatprep.subr.bf16.mxu1 %v3501_v24  ;;  %4536 = vst [vmem:[#allocation32_spill] sm:$0xff] %v3572_v49  ;;  %4538 = vst [vmem:[#allocation34_spill] sm:$0xff] %v3578_v51  ;;  %v479_v52 = vld [vmem:[#allocation2] sm:$0xff]  ;;  %v3600_v60 = vld [vmem:[#allocation7 + $0xac] ss:$16 sps:$4 sm:$0xff]   ;;  %s3095_s17 = sshll.u32 %s3187_s26, 4  ;;  %s3096_s17 = int_to_ptr.vmem [resolvable:$false] %s3095_s17 }
  0xd1   : > { %v482_v54 = vpack.c.bf16 %v479_v52, %v479_v52  ;;  %v3586_v55 = vld [vmem:[#allocation7 + $0x184] ss:$16 sps:$4 sm:$0xff]   ;;  %v3592_v57 = vld [vmem:[#allocation7 + $0x180] ss:$16 sps:$4 sm:$0xff]   ;;  %4545 = vst [vmem:[#allocation41_spill] sm:$0xff] %v3600_v60  ;;  %s3097_s19 = scalar_lea.vmem %s3096_s17, 1024  ;;  %p3098_p5 = scmp.lt.s32.totalorder %s4335_s12, %s3096_s17 }
  0xd2   : > { %975 = vmatpush1.bf16.msra.mxu0 %v3503_v25  ;;  %4540 = vst [vmem:[#allocation36_spill] sm:$0xff] %v3586_v55  ;;  %4542 = vst [vmem:[#allocation38_spill] sm:$0xff] %v3592_v57  ;;  %v3596_v59 = vld [vmem:[#allocation7 + $0x1a4] ss:$16 sps:$4 sm:$0xff]   ;;  %v3602_v61 = vld [vmem:[#allocation7 + $0x1a0] ss:$16 sps:$4 sm:$0xff]   ;;  %p3099_p6 = scmp.lt.s32.totalorder %s3097_s19, %s3091_s14 }
  0xd3   : > { %1016 = vmatpush1.bf16.msra.mxu1 %v3507_v26  ;;  %976 = vmatprep.subr.bf16.mxu0 %v3509_v27  ;;  %4544 = vst [vmem:[#allocation40_spill] sm:$0xff] %v3596_v59  ;;  %4546 = vst [vmem:[#allocation42_spill] sm:$0xff] %v3602_v61  ;;  %v3606_v62 = vld [vmem:[#allocation7 + $0xa8] ss:$16 sps:$4 sm:$0xff]   ;;  %v3610_v63 = vld [vmem:[#allocation7 + $0x1c4] ss:$16 sps:$4 sm:$0xff]  }
  0xd4   : > { %1017 = vmatprep.subr.bf16.mxu1 %v3513_v28  ;;  %996 = vmatprep.mubr.bf16.mxu0 %v482_v54  ;;  %4547 = vst [vmem:[#allocation43_spill] sm:$0xff] %v3606_v62  ;;  %4548 = vst [vmem:[#allocation44_spill] sm:$0xff] %v3610_v63  ;;  %v3612_v0 = vld [vmem:[#allocation7 + $0xcc] ss:$16 sps:$4 sm:$0xff]   ;;  %v3616_v1 = vld [vmem:[#allocation7 + $0x1c0] ss:$16 sps:$4 sm:$0xff]   ;;  %p3100_p1 = por %p3099_p6, %p3098_p5 }
  0xd5   : > { %4549 = vst [vmem:[#allocation45_spill] sm:$0xff] %v3612_v0  ;;  %4550 = vst [vmem:[#allocation46_spill] sm:$0xff] %v3616_v1  ;;  %v3618_v35 = vld [vmem:[#allocation7 + $0xc8] ss:$16 sps:$4 sm:$0xff]   ;;  %v3620_v52 = vld [vmem:[#allocation7 + $0x1e4] ss:$16 sps:$4 sm:$0xff]  }
  0xd6   : > { %977 = vmatpush1.bf16.msra.mxu0 %v3515_v29  ;;  %4551 = vst [vmem:[#allocation47_spill] sm:$0xff] %v3618_v35  ;;  %4552 = vst [vmem:[#allocation48_spill] sm:$0xff] %v3620_v52  ;;  %v3626_v4 = vld [vmem:[#allocation7 + $0x1e0] ss:$16 sps:$4 sm:$0xff]   ;;  %p3101_p9 = pnand %p3100_p1, %p3094_p12 }
  0xd7   : > { %1018 = vmatpush1.bf16.msra.mxu1 %v3517_v30  ;;  %978 = vmatprep.subr.bf16.mxu0 %v3521_v31  ;;  %4554 = vst [vmem:[#allocation50_spill] sm:$0xff] %v3626_v4 }
  0xd8   : > { %1019 = vmatprep.subr.bf16.mxu1 %v3525_v32 }
  0xda   : > { %979 = vmatpush1.bf16.msra.mxu0 %v3527_v33 }
  0xdb   : > { %1020 = vmatpush1.bf16.msra.mxu1 %v3529_v34  ;;  %980 = vmatprep.subr.bf16.mxu0 %v3535_v36 }
  0xdc   : > { %1046 = vmatprep.subr.bf16.mxu1 %v3537_v37 }
  0xde   : > { %1038 = vmatmul.mubr.bf16.vlgmr.msra.gmra.mrb[0].mxu1 %v3539_v38  ;;  %981 = vmatpush1.bf16.msra.mxu0 %v3541_v39 }
  0xdf   : > { %1047 = vmatpush1.bf16.msra.mxu1 %v3543_v40  ;;  %982 = vmatprep.subr.bf16.mxu0 %v3547_v41 }
  0xe0   : > { %1048 = vmatprep.subr.bf16.mxu1 %v3551_v42  ;;  %1078 = vmatprep.mubr.bf16.mxu1 %v482_v54  ;;  %v3624_v54 = vld [vmem:[#allocation7 + $0xec] ss:$16 sps:$4 sm:$0xff]   ;;  %v3674_v42 = vld [vmem:[#allocation7 + $0x248] ss:$16 sps:$4 sm:$0xff]  }
  0xe1   : > { %4553 = vst [vmem:[#allocation49_spill] sm:$0xff] %v3624_v54  ;;  %4568 = vst [vmem:[#allocation63_spill] sm:$0xff] %v3674_v42 }
  0xe2   : > { %983 = vmatpush1.bf16.msra.mxu0 %v3554_v43 }
  0xe3   : > { %1049 = vmatpush1.bf16.msra.mxu1 %v3558_v44  ;;  %984 = vmatprep.subr.bf16.mxu0 %v3562_v45  ;;  %v3663_v44 = vld [vmem:[#allocation7 + $0x24c] ss:$16 sps:$4 sm:$0xff]  }
  0xe4   : > { %1050 = vmatprep.subr.bf16.mxu1 %v3564_v46  ;;  %v3661_v46 = vld [vmem:[#allocation7 + $0x14c] ss:$16 sps:$4 sm:$0xff]   ;;  %4565 = vst [vmem:[#allocation61_spill] sm:$0xff] %v3663_v44 }
  0xe5   : > { %4564 = vst [vmem:[#allocation60_spill] sm:$0xff] %v3661_v46 }
  0xe6   : > { %985 = vmatpush1.bf16.msra.mxu0 %v3566_v47 }
  0xe7   : > { %1051 = vmatpush1.bf16.msra.mxu1 %v3568_v48  ;;  %986 = vmatprep.subr.bf16.mxu0 %v3572_v49  ;;  %v3652_v48 = vld [vmem:[#allocation7 + $0x22c] ss:$16 sps:$4 sm:$0xff]  }
  0xe8   : > { %1052 = vmatprep.subr.bf16.mxu1 %v3576_v50  ;;  %v3650_v50 = vld [vmem:[#allocation7 + $0x12c] ss:$16 sps:$4 sm:$0xff]   ;;  %4561 = vst [vmem:[#allocation57_spill] sm:$0xff] %v3652_v48 }
  0xea   : > { %987 = vmatpush1.bf16.msra.mxu0 %v3578_v51 }
  0xeb   : > { %1053 = vmatpush1.bf16.msra.mxu1 %v3582_v53  ;;  %988 = vmatprep.subr.bf16.mxu0 %v3586_v55  ;;  %v3644_v53 = vld [vmem:[#allocation7 + $0x108] ss:$16 sps:$4 sm:$0xff]  }
  0xec   : > { %1054 = vmatprep.subr.bf16.mxu1 %v3588_v56  ;;  %v3638_v56 = vld [vmem:[#allocation7 + $0x20c] ss:$16 sps:$4 sm:$0xff]   ;;  %4559 = vst [vmem:[#allocation55_spill] sm:$0xff] %v3644_v53 }
  0xed   : > { %4558 = vst [vmem:[#allocation54_spill] sm:$0xff] %v3638_v56 }
  0xee   : > { %989 = vmatpush1.bf16.msra.mxu0 %v3592_v57 }
  0xef   : > { %1055 = vmatpush1.bf16.msra.mxu1 %v3594_v58  ;;  %990 = vmatprep.subr.bf16.mxu0 %v3596_v59  ;;  %v3636_v58 = vld [vmem:[#allocation7 + $0x10c] ss:$16 sps:$4 sm:$0xff]  }
  0xf0   : > { %1056 = vmatprep.subr.bf16.mxu1 %v3600_v60  ;;  %v3628_v60 = vld [vmem:[#allocation7 + $0xe8] ss:$16 sps:$4 sm:$0xff]   ;;  %4557 = vst [vmem:[#allocation53_spill] sm:$0xff] %v3636_v58 }
  0xf1   : > { %4555 = vst [vmem:[#allocation51_spill] sm:$0xff] %v3628_v60 }
  0xf2   : > { %991 = vmatpush1.bf16.msra.mxu0 %v3602_v61 }
  0xf3   : > { %1057 = vmatpush1.bf16.msra.mxu1 %v3606_v62  ;;  %992 = vmatprep.subr.bf16.mxu0 %v3610_v63  ;;  %v3632_v62 = vld [vmem:[#allocation3] sm:$0xff] }
  0xf4   : > { %1058 = vmatprep.subr.bf16.mxu1 %v3612_v0  ;;  %4556 = vst [vmem:[#allocation52_spill] sm:$0xff] %v3632_v62  ;;  %v3642_v0 = vpack.c.bf16 %v3632_v62, %v3632_v62  ;;  %v3658_v62 = vld [vmem:[#allocation7 + $0x228] ss:$16 sps:$4 sm:$0xff]  }
  0xf5   : > { %4563 = vst [vmem:[#allocation59_spill] sm:$0xff] %v3658_v62 }
  0xf6   : > { %993 = vmatpush1.bf16.msra.mxu0 %v3616_v1 }
  0xf7   : > { %1059 = vmatpush1.bf16.msra.mxu1 %v3618_v35  ;;  %994 = vmatprep.subr.bf16.mxu0 %v3620_v52  ;;  %v3648_v35 = vld [vmem:[#allocation7 + $0x208] ss:$16 sps:$4 sm:$0xff]  }
  0xf8   : > { %1060 = vmatprep.subr.bf16.mxu1 %v3624_v54  ;;  %4560 = vst [vmem:[#allocation56_spill] sm:$0xff] %v3648_v35  ;;  %v3656_v54 = vld [vmem:[#allocation7 + $0x128] ss:$16 sps:$4 sm:$0xff]  }
  0xf9   : > { %4562 = vst [vmem:[#allocation58_spill] sm:$0xff] %v3656_v54 }
  0xfa   : > { %995 = vmatpush1.bf16.msra.mxu0 %v3626_v4 }
  0xfb   : > { %1061 = vmatpush1.bf16.msra.mxu1 %v3628_v60  ;;  %1087 = vmatprep.subr.bf16.mxu0 %v3638_v56  ;;  %v3672_v60 = vld [vmem:[#allocation7 + $0x148] ss:$16 sps:$4 sm:$0xff]  }
  0xfc   : > { %1062 = vmatprep.subr.bf16.mxu1 %v3636_v58  ;;  %v4566_v58 = vmov 0   ;;  %4567 = vst [vmem:[#allocation62_spill] sm:$0xff] %v3672_v60 }
  0xfd   : > { %997 = vmatmul.mubr.bf16.vlgmr.msra.gmra.mrb[0].mxu0 %v3642_v0 }
  0xfe   : > { %1088 = vmatpush1.bf16.msra.mxu0 %v3648_v35  ;;  %1119 = vmatprep.mubr.bf16.mxu0 %v4566_v58  ;;  %v3680_v35 = vld [vmem:[#allocation7 + $0x26c] ss:$16 sps:$4 sm:$0xff]  }
  0xff   : > { %1063 = vmatpush1.bf16.msra.mxu1 %v3644_v53  ;;  %1089 = vmatprep.subr.bf16.mxu0 %v3652_v48  ;;  %v3678_v53 = vld [vmem:[#allocation7 + $0x16c] ss:$16 sps:$4 sm:$0xff]   ;;  %4570 = vst [vmem:[#allocation65_spill] sm:$0xff] %v3680_v35  ;;  %v3684_v48 = vld [vmem:[#allocation7 + $0x168] ss:$16 sps:$4 sm:$0xff]  }
 0x100   : > { %1064 = vmatprep.subr.bf16.mxu1 %v3650_v50  ;;  %4569 = vst [vmem:[#allocation64_spill] sm:$0xff] %v3678_v53  ;;  %4571 = vst [vmem:[#allocation66_spill] sm:$0xff] %v3684_v48 }
 0x102   : > { %1090 = vmatpush1.bf16.msra.mxu0 %v3658_v62  ;;  %v3690_v62 = vld [vmem:[#allocation7 + $0x18c] ss:$16 sps:$4 sm:$0xff]  }
 0x103   : > { %1065 = vmatpush1.bf16.msra.mxu1 %v3656_v54  ;;  %1091 = vmatprep.subr.bf16.mxu0 %v3663_v44  ;;  %v3686_v54 = vld [vmem:[#allocation7 + $0x268] ss:$16 sps:$4 sm:$0xff]   ;;  %4573 = vst [vmem:[#allocation68_spill] sm:$0xff] %v3690_v62 }
 0x104   : > { %1066 = vmatprep.subr.bf16.mxu1 %v3661_v46  ;;  %4572 = vst [vmem:[#allocation67_spill] sm:$0xff] %v3686_v54  ;;  %v3692_v46 = vld [vmem:[#allocation7 + $0x28c] ss:$16 sps:$4 sm:$0xff]   ;;  %v3696_v44 = vld [vmem:[#allocation7 + $0x188] ss:$16 sps:$4 sm:$0xff]  }
 0x105   : > { %4574 = vst [vmem:[#allocation69_spill] sm:$0xff] %v3692_v46  ;;  %4575 = vst [vmem:[#allocation70_spill] sm:$0xff] %v3696_v44 }
 0x106   : > { %1092 = vmatpush1.bf16.msra.mxu0 %v3674_v42  ;;  %v3702_v42 = vld [vmem:[#allocation7 + $0x1ac] ss:$16 sps:$4 sm:$0xff]  }
 0x107   : > { %1067 = vmatpush1.bf16.msra.mxu1 %v3672_v60  ;;  %1093 = vmatprep.subr.bf16.mxu0 %v3680_v35  ;;  %v3698_v60 = vld [vmem:[#allocation7 + $0x288] ss:$16 sps:$4 sm:$0xff]   ;;  %4577 = vst [vmem:[#allocation72_spill] sm:$0xff] %v3702_v42 }
 0x108   : > { %1068 = vmatprep.subr.bf16.mxu1 %v3678_v53  ;;  %4576 = vst [vmem:[#allocation71_spill] sm:$0xff] %v3698_v60  ;;  %v3704_v53 = vld [vmem:[#allocation7 + $0x2ac] ss:$16 sps:$4 sm:$0xff]   ;;  %v3708_v35 = vld [vmem:[#allocation7 + $0x1a8] ss:$16 sps:$4 sm:$0xff]  }
 0x109   : > { %4578 = vst [vmem:[#allocation73_spill] sm:$0xff] %v3704_v53  ;;  %4579 = vst [vmem:[#allocation74_spill] sm:$0xff] %v3708_v35 }
 0x10a   : > { %1094 = vmatpush1.bf16.msra.mxu0 %v3686_v54  ;;  %v3714_v54 = vld [vmem:[#allocation7 + $0x1cc] ss:$16 sps:$4 sm:$0xff]  }
 0x10b   : > { %1069 = vmatpush1.bf16.msra.mxu1 %v3684_v48  ;;  %1095 = vmatprep.subr.bf16.mxu0 %v3692_v46  ;;  %v3710_v48 = vld [vmem:[#allocation7 + $0x2a8] ss:$16 sps:$4 sm:$0xff]  }
 0x10c   : > { %1070 = vmatprep.subr.bf16.mxu1 %v3690_v62  ;;  %4580 = vst [vmem:[#allocation75_spill] sm:$0xff] %v3710_v48  ;;  %v3716_v62 = vld [vmem:[#allocation7 + $0x2cc] ss:$16 sps:$4 sm:$0xff]   ;;  %v3720_v46 = vld [vmem:[#allocation7 + $0x1c8] ss:$16 sps:$4 sm:$0xff]  }
 0x10d   : > { %4581 = vst [vmem:[#allocation76_spill] sm:$0xff] %v3716_v62 }
 0x10e   : > { %1096 = vmatpush1.bf16.msra.mxu0 %v3698_v60  ;;  %v3726_v60 = vld [vmem:[#allocation7 + $0x1ec] ss:$16 sps:$4 sm:$0xff]  }
 0x10f   : > { %1071 = vmatpush1.bf16.msra.mxu1 %v3696_v44  ;;  %1097 = vmatprep.subr.bf16.mxu0 %v3704_v53  ;;  %v3722_v44 = vld [vmem:[#allocation7 + $0x2c8] ss:$16 sps:$4 sm:$0xff]  }
 0x110   : > { %1072 = vmatprep.subr.bf16.mxu1 %v3702_v42  ;;  %4582 = vst [vmem:[#allocation77_spill] sm:$0xff] %v3722_v44  ;;  %v3728_v42 = vld [vmem:[#allocation7 + $0x2ec] ss:$16 sps:$4 sm:$0xff]   ;;  %v3732_v53 = vld [vmem:[#allocation7 + $0x1e8] ss:$16 sps:$4 sm:$0xff]  }
 0x111   : > { %4583 = vst [vmem:[#allocation78_spill] sm:$0xff] %v3728_v42 }
 0x112   : > { %1098 = vmatpush1.bf16.msra.mxu0 %v3710_v48 }
 0x113   : > { %1073 = vmatpush1.bf16.msra.mxu1 %v3708_v35  ;;  %1099 = vmatprep.subr.bf16.mxu0 %v3716_v62  ;;  %v3734_v35 = vld [vmem:[#allocation7 + $0x2e8] ss:$16 sps:$4 sm:$0xff]  }
 0x114   : > { %1074 = vmatprep.subr.bf16.mxu1 %v3714_v54  ;;  %4584 = vst [vmem:[#allocation79_spill] sm:$0xff] %v3734_v35 }
 0x116   : > { %1100 = vmatpush1.bf16.msra.mxu0 %v3722_v44 }
 0x117   : > { %1075 = vmatpush1.bf16.msra.mxu1 %v3720_v46  ;;  %1101 = vmatprep.subr.bf16.mxu0 %v3728_v42 }
 0x118   : > { %1076 = vmatprep.subr.bf16.mxu1 %v3726_v60 }
 0x11a   : > { %1102 = vmatpush1.bf16.msra.mxu0 %v3734_v35 }
 0x11b   : > { %1077 = vmatpush1.bf16.msra.mxu1 %v3732_v53 }
 0x11c   : > { %1289 = vmatprep.subr.bf16.mxu1 %v3440_v2 }
 0x11d   : > { %1120 = vmatmul.mubr.bf16.vlgmr.msra.gmra.mrb[4].mxu0 %v3539_v38 }
 0x11e   : > { %1079 = vmatmul.mubr.bf16.vlgmr.msra.gmra.mrb[4].mxu1 %v3642_v0 }
 0x11f   : > { %1290 = vmatpush1.bf16.msra.mxu1 %v3446_v5 }
 0x120   : > { %1291 = vmatprep.subr.bf16.mxu1 %v3451_v7 }
 0x123   : > { %1292 = vmatpush1.bf16.msra.mxu1 %v3457_v9 }
 0x124   : > { %1293 = vmatprep.subr.bf16.mxu1 %v3463_v11 }
 0x127   : > { %1294 = vmatpush1.bf16.msra.mxu1 %v3467_v13 }
 0x128   : > { %1295 = vmatprep.subr.bf16.mxu1 %v3473_v15  ;;  %v3775_v15 = vld [vmem:[#allocation9 + $0x8] sm:$0xff] }
 0x129   : > { %4585 = vst [vmem:[#allocation80_spill] sm:$0xff] %v3775_v15 }
 0x12b   : > { %1296 = vmatpush1.bf16.msra.mxu1 %v3479_v17 }
 0x12c   : > { %1297 = vmatprep.subr.bf16.mxu1 %v3485_v19 }
 0x12f   : > { %1298 = vmatpush1.bf16.msra.mxu1 %v3491_v21 }
 0x130   : > { %1299 = vmatprep.subr.bf16.mxu1 %v3497_v23 }
 0x133   : > { %1300 = vmatpush1.bf16.msra.mxu1 %v3503_v25 }
 0x134   : > { %1301 = vmatprep.subr.bf16.mxu1 %v3509_v27 }
 0x137   : > { %1302 = vmatpush1.bf16.msra.mxu1 %v3515_v29 }
 0x138   : > { %1303 = vmatprep.subr.bf16.mxu1 %v3521_v31 }
 0x13b   : > { %1304 = vmatpush1.bf16.msra.mxu1 %v3527_v33 }
 0x13c   : > { %1305 = vmatprep.subr.bf16.mxu1 %v3535_v36 }
 0x13f   : > { %1306 = vmatpush1.bf16.msra.mxu1 %v3541_v39 }
 0x140   : > { %1307 = vmatprep.subr.bf16.mxu1 %v3547_v41 }
 0x143   : > { %1308 = vmatpush1.bf16.msra.mxu1 %v3554_v43 }
 0x144   : > { %1309 = vmatprep.subr.bf16.mxu1 %v3562_v45 }
 0x147   : > { %1310 = vmatpush1.bf16.msra.mxu1 %v3566_v47 }
 0x148   : > { %1311 = vmatprep.subr.bf16.mxu1 %v3572_v49 }
 0x14b   : > { %1312 = vmatpush1.bf16.msra.mxu1 %v3578_v51 }
 0x14c   : > { %1313 = vmatprep.subr.bf16.mxu1 %v3586_v55 }
 0x14f   : > { %1314 = vmatpush1.bf16.msra.mxu1 %v3592_v57 }
 0x150   : > { %1315 = vmatprep.subr.bf16.mxu1 %v3596_v59 }
 0x153   : > { %1316 = vmatpush1.bf16.msra.mxu1 %v3602_v61 }
 0x154   : > { %1317 = vmatprep.subr.bf16.mxu1 %v3610_v63 }
 0x157   : > { %1318 = vmatpush1.bf16.msra.mxu1 %v3616_v1 }
 0x158   : > { %1319 = vmatprep.subr.bf16.mxu1 %v3620_v52 }
 0x15b   : > { %1320 = vmatpush1.bf16.msra.mxu1 %v3626_v4 }
 0x15c   : > { %1412 = vmatprep.subr.bf16.mxu1 %v3638_v56 }
 0x1b1   : > { %v1039_v2 = vpop.f32.mrb[0].mxu1 }
 0x1b2   : > { %v1041_v5 = vpop.f32.mrb[1].mxu1 }
 0x1b3   : > { %v1043_v7 = vpop.f32.mrb[2].mxu1 }
 0x1b4   : > { %v1044_v9 = vpop.f32.mrb[3].mxu1 }
 0x1d0   : > { %v998_v11 = vpop.f32.mrb[0].mxu0 }
 0x1d1   : > { %v1040_v13 = vadd.f32 %v1039_v2, %v998_v11  ;;  %v1000_v17 = vpop.f32.mrb[1].mxu0  ;;  %v3783_v2 = vld [vmem:[#allocation9 + $0x18] sm:$0xff] }
 0x1d2   : > { %v1042_v19 = vadd.f32 %v1041_v5, %v1000_v17  ;;  %v1002_v21 = vpop.f32.mrb[2].mxu0  ;;  %4586 = vst [vmem:[#allocation81_spill] sm:$0xff] %v3783_v2 }
 0x1d3   : > { %v1003_v38 = vpop.f32.mrb[3].mxu0 }
 0x1d4   : > { %v3778_v0 = vadd.f32 %v1042_v19, %v3775_v15  ;;  %v3788_v15 = vld [vmem:[#allocation9] sm:$0xff] }
 0x1d5   : > { %4587 = vst [vmem:[#allocation82_spill] sm:$0xff] %v3788_v15 }
 0x1d6   : > { %1134 = vadd.xlane.f32.xlu0 %v3778_v0  ;;  %v1145_v56 = vmul.f32 %v3778_v0, %v3778_v0 }
 0x1d8   : > { %1150 = vadd.xlane.f32.xlu1 %v1145_v56 }
 0x1f0   : > { %v1121_v7 = vpop.f32.mrb[4].mxu0 }
 0x1f1   : > { %v1080_v4 = vpop.f32.mrb[4].mxu1  ;;  %v1123_v11 = vpop.f32.mrb[5].mxu0 }
 0x1f2   : > { %v1122_v9 = vadd.f32 %v1121_v7, %v1080_v4  ;;  %v1082_v52 = vpop.f32.mrb[5].mxu1  ;;  %v1125_v17 = vpop.f32.mrb[6].mxu0  ;;  %v3793_v4 = vld [vmem:[#allocation9 + $0x10] sm:$0xff]  ;;  %v3796_v7 = vadd.f32 %v1040_v13, %v3788_v15  ;;  %v4475_v13 = vmov 0.0  }
 0x1f3   : > { %v1124_v1 = vadd.f32 %v1123_v11, %v1082_v52  ;;  %v1084_v5 = vpop.f32.mrb[6].mxu1  ;;  %v1126_v38 = vpop.f32.mrb[7].mxu0  ;;  %4588 = vst [vmem:[#allocation83_spill] sm:$0xff] %v3793_v4  ;;  %2414 = vmatprep.subr.bf16.mxu0 %v4475_v13  ;;  %v3816_v17 = vld [vmem:[#allocation13 + $0x10] sm:$0xff]   ;;  %2430 = vmatprep.mubr.msk.bf16.mxu0 %vm3186_vm0, %v4475_v13 }
 0x1f4   : > { %v1085_v21 = vpop.f32.mrb[7].mxu1  ;;  %v3799_v52 = vadd.f32 %v1122_v9, %v3793_v4  ;;  %v3807_v5 = vld [vmem:[#allocation13] sm:$0xff]   ;;  %v3812_v9 = vld [vmem:[#allocation13 + $0x8] sm:$0xff]   ;;  %4591 = vst [vmem:[#allocation86_spill] sm:$0xff] %v3816_v17 }
 0x1f5   : > { %v3786_v19 = vadd.f32 %v1124_v1, %v3783_v2  ;;  %v1144_v1 = vmul.f32 %v3796_v7, %v3796_v7  ;;  %4589 = vst [vmem:[#allocation84_spill] sm:$0xff] %v3807_v5  ;;  %2415 = vmatpush3.bf16.msra.mxu0 %v3807_v5  ;;  %4590 = vst [vmem:[#allocation85_spill] sm:$0xff] %v3812_v9  ;;  %v3820_v21 = vld [vmem:[#allocation13 + $0x18] sm:$0xff]   ;;  %v3823_v38 = vld [vmem:[#allocation13 + $0x20] sm:$0xff]  }
 0x1f6   : > { %v1146_v11 = vmul.f32 %v3799_v52, %v3799_v52  ;;  %2416 = vmatprep.subr.bf16.mxu0 %v4475_v13  ;;  %4592 = vst [vmem:[#allocation87_spill] sm:$0xff] %v3820_v21  ;;  %4593 = vst [vmem:[#allocation88_spill] sm:$0xff] %v3823_v38 }
 0x1f7   : > { %1138 = vadd.xlane.f32.xlu0 %v3786_v19  ;;  %v1147_v56 = vmul.f32 %v3786_v19, %v3786_v19 }
 0x1f9   : > { %1154 = vadd.xlane.f32.xlu1 %v1147_v56  ;;  %2417 = vmatpush3.bf16.msra.mxu0 %v3812_v9  ;;  %v3829_v56 = vld [vmem:[#allocation13 + $0x28] sm:$0xff]  }
 0x1fa   : > { %2418 = vmatprep.subr.bf16.mxu0 %v4475_v13  ;;  %4594 = vst [vmem:[#allocation89_spill] sm:$0xff] %v3829_v56 }
 0x1fb   : > { %1132 = vadd.xlane.f32.xlu0 %v3796_v7 }
 0x1fd   : > { %1136 = vadd.xlane.f32.xlu1 %v3799_v52  ;;  %2419 = vmatpush3.bf16.msra.mxu0 %v3816_v17 }
 0x1fe   : > { %2420 = vmatprep.subr.bf16.mxu0 %v4475_v13 }
 0x1ff   : > { %1148 = vadd.xlane.f32.xlu0 %v1144_v1  ;;  %v3833_v1 = vld [vmem:[#allocation13 + $0x30] sm:$0xff]  }
 0x200   : > { %4595 = vst [vmem:[#allocation90_spill] sm:$0xff] %v3833_v1 }
 0x201   : > { %1152 = vadd.xlane.f32.xlu1 %v1146_v11  ;;  %2421 = vmatpush3.bf16.msra.mxu0 %v3820_v21  ;;  %v3837_v11 = vld [vmem:[#allocation13 + $0x38] sm:$0xff]  }
 0x202   : > { %2422 = vmatprep.subr.bf16.mxu0 %v4475_v13  ;;  %4596 = vst [vmem:[#allocation91_spill] sm:$0xff] %v3837_v11 }
 0x205   : > { %2423 = vmatpush3.bf16.msra.mxu0 %v3823_v38 }
 0x206   : > { %2424 = vmatprep.subr.bf16.mxu0 %v4475_v13 }
 0x209   : > { %2425 = vmatpush3.bf16.msra.mxu0 %v3829_v56 }
 0x20a   : > { %2426 = vmatprep.subr.bf16.mxu0 %v4475_v13 }
 0x20d   : > { %2427 = vmatpush3.bf16.msra.mxu0 %v3833_v1 }
 0x20e   : > { %2428 = vmatprep.subr.bf16.mxu0 %v4475_v13 }
 0x211   : > { %2429 = vmatpush3.bf16.msra.mxu0 %v3837_v11 }
 0x212   : > { %1330 = vmatprep.subr.bf16.mxu0 %v3442_v3 }
 0x263   : > { %v1135_v4 = vpop.xlane.xlu0 %1134 }
 0x264   : > { %v1141_v2 = vmul.f32 0.03125, %v1135_v4 }
 0x265   : > { %v1151_v15 = vpop.xlane.xlu1 %1150 }
 0x266   : > { %v1161_v63 = vmul.f32 %v1141_v2, %v1141_v2  ;;  %v1157_v61 = vmul.f32 0.03125, %v1151_v15 }
 0x268   : > { %v1165_v56 = vsub.f32 %v1157_v61, %v1161_v63 }
 0x26a   : > { %v1173_v59 = vadd.f32 1e-05, %v1165_v56 }
 0x26c   : > { %2758 = vrsqrt.f32 %v1173_v59  ;;  %v1169_v59 = vsub.f32 %v3778_v0, %v1141_v2 }
 0x276   : > { %v2759_v56 = vpop.eup %2758 }
 0x284   : > { %v1139_v57 = vpop.xlane.xlu0 %1138 }
 0x285   : > { %v1143_v38 = vmul.f32 0.03125, %v1139_v57 }
 0x286   : > { %v1155_v55 = vpop.xlane.xlu1 %1154 }
 0x287   : > { %v1163_v1 = vmul.f32 %v1143_v38, %v1143_v38  ;;  %v1159_v51 = vmul.f32 0.03125, %v1155_v55 }
 0x288   : > { %v1133_v21 = vpop.xlane.xlu0 %1132 }
 0x289   : > { %v1167_v49 = vsub.f32 %v1159_v51, %v1163_v1  ;;  %v1140_v13 = vmul.f32 0.03125, %v1133_v21  ;;  %v1181_v51 = vmul.f32 %v2759_v56, %v1169_v59  ;;  %v3843_v21 = vld [vmem:[#allocation10 + $0x8] sm:$0xff]  ;;  %v3846_v1 = vld [vmem:[#allocation10 + $0x18] sm:$0xff] }
 0x28a   : > { %v1137_v47 = vpop.xlane.xlu1 %1136 }
 0x28b   : > { %v1175_v11 = vadd.f32 1e-05, %v1167_v49  ;;  %v1142_v17 = vmul.f32 0.03125, %v1137_v47  ;;  %v1160_v4 = vmul.f32 %v1140_v13, %v1140_v13  ;;  %v1171_v47 = vsub.f32 %v3786_v19, %v1143_v38  ;;  %v3857_v19 = vld [vmem:[#allocation10] sm:$0xff] }
 0x28c   : > { %v1149_v3 = vpop.xlane.xlu0 %1148  ;;  %v1168_v2 = vsub.f32 %v3796_v7, %v1140_v13  ;;  %v3865_v7 = vld [vmem:[#allocation12 + $0x10] sm:$0xff] }
 0x28d   : > { %2760 = vrsqrt.f32 %v1175_v11  ;;  %v1156_v45 = vmul.f32 0.03125, %v1149_v3  ;;  %v1162_v15 = vmul.f32 %v1142_v17, %v1142_v17  ;;  %v3851_v3 = vld [vmem:[#allocation12 + $0x18] sm:$0xff]  ;;  %v1170_v38 = vsub.f32 %v3799_v52, %v1142_v17 }
 0x28e   : > { %v1153_v43 = vpop.xlane.xlu1 %1152 }
 0x28f   : > { %v1164_v61 = vsub.f32 %v1156_v45, %v1160_v4  ;;  %v1158_v63 = vmul.f32 0.03125, %v1153_v43  ;;  %v1185_v45 = vmul.f32 %v1181_v51, %v3843_v21  ;;  %v3849_v43 = vld [vmem:[#allocation12 + $0x8] sm:$0xff]  ;;  %v3863_v51 = vld [vmem:[#allocation12] sm:$0xff] }
 0x291   : > { %v1172_v57 = vadd.f32 1e-05, %v1164_v61  ;;  %v1166_v9 = vsub.f32 %v1158_v63, %v1162_v15 }
 0x293   : > { %2762 = vrsqrt.f32 %v1172_v57  ;;  %v1174_v55 = vadd.f32 1e-05, %v1166_v9  ;;  %v1189_v9 = vadd.f32 %v1185_v45, %v3849_v43  ;;  %v3860_v57 = vld [vmem:[#allocation10 + $0x10] sm:$0xff] }
 0x295   : > { %2764 = vrsqrt.f32 %v1174_v55 }
 0x297   : > { %v2761_v49 = vpop.eup %2760 }
 0x298   : > { %v1183_v11 = vmul.f32 %v2761_v49, %v1171_v47 }
 0x29a   : > { %v1187_v0 = vmul.f32 %v1183_v11, %v3846_v1 }
 0x29c   : > { %v1191_v4 = vadd.f32 %v1187_v0, %v3851_v3 }
 0x29d   : > { %v2763_v15 = vpop.eup %2762 }
 0x29e   : > { %v1193_v61 = vadd.f32 %v1191_v4, %v1189_v9  ;;  %v1180_v63 = vmul.f32 %v2763_v15, %v1168_v2  ;;  %v4614_v2 = vld [vmem:[#allocation60_spill] sm:$0xff]  ;;  %v4615_v9 = vld [vmem:[#allocation62_spill] sm:$0xff] }
 0x29f   : > { %v2765_v56 = vpop.eup %2764  ;;  %v4616_v4 = vld [vmem:[#allocation64_spill] sm:$0xff]  ;;  %v4617_v15 = vld [vmem:[#allocation66_spill] sm:$0xff] }
 0x2a0   : > { %2766 = vtanh.f32 %v1193_v61  ;;  %v1182_v59 = vmul.f32 %v2765_v56, %v1170_v38  ;;  %v1184_v55 = vmul.f32 %v1180_v63, %v3857_v19  ;;  %v4618_v38 = vld [vmem:[#allocation68_spill] sm:$0xff]  ;;  %v4619_v61 = vld [vmem:[#allocation70_spill] sm:$0xff] }
 0x2a1   : > { %v4620_v63 = vld [vmem:[#allocation72_spill] sm:$0xff]  ;;  %v4621_v56 = vld [vmem:[#allocation74_spill] sm:$0xff] }
 0x2a2   : > { %v1186_v13 = vmul.f32 %v1182_v59, %v3860_v57  ;;  %v1188_v47 = vadd.f32 %v1184_v55, %v3863_v51  ;;  %v3928_v59 = vld [vmem:[%s4388_s6] sm:$0xff] }
 0x2a4   : > { %v1190_v49 = vadd.f32 %v1186_v13, %v3865_v7 }
 0x2a6   : > { %v1192_v52 = vadd.f32 %v1190_v49, %v1188_v47 }
 0x2a8   : > { %2768 = vtanh.f32 %v1192_v52  ;;  %v4622_v52 = vld [vmem:[#allocation52_spill] sm:$0xff] }
 0x2aa   : > { %v2767_v17 = vpop.eup %2766 }
 0x2ab   : > { %v3870_v11 = vpack.c.bf16 %v2767_v17, %v2767_v17 }
 0x2ad   : > { %2431 = vmatmul.mubr.bf16.vlgmr.msra.gmra.mrb[8].mxu0 %v3870_v11 }
 0x2ae   : > { %1331 = vmatpush1.bf16.msra.mxu0 %v3448_v6  ;;  %1362 = vmatprep.mubr.bf16.mxu0 %v4566_v58  ;;  %v4597_v6 = vld [vmem:[#allocation25_spill] sm:$0xff] }
 0x2af   : > { %1332 = vmatprep.subr.bf16.mxu0 %v3455_v8  ;;  %v4598_v8 = vld [vmem:[#allocation27_spill] sm:$0xff] }
 0x2b2   : > { %v2769_v45 = vpop.eup %2768  ;;  %1333 = vmatpush1.bf16.msra.mxu0 %v3460_v10  ;;  %v4599_v10 = vld [vmem:[#allocation29_spill] sm:$0xff] }
 0x2b3   : > { %1334 = vmatprep.subr.bf16.mxu0 %v3465_v12  ;;  %v1288_v0 = vpack.c.bf16 %v2769_v45, %v2769_v45  ;;  %v4600_v12 = vld [vmem:[#allocation31_spill] sm:$0xff] }
 0x2b5   : > { %1321 = vmatprep.mubr.bf16.mxu1 %v1288_v0 }
 0x2b6   : > { %1335 = vmatpush1.bf16.msra.mxu0 %v3469_v14  ;;  %v4601_v14 = vld [vmem:[#allocation33_spill] sm:$0xff] }
 0x2b7   : > { %1336 = vmatprep.subr.bf16.mxu0 %v3477_v16  ;;  %v4602_v16 = vld [vmem:[#allocation35_spill] sm:$0xff] }
 0x2ba   : > { %1337 = vmatpush1.bf16.msra.mxu0 %v3483_v18  ;;  %v4603_v18 = vld [vmem:[#allocation37_spill] sm:$0xff] }
 0x2bb   : > { %1338 = vmatprep.subr.bf16.mxu0 %v3489_v20  ;;  %v4604_v20 = vld [vmem:[#allocation39_spill] sm:$0xff] }
 0x2be   : > { %1339 = vmatpush1.bf16.msra.mxu0 %v3493_v22  ;;  %v4605_v22 = vld [vmem:[#allocation41_spill] sm:$0xff] }
 0x2bf   : > { %1340 = vmatprep.subr.bf16.mxu0 %v3501_v24  ;;  %v4606_v24 = vld [vmem:[#allocation43_spill] sm:$0xff] }
 0x2c2   : > { %1341 = vmatpush1.bf16.msra.mxu0 %v3507_v26  ;;  %v4607_v26 = vld [vmem:[#allocation45_spill] sm:$0xff] }
 0x2c3   : > { %1342 = vmatprep.subr.bf16.mxu0 %v3513_v28  ;;  %v4608_v28 = vld [vmem:[#allocation47_spill] sm:$0xff] }
 0x2c6   : > { %1343 = vmatpush1.bf16.msra.mxu0 %v3517_v30  ;;  %v4609_v30 = vld [vmem:[#allocation49_spill] sm:$0xff] }
 0x2c7   : > { %1344 = vmatprep.subr.bf16.mxu0 %v3525_v32  ;;  %v4610_v32 = vld [vmem:[#allocation51_spill] sm:$0xff] }
 0x2ca   : > { %1345 = vmatpush1.bf16.msra.mxu0 %v3529_v34  ;;  %v4611_v34 = vld [vmem:[#allocation53_spill] sm:$0xff] }
 0x2cb   : > { %1371 = vmatprep.subr.bf16.mxu0 %v3537_v37  ;;  %v4612_v37 = vld [vmem:[#allocation55_spill] sm:$0xff] }
 0x2cd   : > { %1363 = vmatmul.mubr.bf16.vlgmr.msra.gmra.mrb[12].mxu0 %v3870_v11 }
 0x2ce   : > { %1403 = vmatprep.mubr.bf16.mxu0 %v1288_v0  ;;  %1372 = vmatpush1.bf16.msra.mxu0 %v3543_v40  ;;  %v4613_v40 = vld [vmem:[#allocation58_spill] sm:$0xff] }
 0x2cf   : > { %1373 = vmatprep.subr.bf16.mxu0 %v4597_v6  ;;  %v4623_v6 = vld [vmem:[#allocation56_spill] sm:$0xff] }
 0x2d2   : > { %1374 = vmatpush1.bf16.msra.mxu0 %v4598_v8  ;;  %v4624_v8 = vld [vmem:[#allocation57_spill] sm:$0xff] }
 0x2d3   : > { %1375 = vmatprep.subr.bf16.mxu0 %v4599_v10  ;;  %v3941_v10 = vld [vmem:[#allocation7] ss:$16 sps:$4 sm:$0xff]  }
 0x2d6   : > { %1376 = vmatpush1.bf16.msra.mxu0 %v4600_v12  ;;  %v3944_v12 = vld [vmem:[#allocation7 + $0x24] ss:$16 sps:$4 sm:$0xff]  }
 0x2d7   : > { %1377 = vmatprep.subr.bf16.mxu0 %v4601_v14  ;;  %v4625_v14 = vld [vmem:[#allocation59_spill] sm:$0xff] }
 0x2da   : > { %1378 = vmatpush1.bf16.msra.mxu0 %v4602_v16  ;;  %v4626_v16 = vld [vmem:[#allocation61_spill] sm:$0xff] }
 0x2db   : > { %1379 = vmatprep.subr.bf16.mxu0 %v4603_v18  ;;  %v3949_v18 = vld [vmem:[#allocation7 + $0x20] ss:$16 sps:$4 sm:$0xff]  }
 0x2de   : > { %1380 = vmatpush1.bf16.msra.mxu0 %v4604_v20  ;;  %v3952_v20 = vld [vmem:[#allocation7 + $0x44] ss:$16 sps:$4 sm:$0xff]  }
 0x2df   : > { %1381 = vmatprep.subr.bf16.mxu0 %v4605_v22  ;;  %v4627_v22 = vld [vmem:[#allocation63_spill] sm:$0xff] }
 0x2e2   : > { %1382 = vmatpush1.bf16.msra.mxu0 %v4606_v24  ;;  %v4628_v24 = vld [vmem:[#allocation65_spill] sm:$0xff] }
 0x2e3   : > { %1383 = vmatprep.subr.bf16.mxu0 %v4607_v26  ;;  %v3957_v26 = vld [vmem:[#allocation7 + $0x40] ss:$16 sps:$4 sm:$0xff]  }
 0x2e6   : > { %1384 = vmatpush1.bf16.msra.mxu0 %v4608_v28  ;;  %v3960_v28 = vld [vmem:[#allocation7 + $0x64] ss:$16 sps:$4 sm:$0xff]  }
 0x2e7   : > { %1385 = vmatprep.subr.bf16.mxu0 %v4609_v30  ;;  %v4629_v30 = vld [vmem:[#allocation67_spill] sm:$0xff] }
 0x2ea   : > { %1386 = vmatpush1.bf16.msra.mxu0 %v4610_v32  ;;  %v4630_v32 = vld [vmem:[#allocation69_spill] sm:$0xff] }
 0x2eb   : > { %1387 = vmatprep.subr.bf16.mxu0 %v4611_v34  ;;  %v3965_v34 = vld [vmem:[#allocation7 + $0x60] ss:$16 sps:$4 sm:$0xff]  }
 0x2ee   : > { %1388 = vmatpush1.bf16.msra.mxu0 %v4612_v37  ;;  %v3968_v37 = vld [vmem:[#allocation7 + $0x84] ss:$16 sps:$4 sm:$0xff]  }
 0x2ef   : > { %1389 = vmatprep.subr.bf16.mxu0 %v3650_v50  ;;  %v3922_v50 = vld [vmem:[#allocation7 + $0x4] ss:$16 sps:$4 sm:$0xff]  }
 0x2f2   : > { %1390 = vmatpush1.bf16.msra.mxu0 %v4613_v40 }
 0x2f3   : > { %1391 = vmatprep.subr.bf16.mxu0 %v4614_v2 }
 0x2f6   : > { %1392 = vmatpush1.bf16.msra.mxu0 %v4615_v9 }
 0x2f7   : > { %1393 = vmatprep.subr.bf16.mxu0 %v4616_v4 }
 0x2fa   : > { %1394 = vmatpush1.bf16.msra.mxu0 %v4617_v15 }
 0x2fb   : > { %1395 = vmatprep.subr.bf16.mxu0 %v4618_v38 }
 0x2fe   : > { %1396 = vmatpush1.bf16.msra.mxu0 %v4619_v61 }
 0x2ff   : > { %1397 = vmatprep.subr.bf16.mxu0 %v4620_v63 }
 0x302   : > { %1398 = vmatpush1.bf16.msra.mxu0 %v4621_v56 }
 0x303   : > { %1399 = vmatprep.subr.bf16.mxu0 %v3714_v54 }
 0x306   : > { %1400 = vmatpush1.bf16.msra.mxu0 %v3720_v46 }
 0x307   : > { %1401 = vmatprep.subr.bf16.mxu0 %v3726_v60 }
 0x30a   : > { %1402 = vmatpush1.bf16.msra.mxu0 %v3732_v53 }
 0x30b   : > { %1567 = vmatprep.subr.bf16.mxu0 %v3922_v50 }
 0x380   : > { %v1279_v55 = vpop.f32.mrb[8].mxu0 }
 0x381   : > { %v1280_v13 = vadd.f32 %v1279_v55, %v3928_v59  ;;  %v2432_v47 = vpop.f32.mrb[9].mxu0  ;;  %v4631_v55 = vld [vmem:[#allocation71_spill] sm:$0xff] }
 0x382   : > { %v1282_v49 = vpop.f32.mrb[10].mxu0  ;;  %v3973_v47 = vld [vmem:[#allocation7 + $0x80] ss:$16 sps:$4 sm:$0xff]  }
 0x383   : > { %v3932_v17 = vadd.f32 %v1280_v13, %v4622_v52  ;;  %v2433_v45 = vpop.f32.mrb[11].mxu0  ;;  %v4632_v13 = vld [vmem:[#allocation73_spill] sm:$0xff]  ;;  %4633 = vst [vmem:[#allocation25_spill] sm:$0xff] %v3973_v47 }
 0x385   : > { %1286 = vst [vmem:[%s3436_s29] sm:$0xff] %v3932_v17  ;;  %v1287_v0 = vpack.c.bf16 %v3932_v17, %v3932_v17 }
 0x387   : > { %1322 = vmatmul.mubr.bf16.vlgmr.msra.gmra.mrb[8].mxu1 %v1287_v0  ;;  %1404 = vmatmul.mubr.bf16.vlgmr.msra.gmra.mrb[16].mxu0 %v1287_v0  ;;  %v4634_v0 = vmov 0.0  }
 0x388   : > { %1413 = vmatpush1.bf16.msra.mxu1 %v4623_v6  ;;  %1444 = vmatprep.mubr.bf16.mxu1 %v4566_v58  ;;  %v4644_v6 = vld [vmem:[#allocation88_spill] sm:$0xff] }
 0x389   : > { %1414 = vmatprep.subr.bf16.mxu1 %v4624_v8  ;;  %1568 = vmatpush1.bf16.msra.mxu0 %v3941_v10  ;;  %v4645_v8 = vld [vmem:[#allocation38_spill] sm:$0xff] }
 0x38a   : > { %1569 = vmatprep.subr.bf16.mxu0 %v3944_v12 }
 0x38c   : > { %1415 = vmatpush1.bf16.msra.mxu1 %v4625_v14  ;;  %v4646_v14 = vld [vmem:[#allocation40_spill] sm:$0xff] }
 0x38d   : > { %1416 = vmatprep.subr.bf16.mxu1 %v4626_v16  ;;  %1570 = vmatpush1.bf16.msra.mxu0 %v3949_v18  ;;  %v4647_v16 = vld [vmem:[#allocation89_spill] sm:$0xff] }
 0x38e   : > { %1571 = vmatprep.subr.bf16.mxu0 %v3952_v20 }
 0x390   : > { %1417 = vmatpush1.bf16.msra.mxu1 %v4627_v22  ;;  %v4648_v22 = vld [vmem:[#allocation42_spill] sm:$0xff] }
 0x391   : > { %1418 = vmatprep.subr.bf16.mxu1 %v4628_v24  ;;  %1572 = vmatpush1.bf16.msra.mxu0 %v3957_v26  ;;  %v4649_v24 = vld [vmem:[#allocation44_spill] sm:$0xff] }
 0x392   : > { %1573 = vmatprep.subr.bf16.mxu0 %v3960_v28 }
 0x394   : > { %1419 = vmatpush1.bf16.msra.mxu1 %v4629_v30 }
 0x395   : > { %1420 = vmatprep.subr.bf16.mxu1 %v4630_v32  ;;  %1574 = vmatpush1.bf16.msra.mxu0 %v3965_v34 }
 0x396   : > { %1575 = vmatprep.subr.bf16.mxu0 %v3968_v37 }
 0x398   : > { %1421 = vmatpush1.bf16.msra.mxu1 %v4631_v55 }
 0x399   : > { %1422 = vmatprep.subr.bf16.mxu1 %v4632_v13  ;;  %1576 = vmatpush1.bf16.msra.mxu0 %v3973_v47 }
 0x39a   : > { %1577 = vmatprep.subr.bf16.mxu0 %v3497_v23 }
 0x39c   : > { %1423 = vmatpush1.bf16.msra.mxu1 %v3710_v48 }
 0x39d   : > { %1424 = vmatprep.subr.bf16.mxu1 %v3716_v62  ;;  %1578 = vmatpush1.bf16.msra.mxu0 %v3503_v25  ;;  %v4635_v25 = vld [vmem:[#allocation85_spill] sm:$0xff] }
 0x39e   : > { %1579 = vmatprep.subr.bf16.mxu0 %v3509_v27  ;;  %v4636_v27 = vld [vmem:[#allocation26_spill] sm:$0xff] }
 0x3a0   : > { %v1364_v49 = vpop.f32.mrb[12].mxu0  ;;  %1425 = vmatpush1.bf16.msra.mxu1 %v3722_v44 }
 0x3a1   : > { %v1366_v52 = vpop.f32.mrb[13].mxu0  ;;  %1426 = vmatprep.subr.bf16.mxu1 %v3728_v42  ;;  %1580 = vmatpush1.bf16.msra.mxu0 %v3515_v29  ;;  %v4637_v29 = vld [vmem:[#allocation28_spill] sm:$0xff] }
 0x3a2   : > { %v1368_v45 = vpop.f32.mrb[14].mxu0  ;;  %1581 = vmatprep.subr.bf16.mxu0 %v3521_v31  ;;  %v4638_v31 = vld [vmem:[#allocation86_spill] sm:$0xff] }
 0x3a3   : > { %v1369_v23 = vpop.f32.mrb[15].mxu0  ;;  %v4650_v45 = vld [vmem:[#allocation90_spill] sm:$0xff] }
 0x3a4   : > { %1427 = vmatpush1.bf16.msra.mxu1 %v3734_v35  ;;  %v4651_v23 = vld [vmem:[#allocation46_spill] sm:$0xff] }
 0x3a5   : > { %2434 = vmatprep.subr.bf16.mxu1 %v4634_v0  ;;  %1582 = vmatpush1.bf16.msra.mxu0 %v3527_v33  ;;  %v4639_v33 = vld [vmem:[#allocation30_spill] sm:$0xff] }
 0x3a6   : > { %1583 = vmatprep.subr.bf16.mxu0 %v3535_v36  ;;  %v4640_v36 = vld [vmem:[#allocation32_spill] sm:$0xff] }
 0x3a7   : > { %1445 = vmatmul.mubr.bf16.vlgmr.msra.gmra.mrb[12].mxu1 %v3870_v11  ;;  %v4641_v11 = vld [vmem:[#allocation87_spill] sm:$0xff] }
 0x3a8   : > { %2435 = vmatpush3.bf16.msra.mxu1 %v3807_v5  ;;  %2450 = vmatprep.mubr.msk.bf16.mxu1 %vm3186_vm0, %v4634_v0 }
 0x3a9   : > { %2436 = vmatprep.subr.bf16.mxu1 %v4634_v0  ;;  %1584 = vmatpush1.bf16.msra.mxu0 %v3541_v39  ;;  %v4642_v39 = vld [vmem:[#allocation34_spill] sm:$0xff] }
 0x3aa   : > { %1585 = vmatprep.subr.bf16.mxu0 %v3547_v41  ;;  %v4643_v41 = vld [vmem:[#allocation36_spill] sm:$0xff] }
 0x3ac   : > { %2437 = vmatpush3.bf16.msra.mxu1 %v4635_v25 }
 0x3ad   : > { %2438 = vmatprep.subr.bf16.mxu1 %v4634_v0  ;;  %1586 = vmatpush1.bf16.msra.mxu0 %v4636_v27  ;;  %v4652_v27 = vld [vmem:[#allocation48_spill] sm:$0xff] }
 0x3ae   : > { %1587 = vmatprep.subr.bf16.mxu0 %v4637_v29  ;;  %v4653_v29 = vld [vmem:[#allocation91_spill] sm:$0xff] }
 0x3b0   : > { %2439 = vmatpush3.bf16.msra.mxu1 %v4638_v31 }
 0x3b1   : > { %2440 = vmatprep.subr.bf16.mxu1 %v4634_v0  ;;  %1588 = vmatpush1.bf16.msra.mxu0 %v4639_v33  ;;  %v4021_v33 = vld [vmem:[#allocation7 + $0x204] ss:$16 sps:$4 sm:$0xff]  }
 0x3b2   : > { %1589 = vmatprep.subr.bf16.mxu0 %v4640_v36  ;;  %4654 = vst [vmem:[#allocation27_spill] sm:$0xff] %v4021_v33  ;;  %v4655_v36 = vld [vmem:[#allocation50_spill] sm:$0xff] }
 0x3b4   : > { %2441 = vmatpush3.bf16.msra.mxu1 %v4641_v11  ;;  %v4657_v11 = vld [vmem:[#allocation80_spill] sm:$0xff] }
 0x3b5   : > { %2442 = vmatprep.subr.bf16.mxu1 %v4634_v0  ;;  %1590 = vmatpush1.bf16.msra.mxu0 %v4642_v39  ;;  %v4656_v39 = vld [vmem:[#allocation54_spill] sm:$0xff] }
 0x3b6   : > { %1591 = vmatprep.subr.bf16.mxu0 %v4643_v41 }
 0x3b8   : > { %2443 = vmatpush3.bf16.msra.mxu1 %v4644_v6 }
 0x3b9   : > { %2444 = vmatprep.subr.bf16.mxu1 %v4634_v0  ;;  %1592 = vmatpush1.bf16.msra.mxu0 %v4645_v8 }
 0x3ba   : > { %1593 = vmatprep.subr.bf16.mxu0 %v4646_v14 }
 0x3bc   : > { %2445 = vmatpush3.bf16.msra.mxu1 %v4647_v16 }
 0x3bd   : > { %2446 = vmatprep.subr.bf16.mxu1 %v4634_v0  ;;  %1594 = vmatpush1.bf16.msra.mxu0 %v4648_v22 }
 0x3be   : > { %1595 = vmatprep.subr.bf16.mxu0 %v4649_v24 }
 0x3c0   : > { %2447 = vmatpush3.bf16.msra.mxu1 %v4650_v45 }
 0x3c1   : > { %2448 = vmatprep.subr.bf16.mxu1 %v4634_v0  ;;  %1596 = vmatpush1.bf16.msra.mxu0 %v4651_v23 }
 0x3c2   : > { %1597 = vmatprep.subr.bf16.mxu0 %v4652_v27 }
 0x3c4   : > { %2449 = vmatpush3.bf16.msra.mxu1 %v4653_v29 }
 0x3c5   : > { %1608 = vmatprep.subr.bf16.mxu1 %v4021_v33  ;;  %1598 = vmatpush1.bf16.msra.mxu0 %v4655_v36  ;;  %v4658_v33 = vld [vmem:[#allocation82_spill] sm:$0xff] }
 0x3c6   : > { %1690 = vmatprep.subr.bf16.mxu0 %v4656_v39 }
 0x45a   : > { %v1323_v41 = vpop.f32.mrb[8].mxu1  ;;  %v1405_v8 = vpop.f32.mrb[16].mxu0 }
 0x45b   : > { %v1365_v14 = vadd.f32 %v1364_v49, %v1323_v41  ;;  %v1325_v22 = vpop.f32.mrb[9].mxu1  ;;  %v1407_v24 = vpop.f32.mrb[17].mxu0 }
 0x45c   : > { %v1367_v45 = vadd.f32 %v1366_v52, %v1325_v22  ;;  %v1327_v16 = vpop.f32.mrb[10].mxu1  ;;  %v1409_v23 = vpop.f32.mrb[18].mxu0  ;;  %v4659_v22 = vld [vmem:[#allocation81_spill] sm:$0xff] }
 0x45d   : > { %v1328_v6 = vpop.f32.mrb[11].mxu1  ;;  %v1410_v27 = vpop.f32.mrb[19].mxu0  ;;  %v4028_v25 = vadd.f32 %v1365_v14, %v4658_v33 }
 0x45e   : > { %v1454_v29 = vadd.f32 %v1367_v45, %v4657_v11 }
 0x45f   : > { %v1469_v49 = vmul.f32 %v4028_v25, %v4028_v25 }
 0x460   : > { %1459 = vadd.xlane.f32.xlu0 %v1454_v29  ;;  %v1470_v31 = vmul.f32 %v1454_v29, %v1454_v29 }
 0x464   : > { %1475 = vadd.xlane.f32.xlu0 %v1470_v31  ;;  %v4660_v31 = vld [vmem:[#allocation83_spill] sm:$0xff] }
 0x468   : > { %1457 = vadd.xlane.f32.xlu0 %v4028_v25 }
 0x46c   : > { %1473 = vadd.xlane.f32.xlu0 %v1469_v49 }
 0x47a   : > { %v1446_v36 = vpop.f32.mrb[12].mxu1 }
 0x47b   : > { %v1447_v52 = vadd.f32 %v1446_v36, %v1405_v8  ;;  %v1448_v16 = vpop.f32.mrb[13].mxu1 }
 0x47c   : > { %v1449_v39 = vadd.f32 %v1448_v16, %v1407_v24  ;;  %v1450_v6 = vpop.f32.mrb[14].mxu1 }
 0x47d   : > { %v1451_v41 = vpop.f32.mrb[15].mxu1  ;;  %v1455_v14 = vadd.f32 %v1447_v52, %v4660_v31 }
 0x47e   : > { %v1456_v45 = vadd.f32 %v1449_v39, %v4659_v22 }
 0x47f   : > { %v1471_v27 = vmul.f32 %v1455_v14, %v1455_v14 }
 0x480   : > { %1463 = vadd.xlane.f32.xlu1 %v1456_v45  ;;  %v1472_v23 = vmul.f32 %v1456_v45, %v1456_v45 }
 0x484   : > { %1479 = vadd.xlane.f32.xlu1 %v1472_v23 }
 0x488   : > { %1461 = vadd.xlane.f32.xlu1 %v1455_v14 }
 0x48c   : > { %1477 = vadd.xlane.f32.xlu1 %v1471_v27 }
 0x4ed   : > { %v1460_v33 = vpop.xlane.xlu0 %1459 }
 0x4ee   : > { %v1466_v5 = vmul.f32 0.03125, %v1460_v33 }
 0x4f0   : > { %v1486_v8 = vmul.f32 %v1466_v5, %v1466_v5 }
 0x4f1   : > { %v1476_v11 = vpop.xlane.xlu0 %1475 }
 0x4f2   : > { %v1482_v0 = vmul.f32 0.03125, %v1476_v11 }
 0x4f4   : > { %v1490_v36 = vsub.f32 %v1482_v0, %v1486_v8 }
 0x4f5   : > { %v1458_v49 = vpop.xlane.xlu0 %1457 }
 0x4f6   : > { %v1465_v16 = vmul.f32 0.03125, %v1458_v49  ;;  %v1498_v41 = vadd.f32 1e-05, %v1490_v36 }
 0x4f8   : > { %v1485_v35 = vmul.f32 %v1465_v16, %v1465_v16  ;;  %2770 = vrsqrt.f32 %v1498_v41 }
 0x4f9   : > { %v1474_v24 = vpop.xlane.xlu0 %1473 }
 0x4fa   : > { %v1481_v39 = vmul.f32 0.03125, %v1474_v24  ;;  %v1494_v24 = vsub.f32 %v1454_v29, %v1466_v5 }
 0x4fc   : > { %v1489_v52 = vsub.f32 %v1481_v39, %v1485_v35 }
 0x4fe   : > { %v1497_v62 = vadd.f32 1e-05, %v1489_v52 }
 0x502   : > { %v2771_v8 = vpop.eup %2770 }
 0x503   : > { %v1506_v47 = vmul.f32 %v2771_v8, %v1494_v24  ;;  %v4057_v24 = vld [vmem:[#allocation7 + $0x244] ss:$16 sps:$4 sm:$0xff]  }
 0x50d   : > { %v1464_v6 = vpop.xlane.xlu1 %1463 }
 0x50e   : > { %v1468_v22 = vmul.f32 0.03125, %v1464_v6 }
 0x510   : > { %v1488_v31 = vmul.f32 %v1468_v22, %v1468_v22  ;;  %v1496_v41 = vsub.f32 %v1456_v45, %v1468_v22 }
 0x511   : > { %v1480_v23 = vpop.xlane.xlu1 %1479 }
 0x512   : > { %v1484_v42 = vmul.f32 0.03125, %v1480_v23  ;;  %v1493_v23 = vsub.f32 %v4028_v25, %v1465_v16 }
 0x514   : > { %v1492_v27 = vsub.f32 %v1484_v42, %v1488_v31  ;;  %v1510_v42 = vmul.f32 %v1506_v47, %v3843_v21 }
 0x515   : > { %v1462_v44 = vpop.xlane.xlu1 %1461 }
 0x516   : > { %v1500_v33 = vadd.f32 1e-05, %v1492_v27  ;;  %v1467_v48 = vmul.f32 0.03125, %v1462_v44 }
 0x518   : > { %2772 = vrsqrt.f32 %v1500_v33  ;;  %v1487_v0 = vmul.f32 %v1467_v48, %v1467_v48  ;;  %v1495_v33 = vsub.f32 %v1455_v14, %v1467_v48  ;;  %v4047_v48 = vld [vmem:[#allocation7 + $0x200] ss:$16 sps:$4 sm:$0xff]   ;;  %v4051_v14 = vld [vmem:[#allocation7 + $0x224] ss:$16 sps:$4 sm:$0xff]  }
 0x519   : > { %v1478_v11 = vpop.xlane.xlu1 %1477  ;;  %2774 = vrsqrt.f32 %v1497_v62  ;;  %v1514_v62 = vadd.f32 %v1510_v42, %v3849_v43  ;;  %v4069_v42 = vld [vmem:[#allocation7 + $0x284] ss:$16 sps:$4 sm:$0xff]  }
 0x51a   : > { %v1483_v49 = vmul.f32 0.03125, %v1478_v11 }
 0x51c   : > { %v1491_v36 = vsub.f32 %v1483_v49, %v1487_v0 }
 0x51e   : > { %v1499_v6 = vadd.f32 1e-05, %v1491_v36  ;;  %v4054_v36 = vld [vmem:[#allocation7 + $0x220] ss:$16 sps:$4 sm:$0xff]  }
 0x520   : > { %2776 = vrsqrt.f32 %v1499_v6 }
 0x522   : > { %v2773_v35 = vpop.eup %2772 }
 0x523   : > { %v1508_v39 = vmul.f32 %v2773_v35, %v1496_v41  ;;  %v2775_v31 = vpop.eup %2774  ;;  %v4060_v41 = vld [vmem:[#allocation7 + $0x240] ss:$16 sps:$4 sm:$0xff]   ;;  %v4063_v35 = vld [vmem:[#allocation7 + $0x264] ss:$16 sps:$4 sm:$0xff]  }
 0x524   : > { %v1505_v27 = vmul.f32 %v2775_v31, %v1493_v23  ;;  %v4072_v31 = vld [vmem:[#allocation7 + $0x280] ss:$16 sps:$4 sm:$0xff]   ;;  %v4075_v23 = vld [vmem:[#allocation7 + $0x2a4] ss:$16 sps:$4 sm:$0xff]  }
 0x525   : > { %v1512_v44 = vmul.f32 %v1508_v39, %v3846_v1  ;;  %v4066_v39 = vld [vmem:[#allocation7 + $0x260] ss:$16 sps:$4 sm:$0xff]  }
 0x526   : > { %v1509_v22 = vmul.f32 %v1505_v27, %v3857_v19  ;;  %v4087_v27 = vld [vmem:[#allocation7 + $0x2e4] ss:$16 sps:$4 sm:$0xff]  }
 0x527   : > { %v1516_v52 = vadd.f32 %v1512_v44, %v3851_v3  ;;  %v4078_v44 = vld [vmem:[#allocation7 + $0x2a0] ss:$16 sps:$4 sm:$0xff]  }
 0x528   : > { %v1513_v47 = vadd.f32 %v1509_v22, %v3863_v51  ;;  %v4103_v22 = vld [vmem:[#allocation7 + $0x28] ss:$16 sps:$4 sm:$0xff]  }
 0x529   : > { %v1518_v5 = vadd.f32 %v1516_v52, %v1514_v62  ;;  %v4081_v62 = vld [vmem:[#allocation7 + $0x2c4] ss:$16 sps:$4 sm:$0xff]   ;;  %v4084_v52 = vld [vmem:[#allocation7 + $0x2c0] ss:$16 sps:$4 sm:$0xff]  }
 0x52a   : > { %v2777_v29 = vpop.eup %2776 }
 0x52b   : > { %2778 = vtanh.f32 %v1518_v5  ;;  %v1507_v11 = vmul.f32 %v2777_v29, %v1495_v33  ;;  %v4090_v33 = vld [vmem:[#allocation7 + $0x2e0] ss:$16 sps:$4 sm:$0xff]   ;;  %v4093_v5 = vld [vmem:[#allocation7 + $0xc] ss:$16 sps:$4 sm:$0xff]   ;;  %v4097_v29 = vld [vmem:[#allocation7 + $0x8] ss:$16 sps:$4 sm:$0xff]  }
 0x52d   : > { %v1511_v45 = vmul.f32 %v1507_v11, %v3860_v57  ;;  %v4100_v11 = vld [vmem:[#allocation7 + $0x2c] ss:$16 sps:$4 sm:$0xff]  }
 0x52f   : > { %v1515_v25 = vadd.f32 %v1511_v45, %v3865_v7  ;;  %v4106_v45 = vld [vmem:[#allocation7 + $0x4c] ss:$16 sps:$4 sm:$0xff]  }
 0x531   : > { %v1517_v16 = vadd.f32 %v1515_v25, %v1513_v47  ;;  %v4109_v47 = vld [vmem:[#allocation7 + $0x48] ss:$16 sps:$4 sm:$0xff]   ;;  %v4112_v25 = vld [vmem:[#allocation7 + $0x6c] ss:$16 sps:$4 sm:$0xff]  }
 0x532   : > { %4661 = vst [vmem:[#allocation29_spill] sm:$0xff] %v4109_v47  ;;  %4662 = vst [vmem:[#allocation31_spill] sm:$0xff] %v4112_v25 }
 0x533   : > { %2780 = vtanh.f32 %v1517_v16  ;;  %v4115_v16 = vld [vmem:[#allocation7 + $0x68] ss:$16 sps:$4 sm:$0xff]  }
 0x534   : > { %4663 = vst [vmem:[#allocation33_spill] sm:$0xff] %v4115_v16 }
 0x535   : > { %v2779_v0 = vpop.eup %2778 }
 0x536   : > { %v4044_v49 = vpack.c.bf16 %v2779_v0, %v2779_v0  ;;  %v4118_v0 = vld [vmem:[#allocation7 + $0x8c] ss:$16 sps:$4 sm:$0xff]  }
 0x537   : > { %4664 = vst [vmem:[#allocation35_spill] sm:$0xff] %v4118_v0 }
 0x538   : > { %2451 = vmatmul.mubr.bf16.vlgmr.msra.gmra.mrb[16].mxu1 %v4044_v49 }
 0x539   : > { %1609 = vmatpush1.bf16.msra.mxu1 %v4047_v48  ;;  %1640 = vmatprep.mubr.bf16.mxu1 %v4566_v58 }
 0x53a   : > { %1610 = vmatprep.subr.bf16.mxu1 %v4051_v14 }
 0x53d   : > { %v2781_v8 = vpop.eup %2780  ;;  %1611 = vmatpush1.bf16.msra.mxu1 %v4054_v36 }
 0x53e   : > { %1612 = vmatprep.subr.bf16.mxu1 %v4057_v24  ;;  %v1566_v6 = vpack.c.bf16 %v2781_v8, %v2781_v8  ;;  %v4121_v8 = vld [vmem:[#allocation7 + $0x88] ss:$16 sps:$4 sm:$0xff]  }
 0x53f   : > { %4665 = vst [vmem:[#allocation37_spill] sm:$0xff] %v4121_v8 }
 0x540   : > { %1599 = vmatprep.mubr.bf16.mxu0 %v1566_v6 }
 0x541   : > { %1613 = vmatpush1.bf16.msra.mxu1 %v4060_v41 }
 0x542   : > { %1614 = vmatprep.subr.bf16.mxu1 %v4063_v35 }
 0x545   : > { %1615 = vmatpush1.bf16.msra.mxu1 %v4066_v39 }
 0x546   : > { %1616 = vmatprep.subr.bf16.mxu1 %v4069_v42 }
 0x549   : > { %1617 = vmatpush1.bf16.msra.mxu1 %v4072_v31 }
 0x54a   : > { %1618 = vmatprep.subr.bf16.mxu1 %v4075_v23 }
 0x54d   : > { %1619 = vmatpush1.bf16.msra.mxu1 %v4078_v44 }
 0x54e   : > { %1620 = vmatprep.subr.bf16.mxu1 %v4081_v62 }
 0x551   : > { %1621 = vmatpush1.bf16.msra.mxu1 %v4084_v52 }
 0x552   : > { %1622 = vmatprep.subr.bf16.mxu1 %v4087_v27 }
 0x555   : > { %1623 = vmatpush1.bf16.msra.mxu1 %v4090_v33 }
 0x556   : > { %1649 = vmatprep.subr.bf16.mxu1 %v4093_v5 }
 0x558   : > { %1641 = vmatmul.mubr.bf16.vlgmr.msra.gmra.mrb[20].mxu1 %v4044_v49 }
 0x559   : > { %1681 = vmatprep.mubr.bf16.mxu1 %v1566_v6  ;;  %1650 = vmatpush1.bf16.msra.mxu1 %v4097_v29  ;;  %v4124_v6 = vld [vmem:[#allocation7 + $0xac] ss:$16 sps:$4 sm:$0xff]  }
 0x55a   : > { %1651 = vmatprep.subr.bf16.mxu1 %v4100_v11  ;;  %4666 = vst [vmem:[#allocation39_spill] sm:$0xff] %v4124_v6 }
 0x55d   : > { %1652 = vmatpush1.bf16.msra.mxu1 %v4103_v22 }
 0x55e   : > { %1653 = vmatprep.subr.bf16.mxu1 %v4106_v45 }
 0x561   : > { %1654 = vmatpush1.bf16.msra.mxu1 %v4109_v47  ;;  %v4127_v47 = vld [vmem:[#allocation7 + $0xa8] ss:$16 sps:$4 sm:$0xff]  }
 0x562   : > { %1655 = vmatprep.subr.bf16.mxu1 %v4112_v25  ;;  %4667 = vst [vmem:[#allocation41_spill] sm:$0xff] %v4127_v47  ;;  %v4130_v25 = vld [vmem:[#allocation7 + $0xcc] ss:$16 sps:$4 sm:$0xff]  }
 0x563   : > { %4668 = vst [vmem:[#allocation43_spill] sm:$0xff] %v4130_v25 }
 0x565   : > { %1656 = vmatpush1.bf16.msra.mxu1 %v4115_v16  ;;  %v4133_v16 = vld [vmem:[#allocation7 + $0xc8] ss:$16 sps:$4 sm:$0xff]  }
 0x566   : > { %1657 = vmatprep.subr.bf16.mxu1 %v4118_v0  ;;  %v4136_v0 = vld [vmem:[#allocation7 + $0xec] ss:$16 sps:$4 sm:$0xff]  }
 0x569   : > { %1658 = vmatpush1.bf16.msra.mxu1 %v4121_v8  ;;  %v4139_v8 = vld [vmem:[#allocation7 + $0xe8] ss:$16 sps:$4 sm:$0xff]  }
 0x56a   : > { %1659 = vmatprep.subr.bf16.mxu1 %v4124_v6  ;;  %v4142_v6 = vld [vmem:[#allocation7 + $0x10c] ss:$16 sps:$4 sm:$0xff]  }
 0x56d   : > { %1660 = vmatpush1.bf16.msra.mxu1 %v4127_v47  ;;  %v4145_v47 = vld [vmem:[#allocation7 + $0x108] ss:$16 sps:$4 sm:$0xff]  }
 0x56e   : > { %1661 = vmatprep.subr.bf16.mxu1 %v4130_v25  ;;  %v4148_v25 = vld [vmem:[#allocation7 + $0x12c] ss:$16 sps:$4 sm:$0xff]  }
 0x571   : > { %1662 = vmatpush1.bf16.msra.mxu1 %v4133_v16 }
 0x572   : > { %1663 = vmatprep.subr.bf16.mxu1 %v4136_v0 }
 0x575   : > { %1664 = vmatpush1.bf16.msra.mxu1 %v4139_v8 }
 0x576   : > { %1665 = vmatprep.subr.bf16.mxu1 %v4142_v6 }
 0x579   : > { %1666 = vmatpush1.bf16.msra.mxu1 %v4145_v47 }
 0x57a   : > { %1667 = vmatprep.subr.bf16.mxu1 %v4148_v25 }
 0x57d   : > { %1668 = vmatpush1.bf16.msra.mxu1 %v4613_v40 }
 0x57e   : > { %1669 = vmatprep.subr.bf16.mxu1 %v4614_v2 }
 0x581   : > { %1670 = vmatpush1.bf16.msra.mxu1 %v4615_v9 }
 0x582   : > { %1671 = vmatprep.subr.bf16.mxu1 %v4616_v4 }
 0x585   : > { %1672 = vmatpush1.bf16.msra.mxu1 %v4617_v15 }
 0x586   : > { %1673 = vmatprep.subr.bf16.mxu1 %v4618_v38 }
 0x589   : > { %1674 = vmatpush1.bf16.msra.mxu1 %v4619_v61  ;;  %v4185_v61 = vld [vmem:[#allocation7 + $0x24c] ss:$16 sps:$4 sm:$0xff]  }
 0x58a   : > { %1675 = vmatprep.subr.bf16.mxu1 %v4620_v63  ;;  %4672 = vst [vmem:[#allocation51_spill] sm:$0xff] %v4185_v61  ;;  %v4190_v63 = vld [vmem:[#allocation7 + $0x248] ss:$16 sps:$4 sm:$0xff]  }
 0x58b   : > { %4673 = vst [vmem:[#allocation53_spill] sm:$0xff] %v4190_v63 }
 0x58d   : > { %1676 = vmatpush1.bf16.msra.mxu1 %v4621_v56  ;;  %v4193_v56 = vld [vmem:[#allocation7 + $0x26c] ss:$16 sps:$4 sm:$0xff]  }
 0x58e   : > { %1677 = vmatprep.subr.bf16.mxu1 %v3714_v54  ;;  %v4182_v54 = vld [vmem:[#allocation7 + $0x228] ss:$16 sps:$4 sm:$0xff]   ;;  %4674 = vst [vmem:[#allocation55_spill] sm:$0xff] %v4193_v56 }
 0x58f   : > { %4671 = vst [vmem:[#allocation49_spill] sm:$0xff] %v4182_v54 }
 0x591   : > { %1678 = vmatpush1.bf16.msra.mxu1 %v3720_v46 }
 0x592   : > { %1679 = vmatprep.subr.bf16.mxu1 %v3726_v60  ;;  %v4173_v60 = vld [vmem:[#allocation7 + $0x208] ss:$16 sps:$4 sm:$0xff]  }
 0x593   : > { %4669 = vst [vmem:[#allocation45_spill] sm:$0xff] %v4173_v60 }
 0x595   : > { %1680 = vmatpush1.bf16.msra.mxu1 %v3732_v53  ;;  %v4177_v53 = vld [vmem:[#allocation7 + $0x22c] ss:$16 sps:$4 sm:$0xff]  }
 0x596   : > { %1845 = vmatprep.subr.bf16.mxu1 %v3922_v50  ;;  %4670 = vst [vmem:[#allocation47_spill] sm:$0xff] %v4177_v53  ;;  %v4675_v50 = vld [vmem:[#allocation25_spill] sm:$0xff] }
 0x60b   : > { %v1556_v40 = vpop.f32.mrb[16].mxu1 }
 0x60c   : > { %v1557_v2 = vadd.f32 %v1556_v40, %v3928_v59  ;;  %v2452_v9 = vpop.f32.mrb[17].mxu1  ;;  %v4680_v40 = vld [vmem:[#allocation79_spill] sm:$0xff] }
 0x60d   : > { %v1559_v4 = vpop.f32.mrb[18].mxu1  ;;  %v2862_v9 = vld [vmem:[#allocation7 + $0xe0] ss:$16 sps:$4 sm:$0xff]  }
 0x60e   : > { %v4167_v15 = vadd.f32 %v1557_v2, %v3932_v17  ;;  %v2453_v38 = vpop.f32.mrb[19].mxu1  ;;  %v2857_v17 = vld [vmem:[#allocation7 + $0xa4] ss:$16 sps:$4 sm:$0xff]   ;;  %v4681_v2 = vmov 0.0  }
 0x60f   : > { %v2863_v4 = vld [vmem:[#allocation7 + $0x104] ss:$16 sps:$4 sm:$0xff]   ;;  %v4682_v38 = vld [vmem:[#allocation84_spill] sm:$0xff] }
 0x610   : > { %2369 = vst [vmem:[%s3436_s29 + $0x8] sm:$0xff] %v4167_v15  ;;  %v1565_v46 = vpack.c.bf16 %v4167_v15, %v4167_v15 }
 0x612   : > { %1600 = vmatmul.mubr.bf16.vlgmr.msra.gmra.mrb[20].mxu0 %v1565_v46  ;;  %1682 = vmatmul.mubr.bf16.vlgmr.msra.gmra.mrb[24].mxu1 %v1565_v46  ;;  %v2864_v46 = vld [vmem:[#allocation7 + $0x100] ss:$16 sps:$4 sm:$0xff]  }
 0x613   : > { %1691 = vmatpush1.bf16.msra.mxu0 %v4173_v60  ;;  %1722 = vmatprep.mubr.bf16.mxu0 %v4566_v58 }
 0x614   : > { %1692 = vmatprep.subr.bf16.mxu0 %v4177_v53  ;;  %1846 = vmatpush1.bf16.msra.mxu1 %v3941_v10  ;;  %v4676_v10 = vld [vmem:[#allocation75_spill] sm:$0xff] }
 0x615   : > { %1847 = vmatprep.subr.bf16.mxu1 %v3944_v12  ;;  %v4677_v12 = vld [vmem:[#allocation76_spill] sm:$0xff] }
 0x617   : > { %1693 = vmatpush1.bf16.msra.mxu0 %v4182_v54 }
 0x618   : > { %1694 = vmatprep.subr.bf16.mxu0 %v4185_v61  ;;  %1848 = vmatpush1.bf16.msra.mxu1 %v3949_v18  ;;  %v2858_v18 = vld [vmem:[#allocation7 + $0xa0] ss:$16 sps:$4 sm:$0xff]  }
 0x619   : > { %1849 = vmatprep.subr.bf16.mxu1 %v3952_v20  ;;  %v2859_v20 = vld [vmem:[#allocation7 + $0xc4] ss:$16 sps:$4 sm:$0xff]  }
 0x61b   : > { %1695 = vmatpush1.bf16.msra.mxu0 %v4190_v63 }
 0x61c   : > { %1696 = vmatprep.subr.bf16.mxu0 %v4193_v56  ;;  %1850 = vmatpush1.bf16.msra.mxu1 %v3957_v26 }
 0x61d   : > { %1851 = vmatprep.subr.bf16.mxu1 %v3960_v28  ;;  %v4678_v28 = vld [vmem:[#allocation77_spill] sm:$0xff] }
 0x61f   : > { %1697 = vmatpush1.bf16.msra.mxu0 %v4629_v30 }
 0x620   : > { %1698 = vmatprep.subr.bf16.mxu0 %v4630_v32  ;;  %1852 = vmatpush1.bf16.msra.mxu1 %v3965_v34  ;;  %v4679_v32 = vld [vmem:[#allocation78_spill] sm:$0xff]  ;;  %v2860_v34 = vld [vmem:[#allocation7 + $0xc0] ss:$16 sps:$4 sm:$0xff]  }
 0x621   : > { %1853 = vmatprep.subr.bf16.mxu1 %v3968_v37 }
 0x623   : > { %1699 = vmatpush1.bf16.msra.mxu0 %v4631_v55  ;;  %v2861_v55 = vld [vmem:[#allocation7 + $0xe4] ss:$16 sps:$4 sm:$0xff]  }
 0x624   : > { %1700 = vmatprep.subr.bf16.mxu0 %v4632_v13  ;;  %1854 = vmatpush1.bf16.msra.mxu1 %v4675_v50  ;;  %v2865_v50 = vld [vmem:[#allocation7 + $0x124] ss:$16 sps:$4 sm:$0xff]  }
 0x625   : > { %1855 = vmatprep.subr.bf16.mxu1 %v2857_v17  ;;  %v4683_v17 = vld [vmem:[#allocation85_spill] sm:$0xff] }
 0x627   : > { %1701 = vmatpush1.bf16.msra.mxu0 %v4676_v10  ;;  %v2866_v10 = vld [vmem:[#allocation7 + $0x120] ss:$16 sps:$4 sm:$0xff]  }
 0x628   : > { %1702 = vmatprep.subr.bf16.mxu0 %v4677_v12  ;;  %1856 = vmatpush1.bf16.msra.mxu1 %v2858_v18  ;;  %v2867_v12 = vld [vmem:[#allocation7 + $0x144] ss:$16 sps:$4 sm:$0xff]   ;;  %v2868_v18 = vld [vmem:[#allocation7 + $0x140] ss:$16 sps:$4 sm:$0xff]  }
 0x629   : > { %1857 = vmatprep.subr.bf16.mxu1 %v2859_v20  ;;  %v2869_v20 = vld [vmem:[#allocation7 + $0x164] ss:$16 sps:$4 sm:$0xff]  }
 0x62b   : > { %v4207_v26 = vpop.f32.mrb[20].mxu1  ;;  %1703 = vmatpush1.bf16.msra.mxu0 %v4678_v28  ;;  %v4685_v28 = vld [vmem:[#allocation87_spill] sm:$0xff] }
 0x62c   : > { %v4210_v30 = vpop.f32.mrb[21].mxu1  ;;  %1704 = vmatprep.subr.bf16.mxu0 %v4679_v32  ;;  %1858 = vmatpush1.bf16.msra.mxu1 %v2860_v34  ;;  %v2870_v32 = vld [vmem:[#allocation7 + $0x160] ss:$16 sps:$4 sm:$0xff]   ;;  %v2871_v34 = vld [vmem:[#allocation7 + $0x184] ss:$16 sps:$4 sm:$0xff]  }
 0x62d   : > { %v1646_v37 = vpop.f32.mrb[22].mxu1  ;;  %1859 = vmatprep.subr.bf16.mxu1 %v2861_v55  ;;  %v2872_v55 = vld [vmem:[#allocation7 + $0x180] ss:$16 sps:$4 sm:$0xff]  }
 0x62e   : > { %v1647_v13 = vpop.f32.mrb[23].mxu1  ;;  %v4686_v37 = vld [vmem:[#allocation88_spill] sm:$0xff] }
 0x62f   : > { %1705 = vmatpush1.bf16.msra.mxu0 %v4680_v40  ;;  %v2873_v13 = vld [vmem:[#allocation7 + $0x1a4] ss:$16 sps:$4 sm:$0xff]  }
 0x630   : > { %2454 = vmatprep.subr.bf16.mxu0 %v4681_v2  ;;  %1860 = vmatpush1.bf16.msra.mxu1 %v2862_v9  ;;  %v4687_v40 = vld [vmem:[#allocation89_spill] sm:$0xff] }
 0x631   : > { %1861 = vmatprep.subr.bf16.mxu1 %v2863_v4  ;;  %v2874_v9 = vld [vmem:[#allocation7 + $0x1a0] ss:$16 sps:$4 sm:$0xff]   ;;  %v2875_v4 = vld [vmem:[#allocation7 + $0x1c4] ss:$16 sps:$4 sm:$0xff]  }
 0x632   : > { %1723 = vmatmul.mubr.bf16.vlgmr.msra.gmra.mrb[24].mxu0 %v4044_v49  ;;  %v4684_v49 = vld [vmem:[#allocation86_spill] sm:$0xff] }
 0x633   : > { %2455 = vmatpush3.bf16.msra.mxu0 %v4682_v38  ;;  %2470 = vmatprep.mubr.msk.bf16.mxu0 %vm3186_vm0, %v4681_v2  ;;  %v4688_v38 = vld [vmem:[#allocation90_spill] sm:$0xff] }
 0x634   : > { %2456 = vmatprep.subr.bf16.mxu0 %v4681_v2  ;;  %1862 = vmatpush1.bf16.msra.mxu1 %v2864_v46  ;;  %v2876_v46 = vld [vmem:[#allocation7 + $0x1c0] ss:$16 sps:$4 sm:$0xff]  }
 0x635   : > { %1863 = vmatprep.subr.bf16.mxu1 %v2865_v50  ;;  %v2877_v50 = vld [vmem:[#allocation7 + $0x1e4] ss:$16 sps:$4 sm:$0xff]  }
 0x637   : > { %2457 = vmatpush3.bf16.msra.mxu0 %v4683_v17  ;;  %v4689_v17 = vld [vmem:[#allocation91_spill] sm:$0xff] }
 0x638   : > { %2458 = vmatprep.subr.bf16.mxu0 %v4681_v2  ;;  %1864 = vmatpush1.bf16.msra.mxu1 %v2866_v10  ;;  %v4690_v10 = vld [vmem:[#allocation27_spill] sm:$0xff] }
 0x639   : > { %1865 = vmatprep.subr.bf16.mxu1 %v2867_v12  ;;  %v2878_v12 = vld [vmem:[#allocation7 + $0x1e0] ss:$16 sps:$4 sm:$0xff]  }
 0x63b   : > { %2459 = vmatpush3.bf16.msra.mxu0 %v4684_v49  ;;  %v2879_v49 = vld [vmem:[#allocation7 + $0x20c] ss:$16 sps:$4 sm:$0xff]  }
 0x63c   : > { %2460 = vmatprep.subr.bf16.mxu0 %v4681_v2  ;;  %1866 = vmatpush1.bf16.msra.mxu1 %v2868_v18 }
 0x63d   : > { %1867 = vmatprep.subr.bf16.mxu1 %v2869_v20 }
 0x63f   : > { %2461 = vmatpush3.bf16.msra.mxu0 %v4685_v28 }
 0x640   : > { %2462 = vmatprep.subr.bf16.mxu0 %v4681_v2  ;;  %1868 = vmatpush1.bf16.msra.mxu1 %v2870_v32 }
 0x641   : > { %1869 = vmatprep.subr.bf16.mxu1 %v2871_v34 }
 0x643   : > { %2463 = vmatpush3.bf16.msra.mxu0 %v4686_v37 }
 0x644   : > { %2464 = vmatprep.subr.bf16.mxu0 %v4681_v2  ;;  %1870 = vmatpush1.bf16.msra.mxu1 %v2872_v55 }
 0x645   : > { %1871 = vmatprep.subr.bf16.mxu1 %v2873_v13 }
 0x647   : > { %2465 = vmatpush3.bf16.msra.mxu0 %v4687_v40 }
 0x648   : > { %2466 = vmatprep.subr.bf16.mxu0 %v4681_v2  ;;  %1872 = vmatpush1.bf16.msra.mxu1 %v2874_v9 }
 0x649   : > { %1873 = vmatprep.subr.bf16.mxu1 %v2875_v4  ;;  %v4691_v4 = vld [vmem:[#allocation80_spill] sm:$0xff] }
 0x64b   : > { %2467 = vmatpush3.bf16.msra.mxu0 %v4688_v38 }
 0x64c   : > { %2468 = vmatprep.subr.bf16.mxu0 %v4681_v2  ;;  %1874 = vmatpush1.bf16.msra.mxu1 %v2876_v46 }
 0x64d   : > { %1875 = vmatprep.subr.bf16.mxu1 %v2877_v50  ;;  %v4692_v50 = vld [vmem:[#allocation82_spill] sm:$0xff] }
 0x64f   : > { %2469 = vmatpush3.bf16.msra.mxu0 %v4689_v17 }
 0x650   : > { %1886 = vmatprep.subr.bf16.mxu0 %v4690_v10  ;;  %1876 = vmatpush1.bf16.msra.mxu1 %v2878_v12 }
 0x651   : > { %1968 = vmatprep.subr.bf16.mxu1 %v2879_v49 }
 0x6e5   : > { %v1601_v18 = vpop.f32.mrb[20].mxu0  ;;  %v1683_v20 = vpop.f32.mrb[24].mxu1 }
 0x6e6   : > { %v1643_v28 = vadd.f32 %v4207_v26, %v1601_v18  ;;  %v1603_v32 = vpop.f32.mrb[21].mxu0  ;;  %v1685_v34 = vpop.f32.mrb[25].mxu1 }
 0x6e7   : > { %v1645_v37 = vadd.f32 %v4210_v30, %v1603_v32  ;;  %v1605_v55 = vpop.f32.mrb[22].mxu0  ;;  %v1687_v13 = vpop.f32.mrb[26].mxu1 }
 0x6e8   : > { %v1606_v40 = vpop.f32.mrb[23].mxu0  ;;  %v1688_v9 = vpop.f32.mrb[27].mxu1  ;;  %v4238_v17 = vadd.f32 %v1643_v28, %v4692_v50  ;;  %v4693_v55 = vld [vmem:[#allocation81_spill] sm:$0xff] }
 0x6e9   : > { %v1732_v38 = vadd.f32 %v1645_v37, %v4691_v4  ;;  %v4694_v40 = vld [vmem:[#allocation83_spill] sm:$0xff] }
 0x6ea   : > { %v1747_v26 = vmul.f32 %v4238_v17, %v4238_v17 }
 0x6eb   : > { %1737 = vadd.xlane.f32.xlu0 %v1732_v38  ;;  %v1748_v46 = vmul.f32 %v1732_v38, %v1732_v38 }
 0x6ef   : > { %1753 = vadd.xlane.f32.xlu0 %v1748_v46 }
 0x6f3   : > { %1735 = vadd.xlane.f32.xlu0 %v4238_v17 }
 0x6f7   : > { %1751 = vadd.xlane.f32.xlu0 %v1747_v26 }
 0x705   : > { %v1724_v10 = vpop.f32.mrb[24].mxu0 }
 0x706   : > { %v1725_v30 = vadd.f32 %v1724_v10, %v1683_v20  ;;  %v1726_v12 = vpop.f32.mrb[25].mxu0 }
 0x707   : > { %v1727_v49 = vadd.f32 %v1726_v12, %v1685_v34  ;;  %v1728_v18 = vpop.f32.mrb[26].mxu0 }
 0x708   : > { %v1729_v32 = vpop.f32.mrb[27].mxu0  ;;  %v1733_v28 = vadd.f32 %v1725_v30, %v4694_v40 }
 0x709   : > { %v1734_v37 = vadd.f32 %v1727_v49, %v4693_v55 }
 0x70a   : > { %v1749_v9 = vmul.f32 %v1733_v28, %v1733_v28 }
 0x70b   : > { %1741 = vadd.xlane.f32.xlu1 %v1734_v37  ;;  %v1750_v13 = vmul.f32 %v1734_v37, %v1734_v37 }
 0x70f   : > { %1757 = vadd.xlane.f32.xlu1 %v1750_v13 }
 0x713   : > { %1739 = vadd.xlane.f32.xlu1 %v1733_v28 }
 0x717   : > { %1755 = vadd.xlane.f32.xlu1 %v1749_v9 }
 0x778   : > { %v1738_v4 = vpop.xlane.xlu0 %1737 }
 0x779   : > { %v1744_v50 = vmul.f32 0.03125, %v1738_v4 }
 0x77b   : > { %v1764_v20 = vmul.f32 %v1744_v50, %v1744_v50 }
 0x77c   : > { %v1754_v46 = vpop.xlane.xlu0 %1753 }
 0x77d   : > { %v1760_v2 = vmul.f32 0.03125, %v1754_v46 }
 0x77f   : > { %v1768_v10 = vsub.f32 %v1760_v2, %v1764_v20 }
 0x780   : > { %v1736_v26 = vpop.xlane.xlu0 %1735 }
 0x781   : > { %v1743_v12 = vmul.f32 0.03125, %v1736_v26  ;;  %v1776_v32 = vadd.f32 1e-05, %v1768_v10 }
 0x783   : > { %v1763_v56 = vmul.f32 %v1743_v12, %v1743_v12  ;;  %2782 = vrsqrt.f32 %v1776_v32 }
 0x784   : > { %v1752_v34 = vpop.xlane.xlu0 %1751 }
 0x785   : > { %v1759_v49 = vmul.f32 0.03125, %v1752_v34  ;;  %v1772_v34 = vsub.f32 %v1732_v38, %v1744_v50 }
 0x787   : > { %v1767_v30 = vsub.f32 %v1759_v49, %v1763_v56 }
 0x789   : > { %v1775_v54 = vadd.f32 1e-05, %v1767_v30  ;;  %v1771_v30 = vsub.f32 %v4238_v17, %v1743_v12  ;;  %v4708_v12 = vld [vmem:[#allocation55_spill] sm:$0xff] }
 0x78d   : > { %v2783_v20 = vpop.eup %2782 }
 0x78e   : > { %v1784_v60 = vmul.f32 %v2783_v20, %v1772_v34  ;;  %v2895_v20 = vld [vmem:[#allocation7 + $0x288] ss:$16 sps:$4 sm:$0xff]  }
 0x78f   : > { %v2897_v34 = vld [vmem:[#allocation7 + $0x2a8] ss:$16 sps:$4 sm:$0xff]  }
 0x798   : > { %v1742_v18 = vpop.xlane.xlu1 %1741 }
 0x799   : > { %v1746_v55 = vmul.f32 0.03125, %v1742_v18 }
 0x79b   : > { %v1766_v40 = vmul.f32 %v1746_v55, %v1746_v55  ;;  %v1774_v32 = vsub.f32 %v1734_v37, %v1746_v55 }
 0x79c   : > { %v1758_v13 = vpop.xlane.xlu1 %1757 }
 0x79d   : > { %v1762_v63 = vmul.f32 0.03125, %v1758_v13 }
 0x79f   : > { %v1770_v9 = vsub.f32 %v1762_v63, %v1766_v40  ;;  %v1788_v63 = vmul.f32 %v1784_v60, %v3843_v21 }
 0x7a0   : > { %v1740_v61 = vpop.xlane.xlu1 %1739 }
 0x7a1   : > { %v1778_v4 = vadd.f32 1e-05, %v1770_v9  ;;  %v1745_v53 = vmul.f32 0.03125, %v1740_v61 }
 0x7a3   : > { %2784 = vrsqrt.f32 %v1778_v4  ;;  %v1765_v2 = vmul.f32 %v1745_v53, %v1745_v53  ;;  %v1773_v4 = vsub.f32 %v1733_v28, %v1745_v53  ;;  %v4704_v53 = vld [vmem:[#allocation47_spill] sm:$0xff] }
 0x7a4   : > { %v1756_v46 = vpop.xlane.xlu1 %1755  ;;  %2786 = vrsqrt.f32 %v1775_v54  ;;  %v1792_v54 = vadd.f32 %v1788_v63, %v3849_v43  ;;  %v4706_v28 = vld [vmem:[#allocation51_spill] sm:$0xff] }
 0x7a5   : > { %v1761_v26 = vmul.f32 0.03125, %v1756_v46 }
 0x7a7   : > { %v1769_v10 = vsub.f32 %v1761_v26, %v1765_v2  ;;  %v2893_v2 = vld [vmem:[#allocation7 + $0x268] ss:$16 sps:$4 sm:$0xff]   ;;  %v2894_v26 = vld [vmem:[#allocation7 + $0x28c] ss:$16 sps:$4 sm:$0xff]  }
 0x7a9   : > { %v1777_v18 = vadd.f32 1e-05, %v1769_v10  ;;  %v2896_v10 = vld [vmem:[#allocation7 + $0x2ac] ss:$16 sps:$4 sm:$0xff]  }
 0x7ab   : > { %2788 = vrsqrt.f32 %v1777_v18 }
 0x7ad   : > { %v2785_v56 = vpop.eup %2784 }
 0x7ae   : > { %v1786_v49 = vmul.f32 %v2785_v56, %v1774_v32  ;;  %v2787_v13 = vpop.eup %2786  ;;  %v2899_v32 = vld [vmem:[#allocation7 + $0x2c8] ss:$16 sps:$4 sm:$0xff]  }
 0x7af   : > { %v1783_v9 = vmul.f32 %v2787_v13, %v1771_v30  ;;  %v2901_v30 = vld [vmem:[#allocation7 + $0x2e8] ss:$16 sps:$4 sm:$0xff]  }
 0x7b0   : > { %v1790_v61 = vmul.f32 %v1786_v49, %v3846_v1  ;;  %v2900_v49 = vld [vmem:[#allocation7 + $0x2ec] ss:$16 sps:$4 sm:$0xff]  }
 0x7b1   : > { %v1787_v37 = vmul.f32 %v1783_v9, %v3857_v19  ;;  %v2904_v9 = vld [vmem:[#allocation13 + $0x10] sm:$0xff]  }
 0x7b2   : > { %v1794_v40 = vadd.f32 %v1790_v61, %v3851_v3  ;;  %v4709_v61 = vmov 0.0  }
 0x7b3   : > { %v1791_v21 = vadd.f32 %v1787_v37, %v3863_v51  ;;  %v4696_v51 = vld [vmem:[#allocation31_spill] sm:$0xff]  ;;  %v2909_v37 = vld [vmem:[#allocation13 + $0x38] sm:$0xff]  }
 0x7b4   : > { %v1796_v38 = vadd.f32 %v1794_v40, %v1792_v54  ;;  %v2902_v54 = vld [vmem:[#allocation13] sm:$0xff]   ;;  %v2903_v40 = vld [vmem:[#allocation13 + $0x8] sm:$0xff]  }
 0x7b5   : > { %v2789_v50 = vpop.eup %2788 }
 0x7b6   : > { %2790 = vtanh.f32 %v1796_v38  ;;  %v1785_v46 = vmul.f32 %v2789_v50, %v1773_v4  ;;  %v2905_v4 = vld [vmem:[#allocation13 + $0x18] sm:$0xff]   ;;  %v2906_v38 = vld [vmem:[#allocation13 + $0x20] sm:$0xff]   ;;  %v2907_v50 = vld [vmem:[#allocation13 + $0x28] sm:$0xff]  }
 0x7b8   : > { %v1789_v55 = vmul.f32 %v1785_v46, %v3860_v57  ;;  %v4695_v57 = vld [vmem:[#allocation29_spill] sm:$0xff]  ;;  %v2908_v46 = vld [vmem:[#allocation13 + $0x30] sm:$0xff]  }
 0x7ba   : > { %v1793_v60 = vadd.f32 %v1789_v55, %v3865_v7  ;;  %v4697_v7 = vld [vmem:[#allocation33_spill] sm:$0xff] }
 0x7bc   : > { %v1795_v17 = vadd.f32 %v1793_v60, %v1791_v21 }
 0x7be   : > { %2792 = vtanh.f32 %v1795_v17 }
 0x7c0   : > { %v2791_v1 = vpop.eup %2790 }
 0x7c1   : > { %v4254_v43 = vpack.c.bf16 %v2791_v1, %v2791_v1 }
 0x7c3   : > { %2471 = vmatmul.mubr.bf16.vlgmr.msra.gmra.mrb[28].mxu0 %v4254_v43 }
 0x7c4   : > { %1887 = vmatpush1.bf16.msra.mxu0 %v4047_v48  ;;  %1918 = vmatprep.mubr.bf16.mxu0 %v4566_v58  ;;  %v4698_v48 = vld [vmem:[#allocation35_spill] sm:$0xff] }
 0x7c5   : > { %1888 = vmatprep.subr.bf16.mxu0 %v4051_v14  ;;  %v4699_v14 = vld [vmem:[#allocation37_spill] sm:$0xff] }
 0x7c8   : > { %v2793_v3 = vpop.eup %2792  ;;  %1889 = vmatpush1.bf16.msra.mxu0 %v4054_v36  ;;  %v4700_v36 = vld [vmem:[#allocation39_spill] sm:$0xff] }
 0x7c9   : > { %1890 = vmatprep.subr.bf16.mxu0 %v4057_v24  ;;  %v1844_v19 = vpack.c.bf16 %v2793_v3, %v2793_v3  ;;  %v4701_v24 = vld [vmem:[#allocation41_spill] sm:$0xff] }
 0x7cb   : > { %1877 = vmatprep.mubr.bf16.mxu1 %v1844_v19 }
 0x7cc   : > { %1891 = vmatpush1.bf16.msra.mxu0 %v4060_v41  ;;  %v4702_v41 = vld [vmem:[#allocation43_spill] sm:$0xff] }
 0x7cd   : > { %1892 = vmatprep.subr.bf16.mxu0 %v4063_v35  ;;  %v2880_v35 = vld [vmem:[#allocation7 + $0x128] ss:$16 sps:$4 sm:$0xff]  }
 0x7d0   : > { %1893 = vmatpush1.bf16.msra.mxu0 %v4066_v39  ;;  %v2881_v39 = vld [vmem:[#allocation7 + $0x14c] ss:$16 sps:$4 sm:$0xff]  }
 0x7d1   : > { %1894 = vmatprep.subr.bf16.mxu0 %v4069_v42  ;;  %v2882_v42 = vld [vmem:[#allocation7 + $0x148] ss:$16 sps:$4 sm:$0xff]  }
 0x7d4   : > { %1895 = vmatpush1.bf16.msra.mxu0 %v4072_v31  ;;  %v2883_v31 = vld [vmem:[#allocation7 + $0x16c] ss:$16 sps:$4 sm:$0xff]  }
 0x7d5   : > { %1896 = vmatprep.subr.bf16.mxu0 %v4075_v23  ;;  %v2884_v23 = vld [vmem:[#allocation7 + $0x168] ss:$16 sps:$4 sm:$0xff]  }
 0x7d8   : > { %1897 = vmatpush1.bf16.msra.mxu0 %v4078_v44  ;;  %v2885_v44 = vld [vmem:[#allocation7 + $0x18c] ss:$16 sps:$4 sm:$0xff]  }
 0x7d9   : > { %1898 = vmatprep.subr.bf16.mxu0 %v4081_v62  ;;  %v2886_v62 = vld [vmem:[#allocation7 + $0x188] ss:$16 sps:$4 sm:$0xff]  }
 0x7dc   : > { %1899 = vmatpush1.bf16.msra.mxu0 %v4084_v52  ;;  %v2887_v52 = vld [vmem:[#allocation7 + $0x1ac] ss:$16 sps:$4 sm:$0xff]  }
 0x7dd   : > { %1900 = vmatprep.subr.bf16.mxu0 %v4087_v27  ;;  %v2888_v27 = vld [vmem:[#allocation7 + $0x1a8] ss:$16 sps:$4 sm:$0xff]  }
 0x7e0   : > { %1901 = vmatpush1.bf16.msra.mxu0 %v4090_v33  ;;  %v2889_v33 = vld [vmem:[#allocation7 + $0x1cc] ss:$16 sps:$4 sm:$0xff]  }
 0x7e1   : > { %1927 = vmatprep.subr.bf16.mxu0 %v4093_v5  ;;  %v2890_v5 = vld [vmem:[#allocation7 + $0x1c8] ss:$16 sps:$4 sm:$0xff]  }
 0x7e3   : > { %1919 = vmatmul.mubr.bf16.vlgmr.msra.gmra.mrb[32].mxu0 %v4254_v43 }
 0x7e4   : > { %1959 = vmatprep.mubr.bf16.mxu0 %v1844_v19  ;;  %1928 = vmatpush1.bf16.msra.mxu0 %v4097_v29  ;;  %v2891_v29 = vld [vmem:[#allocation7 + $0x1ec] ss:$16 sps:$4 sm:$0xff]  }
 0x7e5   : > { %1929 = vmatprep.subr.bf16.mxu0 %v4100_v11  ;;  %v2892_v11 = vld [vmem:[#allocation7 + $0x1e8] ss:$16 sps:$4 sm:$0xff]  }
 0x7e8   : > { %1930 = vmatpush1.bf16.msra.mxu0 %v4103_v22 }
 0x7e9   : > { %1931 = vmatprep.subr.bf16.mxu0 %v4106_v45 }
 0x7ec   : > { %1932 = vmatpush1.bf16.msra.mxu0 %v4695_v57 }
 0x7ed   : > { %1933 = vmatprep.subr.bf16.mxu0 %v4696_v51 }
 0x7f0   : > { %1934 = vmatpush1.bf16.msra.mxu0 %v4697_v7  ;;  %v2910_v7 = vld [vmem:[#allocation9 + $0x8] sm:$0xff] }
 0x7f1   : > { %1935 = vmatprep.subr.bf16.mxu0 %v4698_v48 }
 0x7f4   : > { %1936 = vmatpush1.bf16.msra.mxu0 %v4699_v14 }
 0x7f5   : > { %1937 = vmatprep.subr.bf16.mxu0 %v4700_v36  ;;  %v2911_v36 = vld [vmem:[#allocation9] sm:$0xff] }
 0x7f8   : > { %1938 = vmatpush1.bf16.msra.mxu0 %v4701_v24 }
 0x7f9   : > { %1939 = vmatprep.subr.bf16.mxu0 %v4702_v41 }
 0x7fc   : > { %1940 = vmatpush1.bf16.msra.mxu0 %v4133_v16 }
 0x7fd   : > { %1941 = vmatprep.subr.bf16.mxu0 %v4136_v0 }
 0x800   : > { %1942 = vmatpush1.bf16.msra.mxu0 %v4139_v8 }
 0x801   : > { %1943 = vmatprep.subr.bf16.mxu0 %v4142_v6  ;;  %v4703_v6 = vld [vmem:[#allocation45_spill] sm:$0xff] }
 0x804   : > { %1944 = vmatpush1.bf16.msra.mxu0 %v4145_v47 }
 0x805   : > { %1945 = vmatprep.subr.bf16.mxu0 %v4148_v25 }
 0x808   : > { %1946 = vmatpush1.bf16.msra.mxu0 %v2880_v35 }
 0x809   : > { %1947 = vmatprep.subr.bf16.mxu0 %v2881_v39 }
 0x80c   : > { %1948 = vmatpush1.bf16.msra.mxu0 %v2882_v42 }
 0x80d   : > { %1949 = vmatprep.subr.bf16.mxu0 %v2883_v31 }
 0x810   : > { %1950 = vmatpush1.bf16.msra.mxu0 %v2884_v23 }
 0x811   : > { %1951 = vmatprep.subr.bf16.mxu0 %v2885_v44 }
 0x814   : > { %1952 = vmatpush1.bf16.msra.mxu0 %v2886_v62  ;;  %v2912_v62 = vld [vmem:[#allocation9 + $0x18] sm:$0xff] }
 0x815   : > { %1953 = vmatprep.subr.bf16.mxu0 %v2887_v52 }
 0x818   : > { %1954 = vmatpush1.bf16.msra.mxu0 %v2888_v27 }
 0x819   : > { %1955 = vmatprep.subr.bf16.mxu0 %v2889_v33  ;;  %v2913_v33 = vld [vmem:[#allocation9 + $0x10] sm:$0xff] }
 0x81c   : > { %1956 = vmatpush1.bf16.msra.mxu0 %v2890_v5 }
 0x81d   : > { %1957 = vmatprep.subr.bf16.mxu0 %v2891_v29 }
 0x820   : > { %1958 = vmatpush1.bf16.msra.mxu0 %v2892_v11 }
 0x896   : > { %v1834_v22 = vpop.f32.mrb[28].mxu0 }
 0x897   : > { %v1835_v45 = vadd.f32 %v1834_v22, %v3928_v59  ;;  %v2472_v47 = vpop.f32.mrb[29].mxu0  ;;  %v4705_v59 = vld [vmem:[#allocation49_spill] sm:$0xff] }
 0x898   : > { %v1837_v25 = vpop.f32.mrb[30].mxu0 }
 0x899   : > { %v4295_v16 = vadd.f32 %v1835_v45, %v4167_v15  ;;  %v2473_v0 = vpop.f32.mrb[31].mxu0  ;;  %v4707_v15 = vld [vmem:[#allocation53_spill] sm:$0xff] }
 0x89b   : > { %2370 = vst [vmem:[%s3436_s29 + $0x10] sm:$0xff] %v4295_v16  ;;  %v1843_v8 = vpack.c.bf16 %v4295_v16, %v4295_v16 }
 0x89d   : > { %1878 = vmatmul.mubr.bf16.vlgmr.msra.gmra.mrb[28].mxu1 %v1843_v8  ;;  %1960 = vmatmul.mubr.bf16.vlgmr.msra.gmra.mrb[36].mxu0 %v1843_v8 }
 0x89e   : > { %1969 = vmatpush1.bf16.msra.mxu1 %v4703_v6  ;;  %2000 = vmatprep.mubr.bf16.mxu1 %v4566_v58  ;;  %v2898_v58 = vld [vmem:[#allocation7 + $0x2cc] ss:$16 sps:$4 sm:$0xff]  }
 0x89f   : > { %1970 = vmatprep.subr.bf16.mxu1 %v4704_v53 }
 0x8a2   : > { %1971 = vmatpush1.bf16.msra.mxu1 %v4705_v59 }
 0x8a3   : > { %1972 = vmatprep.subr.bf16.mxu1 %v4706_v28 }
 0x8a6   : > { %1973 = vmatpush1.bf16.msra.mxu1 %v4707_v15 }
 0x8a7   : > { %1974 = vmatprep.subr.bf16.mxu1 %v4708_v12 }
 0x8aa   : > { %1975 = vmatpush1.bf16.msra.mxu1 %v2893_v2 }
 0x8ab   : > { %1976 = vmatprep.subr.bf16.mxu1 %v2894_v26 }
 0x8ae   : > { %1977 = vmatpush1.bf16.msra.mxu1 %v2895_v20 }
 0x8af   : > { %1978 = vmatprep.subr.bf16.mxu1 %v2896_v10 }
 0x8b2   : > { %1979 = vmatpush1.bf16.msra.mxu1 %v2897_v34 }
 0x8b3   : > { %1980 = vmatprep.subr.bf16.mxu1 %v2898_v58 }
 0x8b6   : > { %v1920_v18 = vpop.f32.mrb[32].mxu0  ;;  %1981 = vmatpush1.bf16.msra.mxu1 %v2899_v32 }
 0x8b7   : > { %v1922_v56 = vpop.f32.mrb[33].mxu0  ;;  %1982 = vmatprep.subr.bf16.mxu1 %v2900_v49 }
 0x8b8   : > { %v1924_v63 = vpop.f32.mrb[34].mxu0 }
 0x8b9   : > { %v1925_v13 = vpop.f32.mrb[35].mxu0 }
 0x8ba   : > { %1983 = vmatpush1.bf16.msra.mxu1 %v2901_v30 }
 0x8bb   : > { %2474 = vmatprep.subr.bf16.mxu1 %v4709_v61 }
 0x8bd   : > { %2001 = vmatmul.mubr.bf16.vlgmr.msra.gmra.mrb[32].mxu1 %v4254_v43 }
 0x8be   : > { %2475 = vmatpush3.bf16.msra.mxu1 %v2902_v54  ;;  %2490 = vmatprep.mubr.msk.bf16.mxu1 %vm3186_vm0, %v4709_v61 }
 0x8bf   : > { %2476 = vmatprep.subr.bf16.mxu1 %v4709_v61 }
 0x8c2   : > { %2477 = vmatpush3.bf16.msra.mxu1 %v2903_v40 }
 0x8c3   : > { %2478 = vmatprep.subr.bf16.mxu1 %v4709_v61 }
 0x8c6   : > { %2479 = vmatpush3.bf16.msra.mxu1 %v2904_v9 }
 0x8c7   : > { %2480 = vmatprep.subr.bf16.mxu1 %v4709_v61 }
 0x8ca   : > { %2481 = vmatpush3.bf16.msra.mxu1 %v2905_v4 }
 0x8cb   : > { %2482 = vmatprep.subr.bf16.mxu1 %v4709_v61 }
 0x8ce   : > { %2483 = vmatpush3.bf16.msra.mxu1 %v2906_v38 }
 0x8cf   : > { %2484 = vmatprep.subr.bf16.mxu1 %v4709_v61 }
 0x8d2   : > { %2485 = vmatpush3.bf16.msra.mxu1 %v2907_v50 }
 0x8d3   : > { %2486 = vmatprep.subr.bf16.mxu1 %v4709_v61 }
 0x8d6   : > { %2487 = vmatpush3.bf16.msra.mxu1 %v2908_v46  ;;  %v2914_v46 = vld [vmem:[#allocation10 + $0x8] sm:$0xff] }
 0x8d7   : > { %2488 = vmatprep.subr.bf16.mxu1 %v4709_v61 }
 0x8da   : > { %2489 = vmatpush3.bf16.msra.mxu1 %v2909_v37 }
 0x970   : > { %v1879_v55 = vpop.f32.mrb[28].mxu1  ;;  %v1961_v21 = vpop.f32.mrb[36].mxu0 }
 0x971   : > { %v1921_v60 = vadd.f32 %v1920_v18, %v1879_v55  ;;  %v1881_v17 = vpop.f32.mrb[29].mxu1  ;;  %v1963_v1 = vpop.f32.mrb[37].mxu0 }
 0x972   : > { %v1923_v43 = vadd.f32 %v1922_v56, %v1881_v17  ;;  %v1883_v3 = vpop.f32.mrb[30].mxu1  ;;  %v1965_v19 = vpop.f32.mrb[38].mxu0  ;;  %v2915_v17 = vld [vmem:[#allocation10 + $0x18] sm:$0xff] }
 0x973   : > { %v1884_v57 = vpop.f32.mrb[31].mxu1  ;;  %v1966_v51 = vpop.f32.mrb[39].mxu0  ;;  %v4319_v24 = vadd.f32 %v2911_v36, %v1921_v60  ;;  %v2918_v36 = vld [vmem:[#allocation10] sm:$0xff] }
 0x974   : > { %v2010_v48 = vadd.f32 %v2910_v7, %v1923_v43  ;;  %v2916_v43 = vld [vmem:[#allocation12 + $0x8] sm:$0xff]  ;;  %v2917_v57 = vld [vmem:[#allocation12 + $0x18] sm:$0xff] }
 0x975   : > { %v2025_v41 = vmul.f32 %v4319_v24, %v4319_v24 }
 0x976   : > { %2015 = vadd.xlane.f32.xlu0 %v2010_v48  ;;  %v2026_v14 = vmul.f32 %v2010_v48, %v2010_v48 }
 0x97a   : > { %2031 = vadd.xlane.f32.xlu0 %v2026_v14 }
 0x97e   : > { %2013 = vadd.xlane.f32.xlu0 %v4319_v24 }
 0x982   : > { %2029 = vadd.xlane.f32.xlu0 %v2025_v41 }
 0x990   : > { %v2002_v35 = vpop.f32.mrb[32].mxu1 }
 0x991   : > { %v2003_v39 = vadd.f32 %v2002_v35, %v1961_v21  ;;  %v2004_v42 = vpop.f32.mrb[33].mxu1 }
 0x992   : > { %v2005_v31 = vadd.f32 %v2004_v42, %v1963_v1  ;;  %v2006_v23 = vpop.f32.mrb[34].mxu1 }
 0x993   : > { %v2007_v44 = vpop.f32.mrb[35].mxu1  ;;  %v2011_v5 = vadd.f32 %v2913_v33, %v2003_v39  ;;  %v2919_v39 = vld [vmem:[#allocation10 + $0x10] sm:$0xff] }
 0x994   : > { %v2012_v52 = vadd.f32 %v2912_v62, %v2005_v31  ;;  %v2920_v31 = vld [vmem:[#allocation12] sm:$0xff]  ;;  %v2921_v23 = vld [vmem:[#allocation12 + $0x10] sm:$0xff] }
 0x995   : > { %v2027_v29 = vmul.f32 %v2011_v5, %v2011_v5 }
 0x996   : > { %2019 = vadd.xlane.f32.xlu1 %v2012_v52  ;;  %v2028_v27 = vmul.f32 %v2012_v52, %v2012_v52 }
 0x99a   : > { %2035 = vadd.xlane.f32.xlu1 %v2028_v27 }
 0x99e   : > { %2017 = vadd.xlane.f32.xlu1 %v2011_v5 }
 0x9a2   : > { %2033 = vadd.xlane.f32.xlu1 %v2027_v29  ;;  %v2922_v29 = vld [vmem:[%s4388_s6] sm:$0xff] }
 0xa03   : > { %v2016_v11 = vpop.xlane.xlu0 %2015 }
 0xa04   : > { %v2022_v45 = vmul.f32 0.03125, %v2016_v11 }
 0xa06   : > { %v2042_v0 = vmul.f32 %v2022_v45, %v2022_v45  ;;  %v2050_v40 = vsub.f32 %v2010_v48, %v2022_v45 }
 0xa07   : > { %v2032_v22 = vpop.xlane.xlu0 %2031 }
 0xa08   : > { %v2038_v25 = vmul.f32 0.03125, %v2032_v22 }
 0xa0a   : > { %v2046_v8 = vsub.f32 %v2038_v25, %v2042_v0 }
 0xa0b   : > { %v2014_v47 = vpop.xlane.xlu0 %2013 }
 0xa0c   : > { %v2021_v53 = vmul.f32 0.03125, %v2014_v47  ;;  %v2054_v28 = vadd.f32 1e-05, %v2046_v8 }
 0xa0e   : > { %v2041_v2 = vmul.f32 %v2021_v53, %v2021_v53  ;;  %2794 = vrsqrt.f32 %v2054_v28  ;;  %v2049_v60 = vsub.f32 %v4319_v24, %v2021_v53 }
 0xa0f   : > { %v2030_v6 = vpop.xlane.xlu0 %2029 }
 0xa10   : > { %v2037_v15 = vmul.f32 0.03125, %v2030_v6 }
 0xa12   : > { %v2045_v20 = vsub.f32 %v2037_v15, %v2041_v2 }
 0xa14   : > { %v2053_v32 = vadd.f32 1e-05, %v2045_v20 }
 0xa18   : > { %v2795_v61 = vpop.eup %2794 }
 0xa19   : > { %v2062_v4 = vmul.f32 %v2795_v61, %v2050_v40 }
 0xa1b   : > { %v2066_v37 = vmul.f32 %v2914_v46, %v2062_v4 }
 0xa1d   : > { %v2070_v3 = vadd.f32 %v2916_v43, %v2066_v37 }
 0xa23   : > { %v2020_v59 = vpop.xlane.xlu1 %2019 }
 0xa24   : > { %v2024_v12 = vmul.f32 0.03125, %v2020_v59 }
 0xa26   : > { %v2044_v10 = vmul.f32 %v2024_v12, %v2024_v12  ;;  %v2052_v38 = vsub.f32 %v2012_v52, %v2024_v12 }
 0xa27   : > { %v2036_v26 = vpop.xlane.xlu1 %2035 }
 0xa28   : > { %v2040_v34 = vmul.f32 0.03125, %v2036_v26 }
 0xa2a   : > { %v2048_v58 = vsub.f32 %v2040_v34, %v2044_v10 }
 0xa2b   : > { %v2018_v18 = vpop.xlane.xlu1 %2017 }
 0xa2c   : > { %v2056_v56 = vadd.f32 1e-05, %v2048_v58  ;;  %v2023_v49 = vmul.f32 0.03125, %v2018_v18 }
 0xa2e   : > { %2796 = vrsqrt.f32 %v2056_v56  ;;  %v2043_v13 = vmul.f32 %v2023_v49, %v2023_v49  ;;  %v2051_v7 = vsub.f32 %v2011_v5, %v2023_v49 }
 0xa2f   : > { %v2034_v63 = vpop.xlane.xlu1 %2033  ;;  %2798 = vrsqrt.f32 %v2053_v32 }
 0xa30   : > { %v2039_v30 = vmul.f32 0.03125, %v2034_v63 }
 0xa32   : > { %v2047_v54 = vsub.f32 %v2039_v30, %v2043_v13 }
 0xa34   : > { %v2055_v9 = vadd.f32 1e-05, %v2047_v54 }
 0xa36   : > { %2800 = vrsqrt.f32 %v2055_v9 }
 0xa38   : > { %v2797_v50 = vpop.eup %2796 }
 0xa39   : > { %v2064_v55 = vmul.f32 %v2797_v50, %v2052_v38  ;;  %v2799_v21 = vpop.eup %2798 }
 0xa3a   : > { %v2061_v19 = vmul.f32 %v2799_v21, %v2049_v60 }
 0xa3b   : > { %v2068_v1 = vmul.f32 %v2915_v17, %v2064_v55 }
 0xa3c   : > { %v2065_v41 = vmul.f32 %v2918_v36, %v2061_v19 }
 0xa3d   : > { %v2072_v51 = vadd.f32 %v2917_v57, %v2068_v1 }
 0xa3e   : > { %v2069_v24 = vadd.f32 %v2920_v31, %v2065_v41 }
 0xa3f   : > { %v2074_v48 = vadd.f32 %v2072_v51, %v2070_v3 }
 0xa40   : > { %v2801_v14 = vpop.eup %2800 }
 0xa41   : > { %v2063_v35 = vmul.f32 %v2801_v14, %v2051_v7  ;;  %2802 = vtanh.f32 %v2074_v48 }
 0xa43   : > { %v2067_v42 = vmul.f32 %v2919_v39, %v2063_v35 }
 0xa45   : > { %v2071_v44 = vadd.f32 %v2921_v23, %v2067_v42 }
 0xa47   : > { %v2073_v62 = vadd.f32 %v2071_v44, %v2069_v24 }
 0xa49   : > { %2804 = vtanh.f32 %v2073_v62 }
 0xa4b   : > { %v2803_v52 = vpop.eup %2802 }
 0xa4c   : > { %v2077_v27 = vpack.c.bf16 %v2803_v52, %v2803_v52  ;;  %2123 = vst [vmem:[#allocation2 + $0x8] sm:$0xff] %v2803_v52 }
 0xa4e   : > { %2491 = vmatmul.mubr.bf16.vlgmr.msra.gmra.mrb[36].mxu1 %v2077_v27 }
 0xa53   : > { %v2805_v33 = vpop.eup %2804 }
 0xa54   : > { %2122 = vst [vmem:[#allocation2] sm:$0xff] %v2805_v33 }
 0xb21   : > { %v2112_v5 = vpop.f32.mrb[36].mxu1 }
 0xb22   : > { %v2113_v11 = vadd.f32 %v2922_v29, %v2112_v5  ;;  %v2492_v22 = vpop.f32.mrb[37].mxu1 }
 0xb23   : > { %v2115_v45 = vpop.f32.mrb[38].mxu1 }
 0xb24   : > { %v2118_v47 = vadd.f32 %v2113_v11, %v4295_v16  ;;  %v2493_v25 = vpop.f32.mrb[39].mxu1 }
 0xb26   : > { %2371 = vst [vmem:[%s3436_s29 + $0x18] sm:$0xff] %v2118_v47  ;;  %2121 = vst [vmem:[#allocation3] sm:$0xff] %v2118_v47 }
 0xb27   : > { %3104 = shalt.err (!%p3101_p9)
}
 0xb28   : > { %s3105_s18 = scalar_lea.hbm %s4333_s9, 512  ;;  %s3109_s16 = scalar_lea.hbm %s4389_s7, 1024 }
 0xb29   : > { %p3106_p10 = scmp.ne.s32.totalorder %s4333_s9, %s3105_s18  ;;  %p3110_p0 = scmp.lt.u32.totalorder %s4333_s9, %s4389_s7 }
 0xb2a   : > { %p3111_p2 = scmp.lt.u32.totalorder %s3109_s16, %s3105_s18  ;;  %p3113_p4 = scmp.lt.u32.totalorder %s3105_s18, %s4333_s9 }
 0xb2b   : > { %p3107_p11 = pnand %p3106_p10, %p4710_p7 }
 0xb2c   : > { %p3112_p3 = por %p3111_p2, %p3110_p0 }
 0xb2d   : > { %p3108_p13 = pneg %p3107_p11 }
 0xb2e   : > { %p3114_p8 = por %p3113_p4, %p3112_p3 }
 0xb30   : > { %p3115_p12 = pnand %p3114_p8, %p3108_p13 }
 0xb32   : > { %3118 = shalt.err (!%p3115_p12)
}
 0xb33   : > { %s3188_s15 = smov 128   ;;  %s3189_s30 = smov 8  }
 0xb34   : > { %2518 = dma.vmem_to_hbm [thread:$0]  (%p4710_p7), %s4335_s12, 512, %s4333_s9, %s4341_s28, %s3188_s15, %s3188_s15, %s3189_s30  }
 0xb35 PF: > { %s4711_s20 = sld [smem:[#allocation24_spill]]  ;;  %p2555_p5 = scmp.ge.s32.totalorder %s3169_s27, 2 }
 0xb36   : > { %s2153_s21 = sand.u32 1, %s3157_s24  }
 0xb37   : > { %s2154_s22 = scalar_lea.sflag [#allocation6], %s2153_s21 }
 0xb3b   : > { %p4712_p6 = scmp.ne.s32.totalorder %s4711_s20, 0 }
 0xb3d   : > { %p2540_p1 = pnand %p2555_p5, %p4712_p6 }
 0xb3f   : > { %3152 = dma.done.wait (!%p2540_p1), %s2154_s22, 512  }
 0xb40   : > { %3154 = vsyncadd (!%p2540_p1), %s2154_s22, 4294966784  ;;  %s4713_s27 = sld [smem:[#allocation22_spill]]  ;;  %s4714_s8 = sld [smem:[#allocation21_spill]] }
 0xb41   : > { %s4715_s26 = sld [smem:[#allocation23_spill]]  ;;  %s4716_s24 = smov %s3161_s25 }
 0xb46   : > { %p21_p9 = scmp.ge.s32.totalorder %s4713_s27, 4   ;;  %s4717_s25 = smov %s4714_s8 }
 0xb48   :  { %23 = sbr.rel (!%p21_p9) target bundleno = 7 (0x7), region = 112 }
 0xb4f   :  { %2159 = vsyncpa [#allocation5], 1 }
 0xb50   :  { %2161 = vsyncpa [#allocation5 + $0x1], 1 }
 0xb51   :  { %2162 = vsyncpa [#allocation8], 1 }
 0xb52   :  { %2163 = vsyncpa [#allocation11], 1 }
 0xb53   :  { %2164 = vsyncpa [#allocation14], 1 }
 0xb54   :  { %2165 = vsyncpa [#allocation6], 1 }
 0xb55   :  { %2167 = vsyncpa [#allocation6 + $0x1], 1 }

</bundles_post_ra>
